<compile_context>
chip_gen: v7x
topology: tpu7x:2x2x1
jax: 0.10.0
libtpu: 0.0.40
codegen_flags: <defaults>
</compile_context>

<pallas_src>
import functools

import jax
import jax.numpy as jnp
from jax.experimental import pallas as pl
from jax.experimental.pallas import tpu as pltpu

# ---- module hyper-parameters (small, deterministic, synthetic) --------------
INPUT_EMB_WIDTH = 3
OUTPUT_EMB_WIDTH = 32
WIDTH = 32
DOWN_T = 3
DEPTH = 3
DGR = 3
DILATIONS = [DGR ** d for d in range(DEPTH)][::-1]   # reverse_dilation=True -> [9, 3, 1]

LANES = 128    # channel axis zero-padded to one full vreg lane width
PAD = 16       # time halo in the activation scratch (>= max dilation 9, sublane aligned)

NUM_K3 = 1 + DOWN_T * (DEPTH + 1) + 2   # 15 stacked k=3 convs
NUM_R1 = DOWN_T * DEPTH                 # 9 stacked 1x1 convs


# ---------------------------- fused Pallas kernel -----------------------------
def _decoder_kernel(x_ref, wk3_ref, bk3_ref, w1_ref, b1_ref, o_ref, act_ref, *, T0):
    """Whole decoder forward for one batch element, fully VMEM-resident.

    x_ref  : (1, T0, LANES)              channel-padded input (N,T,C layout)
    wk3_ref: (NUM_K3, 3*LANES, LANES)    stacked tap-folded k=3 conv weights
    bk3_ref: (NUM_K3, 1, LANES)
    w1_ref : (NUM_R1, LANES, LANES)      stacked 1x1 conv weights
    b1_ref : (NUM_R1, 1, LANES)
    o_ref  : (1, T0 * 2**DOWN_T, LANES)
    act_ref: (PAD + T_out + PAD, LANES)  activation scratch; halos stay zero so
                                         dilated taps outside [0, T) read zeros
                                         (== PyTorch zero padding).
    """
    # Zero the scratch (establishes the zero halos), drop the input in the center.
    act_ref[...] = jnp.zeros_like(act_ref)
    act_ref[pl.ds(PAD, T0), :] = x_ref[0]

    def load_act(T):
        return act_ref[pl.ds(PAD, T), :]

    def store_act(T, val):
        act_ref[pl.ds(PAD, T), :] = val

    def conv3(T, widx, dil, relu_in):
        # Taps folded into one K = 3*LANES contraction: operand columns are
        # [x[t-d] | x[t] | x[t+d]]; halo rows are zero == torch zero padding.
        left = act_ref[pl.ds(PAD - dil, T), :]
        mid = act_ref[pl.ds(PAD, T), :]
        right = act_ref[pl.ds(PAD + dil, T), :]
        op = jnp.concatenate([left, mid, right], axis=1)      # (T, 3*LANES)
        if relu_in:
            op = jnp.maximum(op, 0.0)                         # relu(0)==0: halo stays valid
        out = jnp.dot(op, wk3_ref[widx], preferred_element_type=jnp.float32)
        return out + bk3_ref[widx]

    def res_block(T, k3_idx, r_idx, dil):
        x_cur = load_act(T)
        h = jnp.maximum(conv3(T, k3_idx, dil, relu_in=True), 0.0)
        h = jnp.dot(h, w1_ref[r_idx], preferred_element_type=jnp.float32) + b1_ref[r_idx]
        store_act(T, x_cur + h)

    def upsample2(T):
        # nearest-neighbor x2 as a matmul with a constant 0/1 selection matrix:
        # out[i] = x[i // 2]  <=>  sel[i, j] = (i - 2j) in {0, 1}
        x_cur = load_act(T)
        rows = jax.lax.broadcasted_iota(jnp.int32, (2 * T, T), 0)
        cols = jax.lax.broadcasted_iota(jnp.int32, (2 * T, T), 1)
        diff = rows - 2 * cols
        sel = jnp.where(jnp.logical_and(diff >= 0, diff <= 1), 1.0, 0.0)
        store_act(2 * T, jnp.dot(sel, x_cur, preferred_element_type=jnp.float32))

    T = T0
    k3 = 0
    r1 = 0

    # Conv1d(output_emb_width, width, 3) -> ReLU
    store_act(T, jnp.maximum(conv3(T, k3, 1, relu_in=False), 0.0))
    k3 += 1

    # down_t x [ Resnet1D (dilations [9,3,1]) -> Upsample(x2) -> Conv1d(k3) ]
    for _ in range(DOWN_T):
        for d in DILATIONS:
            res_block(T, k3, r1, d)
            k3 += 1
            r1 += 1
        upsample2(T)
        T *= 2
        store_act(T, conv3(T, k3, 1, relu_in=False))
        k3 += 1

    # Conv1d(k3) -> ReLU -> Conv1d(k3, width -> input_emb_width)
    store_act(T, jnp.maximum(conv3(T, k3, 1, relu_in=False), 0.0))
    k3 += 1
    o_ref[0] = conv3(T, k3, 1, relu_in=False).astype(o_ref.dtype)


# ---------------------------- host-side packing --------------------------------
def _pack_params(params):
    """Stack + channel-pad all weights into 4 arrays (order matches the kernel)."""

    def pad_k3(w, b):
        # w: (3, cin, cout), b: (1, cout) -> (3*LANES, LANES), (1, LANES)
        cin, cout = w.shape[1], w.shape[2]
        wp = jnp.zeros((3, LANES, LANES), jnp.float32).at[:, :cin, :cout].set(w)
        bp = jnp.zeros((1, LANES), jnp.float32).at[:, :cout].set(b)
        return wp.reshape(3 * LANES, LANES), bp

    def pad_1x1(w, b):
        cin, cout = w.shape
        wp = jnp.zeros((LANES, LANES), jnp.float32).at[:cin, :cout].set(w)
        bp = jnp.zeros((1, LANES), jnp.float32).at[:, :cout].set(b)
        return wp, bp

    k3_w, k3_b, r_w, r_b = [], [], [], []

    w, b = pad_k3(params["in_conv"]["w"], params["in_conv"]["b"])
    k3_w.append(w); k3_b.append(b)
    for blk in params["up_blocks"]:
        for rp in blk["res"]:
            w, b = pad_k3(rp["w1"], rp["b1"]); k3_w.append(w); k3_b.append(b)
            w, b = pad_1x1(rp["w2"], rp["b2"]); r_w.append(w); r_b.append(b)
        w, b = pad_k3(blk["up_conv"]["w"], blk["up_conv"]["b"])
        k3_w.append(w); k3_b.append(b)
    w, b = pad_k3(params["out_conv1"]["w"], params["out_conv1"]["b"])
    k3_w.append(w); k3_b.append(b)
    w, b = pad_k3(params["out_conv2"]["w"], params["out_conv2"]["b"])
    k3_w.append(w); k3_b.append(b)

    return jnp.stack(k3_w), jnp.stack(k3_b), jnp.stack(r_w), jnp.stack(r_b)


# ---------------------------- full forward pass --------------------------------
def decoder_forward(x_nct, params):
    """x_nct: (N, output_emb_width, T) in PyTorch NCT layout."""
    N, c_in, T0 = x_nct.shape
    T_out = T0 * (2 ** DOWN_T)

    wk3, bk3, w11, b11 = _pack_params(params)

    # One-time tiny glue: NCT -> NTC, channel-pad to a full 128-lane vreg.
    x = jnp.transpose(x_nct, (0, 2, 1))
    x = jnp.pad(x, ((0, 0), (0, 0), (0, LANES - c_in)))

    kern = functools.partial(_decoder_kernel, T0=T0)
    out = pl.pallas_call(
        kern,
        out_shape=jax.ShapeDtypeStruct((N, T_out, LANES), jnp.float32),
        grid=(N,),
        in_specs=[
            pl.BlockSpec((1, T0, LANES), lambda n: (n, 0, 0)),
            pl.BlockSpec(wk3.shape, lambda n: (0, 0, 0)),   # weights: constant block,
            pl.BlockSpec(bk3.shape, lambda n: (0, 0, 0)),   # DMA'd once, stay resident
            pl.BlockSpec(w11.shape, lambda n: (0, 0, 0)),
            pl.BlockSpec(b11.shape, lambda n: (0, 0, 0)),
        ],
        out_specs=pl.BlockSpec((1, T_out, LANES), lambda n: (n, 0, 0)),
        scratch_shapes=[pltpu.VMEM((PAD + T_out + PAD, LANES), jnp.float32)],
        compiler_params=pltpu.CompilerParams(
            dimension_semantics=("parallel",),   # v7x: one batch element per TC
            vmem_limit_bytes=32 * 1024 * 1024,
        ),
    )(x, wk3, bk3, w11, b11)

    # Drop channel padding, back to PyTorch NCT layout.
    return jnp.transpose(out[:, :, :INPUT_EMB_WIDTH], (0, 2, 1))


# ---------------------------- parameters ---------------------------------------
def init_params(key):
    keys = iter(jax.random.split(key, 128))

    def conv(cin, cout, k):
        scale = 1.0 / jnp.sqrt(jnp.float32(cin * k))
        w = jax.random.uniform(next(keys), (k, cin, cout), jnp.float32, -scale, scale)
        b = jax.random.uniform(next(keys), (1, cout), jnp.float32, -scale, scale)
        return {"w": w, "b": b}

    params = {"in_conv": conv(OUTPUT_EMB_WIDTH, WIDTH, 3)}
    up_blocks = []
    for _ in range(DOWN_T):
        res = []
        for _ in range(DEPTH):                       # stored in application order
            c1 = conv(WIDTH, WIDTH, 3)
            c2 = conv(WIDTH, WIDTH, 1)
            res.append({"w1": c1["w"], "b1": c1["b"],
                        "w2": c2["w"][0], "b2": c2["b"]})
        up_blocks.append({"res": res, "up_conv": conv(WIDTH, WIDTH, 3)})
    params["up_blocks"] = up_blocks
    params["out_conv1"] = conv(WIDTH, WIDTH, 3)
    params["out_conv2"] = conv(WIDTH, INPUT_EMB_WIDTH, 3)
    return params


# ---------------------------- pure-JAX reference --------------------------------
def _ref_conv1d(x_nct, w_kio, b, dilation, padding):
    w_oik = jnp.transpose(w_kio, (2, 1, 0))          # (Cout, Cin, K) == torch layout
    out = jax.lax.conv_general_dilated(
        x_nct, w_oik, window_strides=(1,), padding=[(padding, padding)],
        rhs_dilation=(dilation,), dimension_numbers=("NCH", "OIH", "NCH"))
    return out + b.reshape(1, -1, 1)


def ref_decoder(x_nct, params):
    relu = lambda v: jnp.maximum(v, 0.0)
    x = relu(_ref_conv1d(x_nct, params["in_conv"]["w"], params["in_conv"]["b"], 1, 1))
    for blk in params["up_blocks"]:
        for rp, d in zip(blk["res"], DILATIONS):
            h = _ref_conv1d(relu(x), rp["w1"], rp["b1"], d, d)
            h = _ref_conv1d(relu(h), rp["w2"][None], rp["b2"], 1, 0)
            x = x + h
        x = jnp.repeat(x, 2, axis=2)
        x = _ref_conv1d(x, blk["up_conv"]["w"], blk["up_conv"]["b"], 1, 1)
    x = relu(_ref_conv1d(x, params["out_conv1"]["w"], params["out_conv1"]["b"], 1, 1))
    x = _ref_conv1d(x, params["out_conv2"]["w"], params["out_conv2"]["b"], 1, 1)
    return x


# ---------------------------- main ----------------------------------------------
if __name__ == "__main__":
    key = jax.random.PRNGKey(0)
    kp, kx = jax.random.split(key)
    params = init_params(kp)

    N, T = 2, 8
    # PyTorch-style input: (N, output_emb_width, T)
    x = jax.random.normal(kx, (N, OUTPUT_EMB_WIDTH, T), jnp.float32)

    fwd = jax.jit(decoder_forward)
    out = fwd(x, params)
    out = jax.block_until_ready(out)

    assert out.shape == (N, INPUT_EMB_WIDTH, T * (2 ** DOWN_T)), out.shape

    ref = ref_decoder(x, params)
    max_err = float(jnp.max(jnp.abs(out - ref)))
    assert max_err < 1e-3, f"max abs error {max_err}"

    print("KERNEL_OK")
</pallas_src>

<mosaic_0001>
module attributes {stable_mosaic.version = 11 : i64} {
  func.func @_decoder_kernel(%arg0: i32, %arg1: memref<1x8x128xf32, #tpu.memory_space<vmem>>, %arg2: memref<15x384x128xf32, #tpu.memory_space<vmem>>, %arg3: memref<15x1x128xf32, #tpu.memory_space<vmem>>, %arg4: memref<9x128x128xf32, #tpu.memory_space<vmem>>, %arg5: memref<9x1x128xf32, #tpu.memory_space<vmem>>, %arg6: memref<1x64x128xf32, #tpu.memory_space<vmem>>, %arg7: memref<96x128xf32, #tpu.memory_space<vmem>>) attributes {dimension_semantics = [#tpu.dimension_semantics<parallel>], iteration_bounds = array<i64: 2>, scalar_prefetch = 0 : i64, scratch_operands = 1 : i64, tpu.core_type = #tpu.core_type<tc>, window_params = [{transform_indices = @transform_0, window_bounds = array<i64: 1, 8, 128>}, {pipeline_mode = #tpu.pipeline_mode<synchronous>, transform_indices = @transform_1, window_bounds = array<i64: 15, 384, 128>}, {pipeline_mode = #tpu.pipeline_mode<synchronous>, transform_indices = @transform_2, window_bounds = array<i64: 15, 1, 128>}, {pipeline_mode = #tpu.pipeline_mode<synchronous>, transform_indices = @transform_3, window_bounds = array<i64: 9, 128, 128>}, {pipeline_mode = #tpu.pipeline_mode<synchronous>, transform_indices = @transform_4, window_bounds = array<i64: 9, 1, 128>}, {transform_indices = @transform_5, window_bounds = array<i64: 1, 64, 128>}]} {
    %cst = arith.constant 0.000000e+00 : f32
    %0 = vector.broadcast %cst : f32 to vector<96x128xf32>
    %c0 = arith.constant 0 : index
    %c0_0 = arith.constant 0 : index
    %1 = vector.load %arg7[%c0, %c0_0] : memref<96x128xf32, #tpu.memory_space<vmem>>, vector<96x128xf32>
    tpu.vector_store %arg7[%c0, %c0_0], %0 {strides = array<i32>} : memref<96x128xf32, #tpu.memory_space<vmem>>, vector<96x128xf32>,
    %c0_1 = arith.constant 0 : index
    %c0_2 = arith.constant 0 : index
    %c0_3 = arith.constant 0 : index
    %2 = vector.load %arg1[%c0_1, %c0_2, %c0_3] : memref<1x8x128xf32, #tpu.memory_space<vmem>>, vector<1x8x128xf32>
    %3 = vector.shape_cast %2 : vector<1x8x128xf32> to vector<8x128xf32>
    %c16 = arith.constant 16 : index
    %c0_4 = arith.constant 0 : index
    %4 = vector.load %arg7[%c16, %c0_4] : memref<96x128xf32, #tpu.memory_space<vmem>>, vector<8x128xf32>
    tpu.vector_store %arg7[%c16, %c0_4], %3 {strides = array<i32>} : memref<96x128xf32, #tpu.memory_space<vmem>>, vector<8x128xf32>,
    %c15 = arith.constant 15 : index
    %c0_5 = arith.constant 0 : index
    %5 = vector.load %arg7[%c15, %c0_5] : memref<96x128xf32, #tpu.memory_space<vmem>>, vector<8x128xf32>
    %c16_6 = arith.constant 16 : index
    %c0_7 = arith.constant 0 : index
    %6 = vector.load %arg7[%c16_6, %c0_7] : memref<96x128xf32, #tpu.memory_space<vmem>>, vector<8x128xf32>
    %c17 = arith.constant 17 : index
    %c0_8 = arith.constant 0 : index
    %7 = vector.load %arg7[%c17, %c0_8] : memref<96x128xf32, #tpu.memory_space<vmem>>, vector<8x128xf32>
    %8 = tpu.concatenate %5, %6, %7 in 1 : vector<8x128xf32>, vector<8x128xf32>, vector<8x128xf32> -> vector<8x384xf32>
    %c0_9 = arith.constant 0 : index
    %c0_10 = arith.constant 0 : index
    %c0_11 = arith.constant 0 : index
    %9 = vector.load %arg2[%c0_9, %c0_10, %c0_11] : memref<15x384x128xf32, #tpu.memory_space<vmem>>, vector<1x384x128xf32>
    %10 = vector.shape_cast %9 : vector<1x384x128xf32> to vector<384x128xf32>
    %cst_12 = arith.constant dense<0.000000e+00> : vector<8x128xf32>
    %11 = tpu.matmul %8, %10, %cst_12 {dimension_numbers = #tpu.dot_dimension_numbers<[1], [0], [0], [1], [0, 0, 1, 1], [], []>} : vector<8x384xf32>, vector<384x128xf32>, vector<8x128xf32> -> vector<8x128xf32>
    %c0_13 = arith.constant 0 : index
    %c0_14 = arith.constant 0 : index
    %c0_15 = arith.constant 0 : index
    %12 = vector.load %arg3[%c0_13, %c0_14, %c0_15] : memref<15x1x128xf32, #tpu.memory_space<vmem>>, vector<1x1x128xf32>
    %13 = vector.shape_cast %12 : vector<1x1x128xf32> to vector<1x128xf32>
    %14 = vector.broadcast %13 : vector<1x128xf32> to vector<8x128xf32>
    %15 = arith.addf %11, %14 : vector<8x128xf32>
    %cst_16 = arith.constant 0.000000e+00 : f32
    %16 = vector.broadcast %cst_16 : f32 to vector<8x128xf32>
    %17 = arith.maximumf %15, %16 : vector<8x128xf32>
    %c16_17 = arith.constant 16 : index
    %c0_18 = arith.constant 0 : index
    %18 = vector.load %arg7[%c16_17, %c0_18] : memref<96x128xf32, #tpu.memory_space<vmem>>, vector<8x128xf32>
    tpu.vector_store %arg7[%c16_17, %c0_18], %17 {strides = array<i32>} : memref<96x128xf32, #tpu.memory_space<vmem>>, vector<8x128xf32>,
    %c16_19 = arith.constant 16 : index
    %c0_20 = arith.constant 0 : index
    %19 = vector.load %arg7[%c16_19, %c0_20] : memref<96x128xf32, #tpu.memory_space<vmem>>, vector<8x128xf32>
    %c7 = arith.constant 7 : index
    %c0_21 = arith.constant 0 : index
    %20 = vector.load %arg7[%c7, %c0_21] : memref<96x128xf32, #tpu.memory_space<vmem>>, vector<8x128xf32>
    %c16_22 = arith.constant 16 : index
    %c0_23 = arith.constant 0 : index
    %21 = vector.load %arg7[%c16_22, %c0_23] : memref<96x128xf32, #tpu.memory_space<vmem>>, vector<8x128xf32>
    %c25 = arith.constant 25 : index
    %c0_24 = arith.constant 0 : index
    %22 = vector.load %arg7[%c25, %c0_24] : memref<96x128xf32, #tpu.memory_space<vmem>>, vector<8x128xf32>
    %23 = tpu.concatenate %20, %21, %22 in 1 : vector<8x128xf32>, vector<8x128xf32>, vector<8x128xf32> -> vector<8x384xf32>
    %cst_25 = arith.constant 0.000000e+00 : f32
    %24 = vector.broadcast %cst_25 : f32 to vector<8x384xf32>
    %25 = arith.maximumf %23, %24 : vector<8x384xf32>
    %c1 = arith.constant 1 : index
    %c0_26 = arith.constant 0 : index
    %c0_27 = arith.constant 0 : index
    %26 = vector.load %arg2[%c1, %c0_26, %c0_27] : memref<15x384x128xf32, #tpu.memory_space<vmem>>, vector<1x384x128xf32>
    %27 = vector.shape_cast %26 : vector<1x384x128xf32> to vector<384x128xf32>
    %cst_28 = arith.constant dense<0.000000e+00> : vector<8x128xf32>
    %28 = tpu.matmul %25, %27, %cst_28 {dimension_numbers = #tpu.dot_dimension_numbers<[1], [0], [0], [1], [0, 0, 1, 1], [], []>} : vector<8x384xf32>, vector<384x128xf32>, vector<8x128xf32> -> vector<8x128xf32>
    %c1_29 = arith.constant 1 : index
    %c0_30 = arith.constant 0 : index
    %c0_31 = arith.constant 0 : index
    %29 = vector.load %arg3[%c1_29, %c0_30, %c0_31] : memref<15x1x128xf32, #tpu.memory_space<vmem>>, vector<1x1x128xf32>
    %30 = vector.shape_cast %29 : vector<1x1x128xf32> to vector<1x128xf32>
    %31 = vector.broadcast %30 : vector<1x128xf32> to vector<8x128xf32>
    %32 = arith.addf %28, %31 : vector<8x128xf32>
    %cst_32 = arith.constant 0.000000e+00 : f32
    %33 = vector.broadcast %cst_32 : f32 to vector<8x128xf32>
    %34 = arith.maximumf %32, %33 : vector<8x128xf32>
    %c0_33 = arith.constant 0 : index
    %c0_34 = arith.constant 0 : index
    %c0_35 = arith.constant 0 : index
    %35 = vector.load %arg4[%c0_33, %c0_34, %c0_35] : memref<9x128x128xf32, #tpu.memory_space<vmem>>, vector<1x128x128xf32>
    %36 = vector.shape_cast %35 : vector<1x128x128xf32> to vector<128x128xf32>
    %cst_36 = arith.constant dense<0.000000e+00> : vector<8x128xf32>
    %37 = tpu.matmul %34, %36, %cst_36 {dimension_numbers = #tpu.dot_dimension_numbers<[1], [0], [0], [1], [0, 0, 1, 1], [], []>} : vector<8x128xf32>, vector<128x128xf32>, vector<8x128xf32> -> vector<8x128xf32>
    %c0_37 = arith.constant 0 : index
    %c0_38 = arith.constant 0 : index
    %c0_39 = arith.constant 0 : index
    %38 = vector.load %arg5[%c0_37, %c0_38, %c0_39] : memref<9x1x128xf32, #tpu.memory_space<vmem>>, vector<1x1x128xf32>
    %39 = vector.shape_cast %38 : vector<1x1x128xf32> to vector<1x128xf32>
    %40 = vector.broadcast %39 : vector<1x128xf32> to vector<8x128xf32>
    %41 = arith.addf %37, %40 : vector<8x128xf32>
    %42 = arith.addf %19, %41 : vector<8x128xf32>
    %c16_40 = arith.constant 16 : index
    %c0_41 = arith.constant 0 : index
    %43 = vector.load %arg7[%c16_40, %c0_41] : memref<96x128xf32, #tpu.memory_space<vmem>>, vector<8x128xf32>
    tpu.vector_store %arg7[%c16_40, %c0_41], %42 {strides = array<i32>} : memref<96x128xf32, #tpu.memory_space<vmem>>, vector<8x128xf32>,
    %c16_42 = arith.constant 16 : index
    %c0_43 = arith.constant 0 : index
    %44 = vector.load %arg7[%c16_42, %c0_43] : memref<96x128xf32, #tpu.memory_space<vmem>>, vector<8x128xf32>
    %c13 = arith.constant 13 : index
    %c0_44 = arith.constant 0 : index
    %45 = vector.load %arg7[%c13, %c0_44] : memref<96x128xf32, #tpu.memory_space<vmem>>, vector<8x128xf32>
    %c16_45 = arith.constant 16 : index
    %c0_46 = arith.constant 0 : index
    %46 = vector.load %arg7[%c16_45, %c0_46] : memref<96x128xf32, #tpu.memory_space<vmem>>, vector<8x128xf32>
    %c19 = arith.constant 19 : index
    %c0_47 = arith.constant 0 : index
    %47 = vector.load %arg7[%c19, %c0_47] : memref<96x128xf32, #tpu.memory_space<vmem>>, vector<8x128xf32>
    %48 = tpu.concatenate %45, %46, %47 in 1 : vector<8x128xf32>, vector<8x128xf32>, vector<8x128xf32> -> vector<8x384xf32>
    %cst_48 = arith.constant 0.000000e+00 : f32
    %49 = vector.broadcast %cst_48 : f32 to vector<8x384xf32>
    %50 = arith.maximumf %48, %49 : vector<8x384xf32>
    %c2 = arith.constant 2 : index
    %c0_49 = arith.constant 0 : index
    %c0_50 = arith.constant 0 : index
    %51 = vector.load %arg2[%c2, %c0_49, %c0_50] : memref<15x384x128xf32, #tpu.memory_space<vmem>>, vector<1x384x128xf32>
    %52 = vector.shape_cast %51 : vector<1x384x128xf32> to vector<384x128xf32>
    %cst_51 = arith.constant dense<0.000000e+00> : vector<8x128xf32>
    %53 = tpu.matmul %50, %52, %cst_51 {dimension_numbers = #tpu.dot_dimension_numbers<[1], [0], [0], [1], [0, 0, 1, 1], [], []>} : vector<8x384xf32>, vector<384x128xf32>, vector<8x128xf32> -> vector<8x128xf32>
    %c2_52 = arith.constant 2 : index
    %c0_53 = arith.constant 0 : index
    %c0_54 = arith.constant 0 : index
    %54 = vector.load %arg3[%c2_52, %c0_53, %c0_54] : memref<15x1x128xf32, #tpu.memory_space<vmem>>, vector<1x1x128xf32>
    %55 = vector.shape_cast %54 : vector<1x1x128xf32> to vector<1x128xf32>
    %56 = vector.broadcast %55 : vector<1x128xf32> to vector<8x128xf32>
    %57 = arith.addf %53, %56 : vector<8x128xf32>
    %cst_55 = arith.constant 0.000000e+00 : f32
    %58 = vector.broadcast %cst_55 : f32 to vector<8x128xf32>
    %59 = arith.maximumf %57, %58 : vector<8x128xf32>
    %c1_56 = arith.constant 1 : index
    %c0_57 = arith.constant 0 : index
    %c0_58 = arith.constant 0 : index
    %60 = vector.load %arg4[%c1_56, %c0_57, %c0_58] : memref<9x128x128xf32, #tpu.memory_space<vmem>>, vector<1x128x128xf32>
    %61 = vector.shape_cast %60 : vector<1x128x128xf32> to vector<128x128xf32>
    %cst_59 = arith.constant dense<0.000000e+00> : vector<8x128xf32>
    %62 = tpu.matmul %59, %61, %cst_59 {dimension_numbers = #tpu.dot_dimension_numbers<[1], [0], [0], [1], [0, 0, 1, 1], [], []>} : vector<8x128xf32>, vector<128x128xf32>, vector<8x128xf32> -> vector<8x128xf32>
    %c1_60 = arith.constant 1 : index
    %c0_61 = arith.constant 0 : index
    %c0_62 = arith.constant 0 : index
    %63 = vector.load %arg5[%c1_60, %c0_61, %c0_62] : memref<9x1x128xf32, #tpu.memory_space<vmem>>, vector<1x1x128xf32>
    %64 = vector.shape_cast %63 : vector<1x1x128xf32> to vector<1x128xf32>
    %65 = vector.broadcast %64 : vector<1x128xf32> to vector<8x128xf32>
    %66 = arith.addf %62, %65 : vector<8x128xf32>
    %67 = arith.addf %44, %66 : vector<8x128xf32>
    %c16_63 = arith.constant 16 : index
    %c0_64 = arith.constant 0 : index
    %68 = vector.load %arg7[%c16_63, %c0_64] : memref<96x128xf32, #tpu.memory_space<vmem>>, vector<8x128xf32>
    tpu.vector_store %arg7[%c16_63, %c0_64], %67 {strides = array<i32>} : memref<96x128xf32, #tpu.memory_space<vmem>>, vector<8x128xf32>,
    %c16_65 = arith.constant 16 : index
    %c0_66 = arith.constant 0 : index
    %69 = vector.load %arg7[%c16_65, %c0_66] : memref<96x128xf32, #tpu.memory_space<vmem>>, vector<8x128xf32>
    %c15_67 = arith.constant 15 : index
    %c0_68 = arith.constant 0 : index
    %70 = vector.load %arg7[%c15_67, %c0_68] : memref<96x128xf32, #tpu.memory_space<vmem>>, vector<8x128xf32>
    %c16_69 = arith.constant 16 : index
    %c0_70 = arith.constant 0 : index
    %71 = vector.load %arg7[%c16_69, %c0_70] : memref<96x128xf32, #tpu.memory_space<vmem>>, vector<8x128xf32>
    %c17_71 = arith.constant 17 : index
    %c0_72 = arith.constant 0 : index
    %72 = vector.load %arg7[%c17_71, %c0_72] : memref<96x128xf32, #tpu.memory_space<vmem>>, vector<8x128xf32>
    %73 = tpu.concatenate %70, %71, %72 in 1 : vector<8x128xf32>, vector<8x128xf32>, vector<8x128xf32> -> vector<8x384xf32>
    %cst_73 = arith.constant 0.000000e+00 : f32
    %74 = vector.broadcast %cst_73 : f32 to vector<8x384xf32>
    %75 = arith.maximumf %73, %74 : vector<8x384xf32>
    %c3 = arith.constant 3 : index
    %c0_74 = arith.constant 0 : index
    %c0_75 = arith.constant 0 : index
    %76 = vector.load %arg2[%c3, %c0_74, %c0_75] : memref<15x384x128xf32, #tpu.memory_space<vmem>>, vector<1x384x128xf32>
    %77 = vector.shape_cast %76 : vector<1x384x128xf32> to vector<384x128xf32>
    %cst_76 = arith.constant dense<0.000000e+00> : vector<8x128xf32>
    %78 = tpu.matmul %75, %77, %cst_76 {dimension_numbers = #tpu.dot_dimension_numbers<[1], [0], [0], [1], [0, 0, 1, 1], [], []>} : vector<8x384xf32>, vector<384x128xf32>, vector<8x128xf32> -> vector<8x128xf32>
    %c3_77 = arith.constant 3 : index
    %c0_78 = arith.constant 0 : index
    %c0_79 = arith.constant 0 : index
    %79 = vector.load %arg3[%c3_77, %c0_78, %c0_79] : memref<15x1x128xf32, #tpu.memory_space<vmem>>, vector<1x1x128xf32>
    %80 = vector.shape_cast %79 : vector<1x1x128xf32> to vector<1x128xf32>
    %81 = vector.broadcast %80 : vector<1x128xf32> to vector<8x128xf32>
    %82 = arith.addf %78, %81 : vector<8x128xf32>
    %cst_80 = arith.constant 0.000000e+00 : f32
    %83 = vector.broadcast %cst_80 : f32 to vector<8x128xf32>
    %84 = arith.maximumf %82, %83 : vector<8x128xf32>
    %c2_81 = arith.constant 2 : index
    %c0_82 = arith.constant 0 : index
    %c0_83 = arith.constant 0 : index
    %85 = vector.load %arg4[%c2_81, %c0_82, %c0_83] : memref<9x128x128xf32, #tpu.memory_space<vmem>>, vector<1x128x128xf32>
    %86 = vector.shape_cast %85 : vector<1x128x128xf32> to vector<128x128xf32>
    %cst_84 = arith.constant dense<0.000000e+00> : vector<8x128xf32>
    %87 = tpu.matmul %84, %86, %cst_84 {dimension_numbers = #tpu.dot_dimension_numbers<[1], [0], [0], [1], [0, 0, 1, 1], [], []>} : vector<8x128xf32>, vector<128x128xf32>, vector<8x128xf32> -> vector<8x128xf32>
    %c2_85 = arith.constant 2 : index
    %c0_86 = arith.constant 0 : index
    %c0_87 = arith.constant 0 : index
    %88 = vector.load %arg5[%c2_85, %c0_86, %c0_87] : memref<9x1x128xf32, #tpu.memory_space<vmem>>, vector<1x1x128xf32>
    %89 = vector.shape_cast %88 : vector<1x1x128xf32> to vector<1x128xf32>
    %90 = vector.broadcast %89 : vector<1x128xf32> to vector<8x128xf32>
    %91 = arith.addf %87, %90 : vector<8x128xf32>
    %92 = arith.addf %69, %91 : vector<8x128xf32>
    %c16_88 = arith.constant 16 : index
    %c0_89 = arith.constant 0 : index
    %93 = vector.load %arg7[%c16_88, %c0_89] : memref<96x128xf32, #tpu.memory_space<vmem>>, vector<8x128xf32>
    tpu.vector_store %arg7[%c16_88, %c0_89], %92 {strides = array<i32>} : memref<96x128xf32, #tpu.memory_space<vmem>>, vector<8x128xf32>,
    %c16_90 = arith.constant 16 : index
    %c0_91 = arith.constant 0 : index
    %94 = vector.load %arg7[%c16_90, %c0_91] : memref<96x128xf32, #tpu.memory_space<vmem>>, vector<8x128xf32>
    %95 = tpu.iota {dimensions = array<i32: 0>} : vector<16x8xi32>
    %96 = tpu.iota {dimensions = array<i32: 1>} : vector<16x8xi32>
    %c2_i32 = arith.constant 2 : i32
    %97 = vector.broadcast %c2_i32 : i32 to vector<16x8xi32>
    %98 = arith.muli %97, %96 : vector<16x8xi32>
    %99 = arith.subi %95, %98 : vector<16x8xi32>
    %c0_i32 = arith.constant 0 : i32
    %100 = vector.broadcast %c0_i32 : i32 to vector<16x8xi32>
    %101 = arith.cmpi sge, %99, %100 : vector<16x8xi32>
    %c1_i32 = arith.constant 1 : i32
    %102 = vector.broadcast %c1_i32 : i32 to vector<16x8xi32>
    %103 = arith.cmpi sle, %99, %102 : vector<16x8xi32>
    %104 = arith.andi %101, %103 : vector<16x8xi1>
    %cst_92 = arith.constant 1.000000e+00 : f32
    %cst_93 = arith.constant 0.000000e+00 : f32
    %105 = vector.broadcast %cst_92 : f32 to vector<16x8xf32>
    %106 = vector.broadcast %cst_93 : f32 to vector<16x8xf32>
    %107 = arith.select %104, %105, %106 : vector<16x8xi1>, vector<16x8xf32>
    %cst_94 = arith.constant dense<0.000000e+00> : vector<16x128xf32>
    %108 = tpu.matmul %107, %94, %cst_94 {dimension_numbers = #tpu.dot_dimension_numbers<[1], [0], [0], [1], [0, 0, 1, 1], [], []>} : vector<16x8xf32>, vector<8x128xf32>, vector<16x128xf32> -> vector<16x128xf32>
    %c16_95 = arith.constant 16 : index
    %c0_96 = arith.constant 0 : index
    %109 = vector.load %arg7[%c16_95, %c0_96] : memref<96x128xf32, #tpu.memory_space<vmem>>, vector<16x128xf32>
    tpu.vector_store %arg7[%c16_95, %c0_96], %108 {strides = array<i32>} : memref<96x128xf32, #tpu.memory_space<vmem>>, vector<16x128xf32>,
    %c15_97 = arith.constant 15 : index
    %c0_98 = arith.constant 0 : index
    %110 = vector.load %arg7[%c15_97, %c0_98] : memref<96x128xf32, #tpu.memory_space<vmem>>, vector<16x128xf32>
    %c16_99 = arith.constant 16 : index
    %c0_100 = arith.constant 0 : index
    %111 = vector.load %arg7[%c16_99, %c0_100] : memref<96x128xf32, #tpu.memory_space<vmem>>, vector<16x128xf32>
    %c17_101 = arith.constant 17 : index
    %c0_102 = arith.constant 0 : index
    %112 = vector.load %arg7[%c17_101, %c0_102] : memref<96x128xf32, #tpu.memory_space<vmem>>, vector<16x128xf32>
    %113 = tpu.concatenate %110, %111, %112 in 1 : vector<16x128xf32>, vector<16x128xf32>, vector<16x128xf32> -> vector<16x384xf32>
    %c4 = arith.constant 4 : index
    %c0_103 = arith.constant 0 : index
    %c0_104 = arith.constant 0 : index
    %114 = vector.load %arg2[%c4, %c0_103, %c0_104] : memref<15x384x128xf32, #tpu.memory_space<vmem>>, vector<1x384x128xf32>
    %115 = vector.shape_cast %114 : vector<1x384x128xf32> to vector<384x128xf32>
    %cst_105 = arith.constant dense<0.000000e+00> : vector<16x128xf32>
    %116 = tpu.matmul %113, %115, %cst_105 {dimension_numbers = #tpu.dot_dimension_numbers<[1], [0], [0], [1], [0, 0, 1, 1], [], []>} : vector<16x384xf32>, vector<384x128xf32>, vector<16x128xf32> -> vector<16x128xf32>
    %c4_106 = arith.constant 4 : index
    %c0_107 = arith.constant 0 : index
    %c0_108 = arith.constant 0 : index
    %117 = vector.load %arg3[%c4_106, %c0_107, %c0_108] : memref<15x1x128xf32, #tpu.memory_space<vmem>>, vector<1x1x128xf32>
    %118 = vector.shape_cast %117 : vector<1x1x128xf32> to vector<1x128xf32>
    %119 = vector.broadcast %118 : vector<1x128xf32> to vector<16x128xf32>
    %120 = arith.addf %116, %119 : vector<16x128xf32>
    %c16_109 = arith.constant 16 : index
    %c0_110 = arith.constant 0 : index
    %121 = vector.load %arg7[%c16_109, %c0_110] : memref<96x128xf32, #tpu.memory_space<vmem>>, vector<16x128xf32>
    tpu.vector_store %arg7[%c16_109, %c0_110], %120 {strides = array<i32>} : memref<96x128xf32, #tpu.memory_space<vmem>>, vector<16x128xf32>,
    %c16_111 = arith.constant 16 : index
    %c0_112 = arith.constant 0 : index
    %122 = vector.load %arg7[%c16_111, %c0_112] : memref<96x128xf32, #tpu.memory_space<vmem>>, vector<16x128xf32>
    %c7_113 = arith.constant 7 : index
    %c0_114 = arith.constant 0 : index
    %123 = vector.load %arg7[%c7_113, %c0_114] : memref<96x128xf32, #tpu.memory_space<vmem>>, vector<16x128xf32>
    %c16_115 = arith.constant 16 : index
    %c0_116 = arith.constant 0 : index
    %124 = vector.load %arg7[%c16_115, %c0_116] : memref<96x128xf32, #tpu.memory_space<vmem>>, vector<16x128xf32>
    %c25_117 = arith.constant 25 : index
    %c0_118 = arith.constant 0 : index
    %125 = vector.load %arg7[%c25_117, %c0_118] : memref<96x128xf32, #tpu.memory_space<vmem>>, vector<16x128xf32>
    %126 = tpu.concatenate %123, %124, %125 in 1 : vector<16x128xf32>, vector<16x128xf32>, vector<16x128xf32> -> vector<16x384xf32>
    %cst_119 = arith.constant 0.000000e+00 : f32
    %127 = vector.broadcast %cst_119 : f32 to vector<16x384xf32>
    %128 = arith.maximumf %126, %127 : vector<16x384xf32>
    %c5 = arith.constant 5 : index
    %c0_120 = arith.constant 0 : index
    %c0_121 = arith.constant 0 : index
    %129 = vector.load %arg2[%c5, %c0_120, %c0_121] : memref<15x384x128xf32, #tpu.memory_space<vmem>>, vector<1x384x128xf32>
    %130 = vector.shape_cast %129 : vector<1x384x128xf32> to vector<384x128xf32>
    %cst_122 = arith.constant dense<0.000000e+00> : vector<16x128xf32>
    %131 = tpu.matmul %128, %130, %cst_122 {dimension_numbers = #tpu.dot_dimension_numbers<[1], [0], [0], [1], [0, 0, 1, 1], [], []>} : vector<16x384xf32>, vector<384x128xf32>, vector<16x128xf32> -> vector<16x128xf32>
    %c5_123 = arith.constant 5 : index
    %c0_124 = arith.constant 0 : index
    %c0_125 = arith.constant 0 : index
    %132 = vector.load %arg3[%c5_123, %c0_124, %c0_125] : memref<15x1x128xf32, #tpu.memory_space<vmem>>, vector<1x1x128xf32>
    %133 = vector.shape_cast %132 : vector<1x1x128xf32> to vector<1x128xf32>
    %134 = vector.broadcast %133 : vector<1x128xf32> to vector<16x128xf32>
    %135 = arith.addf %131, %134 : vector<16x128xf32>
    %cst_126 = arith.constant 0.000000e+00 : f32
    %136 = vector.broadcast %cst_126 : f32 to vector<16x128xf32>
    %137 = arith.maximumf %135, %136 : vector<16x128xf32>
    %c3_127 = arith.constant 3 : index
    %c0_128 = arith.constant 0 : index
    %c0_129 = arith.constant 0 : index
    %138 = vector.load %arg4[%c3_127, %c0_128, %c0_129] : memref<9x128x128xf32, #tpu.memory_space<vmem>>, vector<1x128x128xf32>
    %139 = vector.shape_cast %138 : vector<1x128x128xf32> to vector<128x128xf32>
    %cst_130 = arith.constant dense<0.000000e+00> : vector<16x128xf32>
    %140 = tpu.matmul %137, %139, %cst_130 {dimension_numbers = #tpu.dot_dimension_numbers<[1], [0], [0], [1], [0, 0, 1, 1], [], []>} : vector<16x128xf32>, vector<128x128xf32>, vector<16x128xf32> -> vector<16x128xf32>
    %c3_131 = arith.constant 3 : index
    %c0_132 = arith.constant 0 : index
    %c0_133 = arith.constant 0 : index
    %141 = vector.load %arg5[%c3_131, %c0_132, %c0_133] : memref<9x1x128xf32, #tpu.memory_space<vmem>>, vector<1x1x128xf32>
    %142 = vector.shape_cast %141 : vector<1x1x128xf32> to vector<1x128xf32>
    %143 = vector.broadcast %142 : vector<1x128xf32> to vector<16x128xf32>
    %144 = arith.addf %140, %143 : vector<16x128xf32>
    %145 = arith.addf %122, %144 : vector<16x128xf32>
    %c16_134 = arith.constant 16 : index
    %c0_135 = arith.constant 0 : index
    %146 = vector.load %arg7[%c16_134, %c0_135] : memref<96x128xf32, #tpu.memory_space<vmem>>, vector<16x128xf32>
    tpu.vector_store %arg7[%c16_134, %c0_135], %145 {strides = array<i32>} : memref<96x128xf32, #tpu.memory_space<vmem>>, vector<16x128xf32>,
    %c16_136 = arith.constant 16 : index
    %c0_137 = arith.constant 0 : index
    %147 = vector.load %arg7[%c16_136, %c0_137] : memref<96x128xf32, #tpu.memory_space<vmem>>, vector<16x128xf32>
    %c13_138 = arith.constant 13 : index
    %c0_139 = arith.constant 0 : index
    %148 = vector.load %arg7[%c13_138, %c0_139] : memref<96x128xf32, #tpu.memory_space<vmem>>, vector<16x128xf32>
    %c16_140 = arith.constant 16 : index
    %c0_141 = arith.constant 0 : index
    %149 = vector.load %arg7[%c16_140, %c0_141] : memref<96x128xf32, #tpu.memory_space<vmem>>, vector<16x128xf32>
    %c19_142 = arith.constant 19 : index
    %c0_143 = arith.constant 0 : index
    %150 = vector.load %arg7[%c19_142, %c0_143] : memref<96x128xf32, #tpu.memory_space<vmem>>, vector<16x128xf32>
    %151 = tpu.concatenate %148, %149, %150 in 1 : vector<16x128xf32>, vector<16x128xf32>, vector<16x128xf32> -> vector<16x384xf32>
    %cst_144 = arith.constant 0.000000e+00 : f32
    %152 = vector.broadcast %cst_144 : f32 to vector<16x384xf32>
    %153 = arith.maximumf %151, %152 : vector<16x384xf32>
    %c6 = arith.constant 6 : index
    %c0_145 = arith.constant 0 : index
    %c0_146 = arith.constant 0 : index
    %154 = vector.load %arg2[%c6, %c0_145, %c0_146] : memref<15x384x128xf32, #tpu.memory_space<vmem>>, vector<1x384x128xf32>
    %155 = vector.shape_cast %154 : vector<1x384x128xf32> to vector<384x128xf32>
    %cst_147 = arith.constant dense<0.000000e+00> : vector<16x128xf32>
    %156 = tpu.matmul %153, %155, %cst_147 {dimension_numbers = #tpu.dot_dimension_numbers<[1], [0], [0], [1], [0, 0, 1, 1], [], []>} : vector<16x384xf32>, vector<384x128xf32>, vector<16x128xf32> -> vector<16x128xf32>
    %c6_148 = arith.constant 6 : index
    %c0_149 = arith.constant 0 : index
    %c0_150 = arith.constant 0 : index
    %157 = vector.load %arg3[%c6_148, %c0_149, %c0_150] : memref<15x1x128xf32, #tpu.memory_space<vmem>>, vector<1x1x128xf32>
    %158 = vector.shape_cast %157 : vector<1x1x128xf32> to vector<1x128xf32>
    %159 = vector.broadcast %158 : vector<1x128xf32> to vector<16x128xf32>
    %160 = arith.addf %156, %159 : vector<16x128xf32>
    %cst_151 = arith.constant 0.000000e+00 : f32
    %161 = vector.broadcast %cst_151 : f32 to vector<16x128xf32>
    %162 = arith.maximumf %160, %161 : vector<16x128xf32>
    %c4_152 = arith.constant 4 : index
    %c0_153 = arith.constant 0 : index
    %c0_154 = arith.constant 0 : index
    %163 = vector.load %arg4[%c4_152, %c0_153, %c0_154] : memref<9x128x128xf32, #tpu.memory_space<vmem>>, vector<1x128x128xf32>
    %164 = vector.shape_cast %163 : vector<1x128x128xf32> to vector<128x128xf32>
    %cst_155 = arith.constant dense<0.000000e+00> : vector<16x128xf32>
    %165 = tpu.matmul %162, %164, %cst_155 {dimension_numbers = #tpu.dot_dimension_numbers<[1], [0], [0], [1], [0, 0, 1, 1], [], []>} : vector<16x128xf32>, vector<128x128xf32>, vector<16x128xf32> -> vector<16x128xf32>
    %c4_156 = arith.constant 4 : index
    %c0_157 = arith.constant 0 : index
    %c0_158 = arith.constant 0 : index
    %166 = vector.load %arg5[%c4_156, %c0_157, %c0_158] : memref<9x1x128xf32, #tpu.memory_space<vmem>>, vector<1x1x128xf32>
    %167 = vector.shape_cast %166 : vector<1x1x128xf32> to vector<1x128xf32>
    %168 = vector.broadcast %167 : vector<1x128xf32> to vector<16x128xf32>
    %169 = arith.addf %165, %168 : vector<16x128xf32>
    %170 = arith.addf %147, %169 : vector<16x128xf32>
    %c16_159 = arith.constant 16 : index
    %c0_160 = arith.constant 0 : index
    %171 = vector.load %arg7[%c16_159, %c0_160] : memref<96x128xf32, #tpu.memory_space<vmem>>, vector<16x128xf32>
    tpu.vector_store %arg7[%c16_159, %c0_160], %170 {strides = array<i32>} : memref<96x128xf32, #tpu.memory_space<vmem>>, vector<16x128xf32>,
    %c16_161 = arith.constant 16 : index
    %c0_162 = arith.constant 0 : index
    %172 = vector.load %arg7[%c16_161, %c0_162] : memref<96x128xf32, #tpu.memory_space<vmem>>, vector<16x128xf32>
    %c15_163 = arith.constant 15 : index
    %c0_164 = arith.constant 0 : index
    %173 = vector.load %arg7[%c15_163, %c0_164] : memref<96x128xf32, #tpu.memory_space<vmem>>, vector<16x128xf32>
    %c16_165 = arith.constant 16 : index
    %c0_166 = arith.constant 0 : index
    %174 = vector.load %arg7[%c16_165, %c0_166] : memref<96x128xf32, #tpu.memory_space<vmem>>, vector<16x128xf32>
    %c17_167 = arith.constant 17 : index
    %c0_168 = arith.constant 0 : index
    %175 = vector.load %arg7[%c17_167, %c0_168] : memref<96x128xf32, #tpu.memory_space<vmem>>, vector<16x128xf32>
    %176 = tpu.concatenate %173, %174, %175 in 1 : vector<16x128xf32>, vector<16x128xf32>, vector<16x128xf32> -> vector<16x384xf32>
    %cst_169 = arith.constant 0.000000e+00 : f32
    %177 = vector.broadcast %cst_169 : f32 to vector<16x384xf32>
    %178 = arith.maximumf %176, %177 : vector<16x384xf32>
    %c7_170 = arith.constant 7 : index
    %c0_171 = arith.constant 0 : index
    %c0_172 = arith.constant 0 : index
    %179 = vector.load %arg2[%c7_170, %c0_171, %c0_172] : memref<15x384x128xf32, #tpu.memory_space<vmem>>, vector<1x384x128xf32>
    %180 = vector.shape_cast %179 : vector<1x384x128xf32> to vector<384x128xf32>
    %cst_173 = arith.constant dense<0.000000e+00> : vector<16x128xf32>
    %181 = tpu.matmul %178, %180, %cst_173 {dimension_numbers = #tpu.dot_dimension_numbers<[1], [0], [0], [1], [0, 0, 1, 1], [], []>} : vector<16x384xf32>, vector<384x128xf32>, vector<16x128xf32> -> vector<16x128xf32>
    %c7_174 = arith.constant 7 : index
    %c0_175 = arith.constant 0 : index
    %c0_176 = arith.constant 0 : index
    %182 = vector.load %arg3[%c7_174, %c0_175, %c0_176] : memref<15x1x128xf32, #tpu.memory_space<vmem>>, vector<1x1x128xf32>
    %183 = vector.shape_cast %182 : vector<1x1x128xf32> to vector<1x128xf32>
    %184 = vector.broadcast %183 : vector<1x128xf32> to vector<16x128xf32>
    %185 = arith.addf %181, %184 : vector<16x128xf32>
    %cst_177 = arith.constant 0.000000e+00 : f32
    %186 = vector.broadcast %cst_177 : f32 to vector<16x128xf32>
    %187 = arith.maximumf %185, %186 : vector<16x128xf32>
    %c5_178 = arith.constant 5 : index
    %c0_179 = arith.constant 0 : index
    %c0_180 = arith.constant 0 : index
    %188 = vector.load %arg4[%c5_178, %c0_179, %c0_180] : memref<9x128x128xf32, #tpu.memory_space<vmem>>, vector<1x128x128xf32>
    %189 = vector.shape_cast %188 : vector<1x128x128xf32> to vector<128x128xf32>
    %cst_181 = arith.constant dense<0.000000e+00> : vector<16x128xf32>
    %190 = tpu.matmul %187, %189, %cst_181 {dimension_numbers = #tpu.dot_dimension_numbers<[1], [0], [0], [1], [0, 0, 1, 1], [], []>} : vector<16x128xf32>, vector<128x128xf32>, vector<16x128xf32> -> vector<16x128xf32>
    %c5_182 = arith.constant 5 : index
    %c0_183 = arith.constant 0 : index
    %c0_184 = arith.constant 0 : index
    %191 = vector.load %arg5[%c5_182, %c0_183, %c0_184] : memref<9x1x128xf32, #tpu.memory_space<vmem>>, vector<1x1x128xf32>
    %192 = vector.shape_cast %191 : vector<1x1x128xf32> to vector<1x128xf32>
    %193 = vector.broadcast %192 : vector<1x128xf32> to vector<16x128xf32>
    %194 = arith.addf %190, %193 : vector<16x128xf32>
    %195 = arith.addf %172, %194 : vector<16x128xf32>
    %c16_185 = arith.constant 16 : index
    %c0_186 = arith.constant 0 : index
    %196 = vector.load %arg7[%c16_185, %c0_186] : memref<96x128xf32, #tpu.memory_space<vmem>>, vector<16x128xf32>
    tpu.vector_store %arg7[%c16_185, %c0_186], %195 {strides = array<i32>} : memref<96x128xf32, #tpu.memory_space<vmem>>, vector<16x128xf32>,
    %c16_187 = arith.constant 16 : index
    %c0_188 = arith.constant 0 : index
    %197 = vector.load %arg7[%c16_187, %c0_188] : memref<96x128xf32, #tpu.memory_space<vmem>>, vector<16x128xf32>
    %198 = tpu.iota {dimensions = array<i32: 0>} : vector<32x16xi32>
    %199 = tpu.iota {dimensions = array<i32: 1>} : vector<32x16xi32>
    %c2_i32_189 = arith.constant 2 : i32
    %200 = vector.broadcast %c2_i32_189 : i32 to vector<32x16xi32>
    %201 = arith.muli %200, %199 : vector<32x16xi32>
    %202 = arith.subi %198, %201 : vector<32x16xi32>
    %c0_i32_190 = arith.constant 0 : i32
    %203 = vector.broadcast %c0_i32_190 : i32 to vector<32x16xi32>
    %204 = arith.cmpi sge, %202, %203 : vector<32x16xi32>
    %c1_i32_191 = arith.constant 1 : i32
    %205 = vector.broadcast %c1_i32_191 : i32 to vector<32x16xi32>
    %206 = arith.cmpi sle, %202, %205 : vector<32x16xi32>
    %207 = arith.andi %204, %206 : vector<32x16xi1>
    %cst_192 = arith.constant 1.000000e+00 : f32
    %cst_193 = arith.constant 0.000000e+00 : f32
    %208 = vector.broadcast %cst_192 : f32 to vector<32x16xf32>
    %209 = vector.broadcast %cst_193 : f32 to vector<32x16xf32>
    %210 = arith.select %207, %208, %209 : vector<32x16xi1>, vector<32x16xf32>
    %cst_194 = arith.constant dense<0.000000e+00> : vector<32x128xf32>
    %211 = tpu.matmul %210, %197, %cst_194 {dimension_numbers = #tpu.dot_dimension_numbers<[1], [0], [0], [1], [0, 0, 1, 1], [], []>} : vector<32x16xf32>, vector<16x128xf32>, vector<32x128xf32> -> vector<32x128xf32>
    %c16_195 = arith.constant 16 : index
    %c0_196 = arith.constant 0 : index
    %212 = vector.load %arg7[%c16_195, %c0_196] : memref<96x128xf32, #tpu.memory_space<vmem>>, vector<32x128xf32>
    tpu.vector_store %arg7[%c16_195, %c0_196], %211 {strides = array<i32>} : memref<96x128xf32, #tpu.memory_space<vmem>>, vector<32x128xf32>,
    %c15_197 = arith.constant 15 : index
    %c0_198 = arith.constant 0 : index
    %213 = vector.load %arg7[%c15_197, %c0_198] : memref<96x128xf32, #tpu.memory_space<vmem>>, vector<32x128xf32>
    %c16_199 = arith.constant 16 : index
    %c0_200 = arith.constant 0 : index
    %214 = vector.load %arg7[%c16_199, %c0_200] : memref<96x128xf32, #tpu.memory_space<vmem>>, vector<32x128xf32>
    %c17_201 = arith.constant 17 : index
    %c0_202 = arith.constant 0 : index
    %215 = vector.load %arg7[%c17_201, %c0_202] : memref<96x128xf32, #tpu.memory_space<vmem>>, vector<32x128xf32>
    %216 = tpu.concatenate %213, %214, %215 in 1 : vector<32x128xf32>, vector<32x128xf32>, vector<32x128xf32> -> vector<32x384xf32>
    %c8 = arith.constant 8 : index
    %c0_203 = arith.constant 0 : index
    %c0_204 = arith.constant 0 : index
    %217 = vector.load %arg2[%c8, %c0_203, %c0_204] : memref<15x384x128xf32, #tpu.memory_space<vmem>>, vector<1x384x128xf32>
    %218 = vector.shape_cast %217 : vector<1x384x128xf32> to vector<384x128xf32>
    %cst_205 = arith.constant dense<0.000000e+00> : vector<32x128xf32>
    %219 = tpu.matmul %216, %218, %cst_205 {dimension_numbers = #tpu.dot_dimension_numbers<[1], [0], [0], [1], [0, 0, 1, 1], [], []>} : vector<32x384xf32>, vector<384x128xf32>, vector<32x128xf32> -> vector<32x128xf32>
    %c8_206 = arith.constant 8 : index
    %c0_207 = arith.constant 0 : index
    %c0_208 = arith.constant 0 : index
    %220 = vector.load %arg3[%c8_206, %c0_207, %c0_208] : memref<15x1x128xf32, #tpu.memory_space<vmem>>, vector<1x1x128xf32>
    %221 = vector.shape_cast %220 : vector<1x1x128xf32> to vector<1x128xf32>
    %222 = vector.broadcast %221 : vector<1x128xf32> to vector<32x128xf32>
    %223 = arith.addf %219, %222 : vector<32x128xf32>
    %c16_209 = arith.constant 16 : index
    %c0_210 = arith.constant 0 : index
    %224 = vector.load %arg7[%c16_209, %c0_210] : memref<96x128xf32, #tpu.memory_space<vmem>>, vector<32x128xf32>
    tpu.vector_store %arg7[%c16_209, %c0_210], %223 {strides = array<i32>} : memref<96x128xf32, #tpu.memory_space<vmem>>, vector<32x128xf32>,
    %c16_211 = arith.constant 16 : index
    %c0_212 = arith.constant 0 : index
    %225 = vector.load %arg7[%c16_211, %c0_212] : memref<96x128xf32, #tpu.memory_space<vmem>>, vector<32x128xf32>
    %c7_213 = arith.constant 7 : index
    %c0_214 = arith.constant 0 : index
    %226 = vector.load %arg7[%c7_213, %c0_214] : memref<96x128xf32, #tpu.memory_space<vmem>>, vector<32x128xf32>
    %c16_215 = arith.constant 16 : index
    %c0_216 = arith.constant 0 : index
    %227 = vector.load %arg7[%c16_215, %c0_216] : memref<96x128xf32, #tpu.memory_space<vmem>>, vector<32x128xf32>
    %c25_217 = arith.constant 25 : index
    %c0_218 = arith.constant 0 : index
    %228 = vector.load %arg7[%c25_217, %c0_218] : memref<96x128xf32, #tpu.memory_space<vmem>>, vector<32x128xf32>
    %229 = tpu.concatenate %226, %227, %228 in 1 : vector<32x128xf32>, vector<32x128xf32>, vector<32x128xf32> -> vector<32x384xf32>
    %cst_219 = arith.constant 0.000000e+00 : f32
    %230 = vector.broadcast %cst_219 : f32 to vector<32x384xf32>
    %231 = arith.maximumf %229, %230 : vector<32x384xf32>
    %c9 = arith.constant 9 : index
    %c0_220 = arith.constant 0 : index
    %c0_221 = arith.constant 0 : index
    %232 = vector.load %arg2[%c9, %c0_220, %c0_221] : memref<15x384x128xf32, #tpu.memory_space<vmem>>, vector<1x384x128xf32>
    %233 = vector.shape_cast %232 : vector<1x384x128xf32> to vector<384x128xf32>
    %cst_222 = arith.constant dense<0.000000e+00> : vector<32x128xf32>
    %234 = tpu.matmul %231, %233, %cst_222 {dimension_numbers = #tpu.dot_dimension_numbers<[1], [0], [0], [1], [0, 0, 1, 1], [], []>} : vector<32x384xf32>, vector<384x128xf32>, vector<32x128xf32> -> vector<32x128xf32>
    %c9_223 = arith.constant 9 : index
    %c0_224 = arith.constant 0 : index
    %c0_225 = arith.constant 0 : index
    %235 = vector.load %arg3[%c9_223, %c0_224, %c0_225] : memref<15x1x128xf32, #tpu.memory_space<vmem>>, vector<1x1x128xf32>
    %236 = vector.shape_cast %235 : vector<1x1x128xf32> to vector<1x128xf32>
    %237 = vector.broadcast %236 : vector<1x128xf32> to vector<32x128xf32>
    %238 = arith.addf %234, %237 : vector<32x128xf32>
    %cst_226 = arith.constant 0.000000e+00 : f32
    %239 = vector.broadcast %cst_226 : f32 to vector<32x128xf32>
    %240 = arith.maximumf %238, %239 : vector<32x128xf32>
    %c6_227 = arith.constant 6 : index
    %c0_228 = arith.constant 0 : index
    %c0_229 = arith.constant 0 : index
    %241 = vector.load %arg4[%c6_227, %c0_228, %c0_229] : memref<9x128x128xf32, #tpu.memory_space<vmem>>, vector<1x128x128xf32>
    %242 = vector.shape_cast %241 : vector<1x128x128xf32> to vector<128x128xf32>
    %cst_230 = arith.constant dense<0.000000e+00> : vector<32x128xf32>
    %243 = tpu.matmul %240, %242, %cst_230 {dimension_numbers = #tpu.dot_dimension_numbers<[1], [0], [0], [1], [0, 0, 1, 1], [], []>} : vector<32x128xf32>, vector<128x128xf32>, vector<32x128xf32> -> vector<32x128xf32>
    %c6_231 = arith.constant 6 : index
    %c0_232 = arith.constant 0 : index
    %c0_233 = arith.constant 0 : index
    %244 = vector.load %arg5[%c6_231, %c0_232, %c0_233] : memref<9x1x128xf32, #tpu.memory_space<vmem>>, vector<1x1x128xf32>
    %245 = vector.shape_cast %244 : vector<1x1x128xf32> to vector<1x128xf32>
    %246 = vector.broadcast %245 : vector<1x128xf32> to vector<32x128xf32>
    %247 = arith.addf %243, %246 : vector<32x128xf32>
    %248 = arith.addf %225, %247 : vector<32x128xf32>
    %c16_234 = arith.constant 16 : index
    %c0_235 = arith.constant 0 : index
    %249 = vector.load %arg7[%c16_234, %c0_235] : memref<96x128xf32, #tpu.memory_space<vmem>>, vector<32x128xf32>
    tpu.vector_store %arg7[%c16_234, %c0_235], %248 {strides = array<i32>} : memref<96x128xf32, #tpu.memory_space<vmem>>, vector<32x128xf32>,
    %c16_236 = arith.constant 16 : index
    %c0_237 = arith.constant 0 : index
    %250 = vector.load %arg7[%c16_236, %c0_237] : memref<96x128xf32, #tpu.memory_space<vmem>>, vector<32x128xf32>
    %c13_238 = arith.constant 13 : index
    %c0_239 = arith.constant 0 : index
    %251 = vector.load %arg7[%c13_238, %c0_239] : memref<96x128xf32, #tpu.memory_space<vmem>>, vector<32x128xf32>
    %c16_240 = arith.constant 16 : index
    %c0_241 = arith.constant 0 : index
    %252 = vector.load %arg7[%c16_240, %c0_241] : memref<96x128xf32, #tpu.memory_space<vmem>>, vector<32x128xf32>
    %c19_242 = arith.constant 19 : index
    %c0_243 = arith.constant 0 : index
    %253 = vector.load %arg7[%c19_242, %c0_243] : memref<96x128xf32, #tpu.memory_space<vmem>>, vector<32x128xf32>
    %254 = tpu.concatenate %251, %252, %253 in 1 : vector<32x128xf32>, vector<32x128xf32>, vector<32x128xf32> -> vector<32x384xf32>
    %cst_244 = arith.constant 0.000000e+00 : f32
    %255 = vector.broadcast %cst_244 : f32 to vector<32x384xf32>
    %256 = arith.maximumf %254, %255 : vector<32x384xf32>
    %c10 = arith.constant 10 : index
    %c0_245 = arith.constant 0 : index
    %c0_246 = arith.constant 0 : index
    %257 = vector.load %arg2[%c10, %c0_245, %c0_246] : memref<15x384x128xf32, #tpu.memory_space<vmem>>, vector<1x384x128xf32>
    %258 = vector.shape_cast %257 : vector<1x384x128xf32> to vector<384x128xf32>
    %cst_247 = arith.constant dense<0.000000e+00> : vector<32x128xf32>
    %259 = tpu.matmul %256, %258, %cst_247 {dimension_numbers = #tpu.dot_dimension_numbers<[1], [0], [0], [1], [0, 0, 1, 1], [], []>} : vector<32x384xf32>, vector<384x128xf32>, vector<32x128xf32> -> vector<32x128xf32>
    %c10_248 = arith.constant 10 : index
    %c0_249 = arith.constant 0 : index
    %c0_250 = arith.constant 0 : index
    %260 = vector.load %arg3[%c10_248, %c0_249, %c0_250] : memref<15x1x128xf32, #tpu.memory_space<vmem>>, vector<1x1x128xf32>
    %261 = vector.shape_cast %260 : vector<1x1x128xf32> to vector<1x128xf32>
    %262 = vector.broadcast %261 : vector<1x128xf32> to vector<32x128xf32>
    %263 = arith.addf %259, %262 : vector<32x128xf32>
    %cst_251 = arith.constant 0.000000e+00 : f32
    %264 = vector.broadcast %cst_251 : f32 to vector<32x128xf32>
    %265 = arith.maximumf %263, %264 : vector<32x128xf32>
    %c7_252 = arith.constant 7 : index
    %c0_253 = arith.constant 0 : index
    %c0_254 = arith.constant 0 : index
    %266 = vector.load %arg4[%c7_252, %c0_253, %c0_254] : memref<9x128x128xf32, #tpu.memory_space<vmem>>, vector<1x128x128xf32>
    %267 = vector.shape_cast %266 : vector<1x128x128xf32> to vector<128x128xf32>
    %cst_255 = arith.constant dense<0.000000e+00> : vector<32x128xf32>
    %268 = tpu.matmul %265, %267, %cst_255 {dimension_numbers = #tpu.dot_dimension_numbers<[1], [0], [0], [1], [0, 0, 1, 1], [], []>} : vector<32x128xf32>, vector<128x128xf32>, vector<32x128xf32> -> vector<32x128xf32>
    %c7_256 = arith.constant 7 : index
    %c0_257 = arith.constant 0 : index
    %c0_258 = arith.constant 0 : index
    %269 = vector.load %arg5[%c7_256, %c0_257, %c0_258] : memref<9x1x128xf32, #tpu.memory_space<vmem>>, vector<1x1x128xf32>
    %270 = vector.shape_cast %269 : vector<1x1x128xf32> to vector<1x128xf32>
    %271 = vector.broadcast %270 : vector<1x128xf32> to vector<32x128xf32>
    %272 = arith.addf %268, %271 : vector<32x128xf32>
    %273 = arith.addf %250, %272 : vector<32x128xf32>
    %c16_259 = arith.constant 16 : index
    %c0_260 = arith.constant 0 : index
    %274 = vector.load %arg7[%c16_259, %c0_260] : memref<96x128xf32, #tpu.memory_space<vmem>>, vector<32x128xf32>
    tpu.vector_store %arg7[%c16_259, %c0_260], %273 {strides = array<i32>} : memref<96x128xf32, #tpu.memory_space<vmem>>, vector<32x128xf32>,
    %c16_261 = arith.constant 16 : index
    %c0_262 = arith.constant 0 : index
    %275 = vector.load %arg7[%c16_261, %c0_262] : memref<96x128xf32, #tpu.memory_space<vmem>>, vector<32x128xf32>
    %c15_263 = arith.constant 15 : index
    %c0_264 = arith.constant 0 : index
    %276 = vector.load %arg7[%c15_263, %c0_264] : memref<96x128xf32, #tpu.memory_space<vmem>>, vector<32x128xf32>
    %c16_265 = arith.constant 16 : index
    %c0_266 = arith.constant 0 : index
    %277 = vector.load %arg7[%c16_265, %c0_266] : memref<96x128xf32, #tpu.memory_space<vmem>>, vector<32x128xf32>
    %c17_267 = arith.constant 17 : index
    %c0_268 = arith.constant 0 : index
    %278 = vector.load %arg7[%c17_267, %c0_268] : memref<96x128xf32, #tpu.memory_space<vmem>>, vector<32x128xf32>
    %279 = tpu.concatenate %276, %277, %278 in 1 : vector<32x128xf32>, vector<32x128xf32>, vector<32x128xf32> -> vector<32x384xf32>
    %cst_269 = arith.constant 0.000000e+00 : f32
    %280 = vector.broadcast %cst_269 : f32 to vector<32x384xf32>
    %281 = arith.maximumf %279, %280 : vector<32x384xf32>
    %c11 = arith.constant 11 : index
    %c0_270 = arith.constant 0 : index
    %c0_271 = arith.constant 0 : index
    %282 = vector.load %arg2[%c11, %c0_270, %c0_271] : memref<15x384x128xf32, #tpu.memory_space<vmem>>, vector<1x384x128xf32>
    %283 = vector.shape_cast %282 : vector<1x384x128xf32> to vector<384x128xf32>
    %cst_272 = arith.constant dense<0.000000e+00> : vector<32x128xf32>
    %284 = tpu.matmul %281, %283, %cst_272 {dimension_numbers = #tpu.dot_dimension_numbers<[1], [0], [0], [1], [0, 0, 1, 1], [], []>} : vector<32x384xf32>, vector<384x128xf32>, vector<32x128xf32> -> vector<32x128xf32>
    %c11_273 = arith.constant 11 : index
    %c0_274 = arith.constant 0 : index
    %c0_275 = arith.constant 0 : index
    %285 = vector.load %arg3[%c11_273, %c0_274, %c0_275] : memref<15x1x128xf32, #tpu.memory_space<vmem>>, vector<1x1x128xf32>
    %286 = vector.shape_cast %285 : vector<1x1x128xf32> to vector<1x128xf32>
    %287 = vector.broadcast %286 : vector<1x128xf32> to vector<32x128xf32>
    %288 = arith.addf %284, %287 : vector<32x128xf32>
    %cst_276 = arith.constant 0.000000e+00 : f32
    %289 = vector.broadcast %cst_276 : f32 to vector<32x128xf32>
    %290 = arith.maximumf %288, %289 : vector<32x128xf32>
    %c8_277 = arith.constant 8 : index
    %c0_278 = arith.constant 0 : index
    %c0_279 = arith.constant 0 : index
    %291 = vector.load %arg4[%c8_277, %c0_278, %c0_279] : memref<9x128x128xf32, #tpu.memory_space<vmem>>, vector<1x128x128xf32>
    %292 = vector.shape_cast %291 : vector<1x128x128xf32> to vector<128x128xf32>
    %cst_280 = arith.constant dense<0.000000e+00> : vector<32x128xf32>
    %293 = tpu.matmul %290, %292, %cst_280 {dimension_numbers = #tpu.dot_dimension_numbers<[1], [0], [0], [1], [0, 0, 1, 1], [], []>} : vector<32x128xf32>, vector<128x128xf32>, vector<32x128xf32> -> vector<32x128xf32>
    %c8_281 = arith.constant 8 : index
    %c0_282 = arith.constant 0 : index
    %c0_283 = arith.constant 0 : index
    %294 = vector.load %arg5[%c8_281, %c0_282, %c0_283] : memref<9x1x128xf32, #tpu.memory_space<vmem>>, vector<1x1x128xf32>
    %295 = vector.shape_cast %294 : vector<1x1x128xf32> to vector<1x128xf32>
    %296 = vector.broadcast %295 : vector<1x128xf32> to vector<32x128xf32>
    %297 = arith.addf %293, %296 : vector<32x128xf32>
    %298 = arith.addf %275, %297 : vector<32x128xf32>
    %c16_284 = arith.constant 16 : index
    %c0_285 = arith.constant 0 : index
    %299 = vector.load %arg7[%c16_284, %c0_285] : memref<96x128xf32, #tpu.memory_space<vmem>>, vector<32x128xf32>
    tpu.vector_store %arg7[%c16_284, %c0_285], %298 {strides = array<i32>} : memref<96x128xf32, #tpu.memory_space<vmem>>, vector<32x128xf32>,
    %c16_286 = arith.constant 16 : index
    %c0_287 = arith.constant 0 : index
    %300 = vector.load %arg7[%c16_286, %c0_287] : memref<96x128xf32, #tpu.memory_space<vmem>>, vector<32x128xf32>
    %301 = tpu.iota {dimensions = array<i32: 0>} : vector<64x32xi32>
    %302 = tpu.iota {dimensions = array<i32: 1>} : vector<64x32xi32>
    %c2_i32_288 = arith.constant 2 : i32
    %303 = vector.broadcast %c2_i32_288 : i32 to vector<64x32xi32>
    %304 = arith.muli %303, %302 : vector<64x32xi32>
    %305 = arith.subi %301, %304 : vector<64x32xi32>
    %c0_i32_289 = arith.constant 0 : i32
    %306 = vector.broadcast %c0_i32_289 : i32 to vector<64x32xi32>
    %307 = arith.cmpi sge, %305, %306 : vector<64x32xi32>
    %c1_i32_290 = arith.constant 1 : i32
    %308 = vector.broadcast %c1_i32_290 : i32 to vector<64x32xi32>
    %309 = arith.cmpi sle, %305, %308 : vector<64x32xi32>
    %310 = arith.andi %307, %309 : vector<64x32xi1>
    %cst_291 = arith.constant 1.000000e+00 : f32
    %cst_292 = arith.constant 0.000000e+00 : f32
    %311 = vector.broadcast %cst_291 : f32 to vector<64x32xf32>
    %312 = vector.broadcast %cst_292 : f32 to vector<64x32xf32>
    %313 = arith.select %310, %311, %312 : vector<64x32xi1>, vector<64x32xf32>
    %cst_293 = arith.constant dense<0.000000e+00> : vector<64x128xf32>
    %314 = tpu.matmul %313, %300, %cst_293 {dimension_numbers = #tpu.dot_dimension_numbers<[1], [0], [0], [1], [0, 0, 1, 1], [], []>} : vector<64x32xf32>, vector<32x128xf32>, vector<64x128xf32> -> vector<64x128xf32>
    %c16_294 = arith.constant 16 : index
    %c0_295 = arith.constant 0 : index
    %315 = vector.load %arg7[%c16_294, %c0_295] : memref<96x128xf32, #tpu.memory_space<vmem>>, vector<64x128xf32>
    tpu.vector_store %arg7[%c16_294, %c0_295], %314 {strides = array<i32>} : memref<96x128xf32, #tpu.memory_space<vmem>>, vector<64x128xf32>,
    %c15_296 = arith.constant 15 : index
    %c0_297 = arith.constant 0 : index
    %316 = vector.load %arg7[%c15_296, %c0_297] : memref<96x128xf32, #tpu.memory_space<vmem>>, vector<64x128xf32>
    %c16_298 = arith.constant 16 : index
    %c0_299 = arith.constant 0 : index
    %317 = vector.load %arg7[%c16_298, %c0_299] : memref<96x128xf32, #tpu.memory_space<vmem>>, vector<64x128xf32>
    %c17_300 = arith.constant 17 : index
    %c0_301 = arith.constant 0 : index
    %318 = vector.load %arg7[%c17_300, %c0_301] : memref<96x128xf32, #tpu.memory_space<vmem>>, vector<64x128xf32>
    %319 = tpu.concatenate %316, %317, %318 in 1 : vector<64x128xf32>, vector<64x128xf32>, vector<64x128xf32> -> vector<64x384xf32>
    %c12 = arith.constant 12 : index
    %c0_302 = arith.constant 0 : index
    %c0_303 = arith.constant 0 : index
    %320 = vector.load %arg2[%c12, %c0_302, %c0_303] : memref<15x384x128xf32, #tpu.memory_space<vmem>>, vector<1x384x128xf32>
    %321 = vector.shape_cast %320 : vector<1x384x128xf32> to vector<384x128xf32>
    %cst_304 = arith.constant dense<0.000000e+00> : vector<64x128xf32>
    %322 = tpu.matmul %319, %321, %cst_304 {dimension_numbers = #tpu.dot_dimension_numbers<[1], [0], [0], [1], [0, 0, 1, 1], [], []>} : vector<64x384xf32>, vector<384x128xf32>, vector<64x128xf32> -> vector<64x128xf32>
    %c12_305 = arith.constant 12 : index
    %c0_306 = arith.constant 0 : index
    %c0_307 = arith.constant 0 : index
    %323 = vector.load %arg3[%c12_305, %c0_306, %c0_307] : memref<15x1x128xf32, #tpu.memory_space<vmem>>, vector<1x1x128xf32>
    %324 = vector.shape_cast %323 : vector<1x1x128xf32> to vector<1x128xf32>
    %325 = vector.broadcast %324 : vector<1x128xf32> to vector<64x128xf32>
    %326 = arith.addf %322, %325 : vector<64x128xf32>
    %c16_308 = arith.constant 16 : index
    %c0_309 = arith.constant 0 : index
    %327 = vector.load %arg7[%c16_308, %c0_309] : memref<96x128xf32, #tpu.memory_space<vmem>>, vector<64x128xf32>
    tpu.vector_store %arg7[%c16_308, %c0_309], %326 {strides = array<i32>} : memref<96x128xf32, #tpu.memory_space<vmem>>, vector<64x128xf32>,
    %c15_310 = arith.constant 15 : index
    %c0_311 = arith.constant 0 : index
    %328 = vector.load %arg7[%c15_310, %c0_311] : memref<96x128xf32, #tpu.memory_space<vmem>>, vector<64x128xf32>
    %c16_312 = arith.constant 16 : index
    %c0_313 = arith.constant 0 : index
    %329 = vector.load %arg7[%c16_312, %c0_313] : memref<96x128xf32, #tpu.memory_space<vmem>>, vector<64x128xf32>
    %c17_314 = arith.constant 17 : index
    %c0_315 = arith.constant 0 : index
    %330 = vector.load %arg7[%c17_314, %c0_315] : memref<96x128xf32, #tpu.memory_space<vmem>>, vector<64x128xf32>
    %331 = tpu.concatenate %328, %329, %330 in 1 : vector<64x128xf32>, vector<64x128xf32>, vector<64x128xf32> -> vector<64x384xf32>
    %c13_316 = arith.constant 13 : index
    %c0_317 = arith.constant 0 : index
    %c0_318 = arith.constant 0 : index
    %332 = vector.load %arg2[%c13_316, %c0_317, %c0_318] : memref<15x384x128xf32, #tpu.memory_space<vmem>>, vector<1x384x128xf32>
    %333 = vector.shape_cast %332 : vector<1x384x128xf32> to vector<384x128xf32>
    %cst_319 = arith.constant dense<0.000000e+00> : vector<64x128xf32>
    %334 = tpu.matmul %331, %333, %cst_319 {dimension_numbers = #tpu.dot_dimension_numbers<[1], [0], [0], [1], [0, 0, 1, 1], [], []>} : vector<64x384xf32>, vector<384x128xf32>, vector<64x128xf32> -> vector<64x128xf32>
    %c13_320 = arith.constant 13 : index
    %c0_321 = arith.constant 0 : index
    %c0_322 = arith.constant 0 : index
    %335 = vector.load %arg3[%c13_320, %c0_321, %c0_322] : memref<15x1x128xf32, #tpu.memory_space<vmem>>, vector<1x1x128xf32>
    %336 = vector.shape_cast %335 : vector<1x1x128xf32> to vector<1x128xf32>
    %337 = vector.broadcast %336 : vector<1x128xf32> to vector<64x128xf32>
    %338 = arith.addf %334, %337 : vector<64x128xf32>
    %cst_323 = arith.constant 0.000000e+00 : f32
    %339 = vector.broadcast %cst_323 : f32 to vector<64x128xf32>
    %340 = arith.maximumf %338, %339 : vector<64x128xf32>
    %c16_324 = arith.constant 16 : index
    %c0_325 = arith.constant 0 : index
    %341 = vector.load %arg7[%c16_324, %c0_325] : memref<96x128xf32, #tpu.memory_space<vmem>>, vector<64x128xf32>
    tpu.vector_store %arg7[%c16_324, %c0_325], %340 {strides = array<i32>} : memref<96x128xf32, #tpu.memory_space<vmem>>, vector<64x128xf32>,
    %c15_326 = arith.constant 15 : index
    %c0_327 = arith.constant 0 : index
    %342 = vector.load %arg7[%c15_326, %c0_327] : memref<96x128xf32, #tpu.memory_space<vmem>>, vector<64x128xf32>
    %c16_328 = arith.constant 16 : index
    %c0_329 = arith.constant 0 : index
    %343 = vector.load %arg7[%c16_328, %c0_329] : memref<96x128xf32, #tpu.memory_space<vmem>>, vector<64x128xf32>
    %c17_330 = arith.constant 17 : index
    %c0_331 = arith.constant 0 : index
    %344 = vector.load %arg7[%c17_330, %c0_331] : memref<96x128xf32, #tpu.memory_space<vmem>>, vector<64x128xf32>
    %345 = tpu.concatenate %342, %343, %344 in 1 : vector<64x128xf32>, vector<64x128xf32>, vector<64x128xf32> -> vector<64x384xf32>
    %c14 = arith.constant 14 : index
    %c0_332 = arith.constant 0 : index
    %c0_333 = arith.constant 0 : index
    %346 = vector.load %arg2[%c14, %c0_332, %c0_333] : memref<15x384x128xf32, #tpu.memory_space<vmem>>, vector<1x384x128xf32>
    %347 = vector.shape_cast %346 : vector<1x384x128xf32> to vector<384x128xf32>
    %cst_334 = arith.constant dense<0.000000e+00> : vector<64x128xf32>
    %348 = tpu.matmul %345, %347, %cst_334 {dimension_numbers = #tpu.dot_dimension_numbers<[1], [0], [0], [1], [0, 0, 1, 1], [], []>} : vector<64x384xf32>, vector<384x128xf32>, vector<64x128xf32> -> vector<64x128xf32>
    %c14_335 = arith.constant 14 : index
    %c0_336 = arith.constant 0 : index
    %c0_337 = arith.constant 0 : index
    %349 = vector.load %arg3[%c14_335, %c0_336, %c0_337] : memref<15x1x128xf32, #tpu.memory_space<vmem>>, vector<1x1x128xf32>
    %350 = vector.shape_cast %349 : vector<1x1x128xf32> to vector<1x128xf32>
    %351 = vector.broadcast %350 : vector<1x128xf32> to vector<64x128xf32>
    %352 = arith.addf %348, %351 : vector<64x128xf32>
    %c0_338 = arith.constant 0 : index
    %c0_339 = arith.constant 0 : index
    %c0_340 = arith.constant 0 : index
    %353 = vector.load %arg6[%c0_338, %c0_339, %c0_340] : memref<1x64x128xf32, #tpu.memory_space<vmem>>, vector<1x64x128xf32>
    %354 = vector.shape_cast %353 : vector<1x64x128xf32> to vector<64x128xf32>
    %355 = vector.shape_cast %352 : vector<64x128xf32> to vector<1x64x128xf32>
    tpu.vector_store %arg6[%c0_338, %c0_339, %c0_340], %355 {strides = array<i32>} : memref<1x64x128xf32, #tpu.memory_space<vmem>>, vector<1x64x128xf32>,
    return
  }
  func.func @transform_0(%arg0: i32) -> (i32, i32, i32) {
    %c0_i32 = arith.constant 0 : i32
    %c0_i32_0 = arith.constant 0 : i32
    %c0_i32_1 = arith.constant 0 : i32
    return %arg0, %c0_i32, %c0_i32_0 : i32, i32, i32
  }
  func.func @transform_1(%arg0: i32) -> (i32, i32, i32) {
    %c0_i32 = arith.constant 0 : i32
    %c0_i32_0 = arith.constant 0 : i32
    %c0_i32_1 = arith.constant 0 : i32
    %c0_i32_2 = arith.constant 0 : i32
    return %c0_i32, %c0_i32_0, %c0_i32_1 : i32, i32, i32
  }
  func.func @transform_2(%arg0: i32) -> (i32, i32, i32) {
    %c0_i32 = arith.constant 0 : i32
    %c0_i32_0 = arith.constant 0 : i32
    %c0_i32_1 = arith.constant 0 : i32
    %c0_i32_2 = arith.constant 0 : i32
    return %c0_i32, %c0_i32_0, %c0_i32_1 : i32, i32, i32
  }
  func.func @transform_3(%arg0: i32) -> (i32, i32, i32) {
    %c0_i32 = arith.constant 0 : i32
    %c0_i32_0 = arith.constant 0 : i32
    %c0_i32_1 = arith.constant 0 : i32
    %c0_i32_2 = arith.constant 0 : i32
    return %c0_i32, %c0_i32_0, %c0_i32_1 : i32, i32, i32
  }
  func.func @transform_4(%arg0: i32) -> (i32, i32, i32) {
    %c0_i32 = arith.constant 0 : i32
    %c0_i32_0 = arith.constant 0 : i32
    %c0_i32_1 = arith.constant 0 : i32
    %c0_i32_2 = arith.constant 0 : i32
    return %c0_i32, %c0_i32_0, %c0_i32_1 : i32, i32, i32
  }
  func.func @transform_5(%arg0: i32) -> (i32, i32, i32) {
    %c0_i32 = arith.constant 0 : i32
    %c0_i32_0 = arith.constant 0 : i32
    %c0_i32_1 = arith.constant 0 : i32
    return %arg0, %c0_i32, %c0_i32_0 : i32, i32, i32
  }
}

</mosaic_0001>

<bundles_post_ra>
// kernel: decoder_forward.1
= control target key start
LH: loop header
LB: loop body
LE: loop exit
PB: predicated region body
PF: predicated region fallthrough
CT: control target
= control target key end

     0   :  { %s9393_s18 = smov 0   ;;  %s12391_s0 = inlined_call_operand.vmem [shape: f32[2,8,128], index: 0, kind: input, shape index: {}]   ;;  %s12392_s1 = inlined_call_operand.vmem [shape: f32[15,384,128], index: 1, kind: input, shape index: {}]   ;;  %s12393_s2 = inlined_call_operand.vmem [shape: f32[15,1,128], index: 2, kind: input, shape index: {}]   ;;  %s12394_s3 = inlined_call_operand.vmem [shape: f32[9,128,128], index: 3, kind: input, shape index: {}]   ;;  %s12395_s4 = inlined_call_operand.vmem [shape: f32[9,1,128], index: 4, kind: input, shape index: {}]   ;;  %s12396_s5 = inlined_call_operand.vmem [shape: f32[2,64,128], index: 5, kind: output, shape index: {}]  }
   0x1 LB: > { %s5226_s19 = sadd.s32 4294967295, %s9358_s18   ;;  %p5230_p0 = scmp.ge.s32.totalorder %s9358_s18, 1  ;;  %s9358_s18 = sphi %s9393_s18, %s15_s18  }
   0x2   : > { %p186_p1 = scmp.lt.s32.totalorder %s9358_s18, 3 }
   0x4   : > { %p187_p2 = pnand %p5230_p0, %p186_p1 }
   0x5   : > { %v255_v0 = vld [vmem:[%s12392_s1 + $0x80] sm:$0xff] (!%p187_p2)  ;;  %v256_v1 = vld [vmem:[%s12392_s1 + $0x88] sm:$0xff] (!%p187_p2)  ;;  %v257_v5 = vld [vmem:[%s12392_s1 + $0x90] sm:$0xff] (!%p187_p2)  ;;  %v9360_v7 = vmov (!%p187_p2), 0.0|0.0   ;;  %p9422_p3 = scmp.lt.s32.totalorder (!%p187_p2), %s5226_s19, 1  ;;  %v9361_v8 = vmov (!%p187_p2), 0.0  }
   0x6   : > { %190 = sbr.rel (%p187_p2) target bundleno = 6147 (0x1803), region = 40  ;;  %v239_v2 = vld [vmem:[%s12392_s1] sm:$0xff] (!%p187_p2)  ;;  %v8134_v3 = vpack.c.bf16 (!%p187_p2), %v256_v1, %v255_v0  ;;  %v240_v4 = vld [vmem:[%s12392_s1 + $0x8] sm:$0xff] (!%p187_p2)  ;;  %v258_v6 = vld [vmem:[%s12392_s1 + $0x98] sm:$0xff] (!%p187_p2)  ;;  %8166 = vmatprep.subr.bf16.mxu1 (!%p187_p2), %v9360_v7  ;;  %223 = vst [vmem:[#allocation2 + $0x8] sm:$0xff] (!%p187_p2), %v9361_v8  ;;  %vm9362_vm0 = vmmov (!%p187_p2), 0  }
   0x7   : > { %225 = vst [vmem:[#allocation2 + $0x18] sm:$0xff] (!%p187_p2), %v9361_v8  ;;  %222 = vst [vmem:[#allocation2] sm:$0xff] (!%p187_p2), %v9361_v8  ;;  %v8136_v9 = vpack.c.bf16 (!%p187_p2), %v240_v4, %v239_v2  ;;  %v8138_v10 = vpack.c.bf16 (!%p187_p2), %v258_v6, %v257_v5  ;;  %v241_v11 = vld [vmem:[%s12392_s1 + $0x10] sm:$0xff] (!%p187_p2)  ;;  %v242_v12 = vld [vmem:[%s12392_s1 + $0x18] sm:$0xff] (!%p187_p2)  ;;  %7243 = vmatprep.mubr.msk.f32.mxu1 (!%p187_p2), %vm9362_vm0, %v9361_v8  ;;  %vm1354_vm4 = vcmask (!%p187_p2), 64512   ;;  %vm2642_vm8 = vcmask (!%p187_p2), 130048  }
   0x8   : > { %226 = vst [vmem:[#allocation2 + $0x20] sm:$0xff] (!%p187_p2), %v9361_v8  ;;  %227 = vst [vmem:[#allocation2 + $0x28] sm:$0xff] (!%p187_p2), %v9361_v8  ;;  %v271_v13 = vld [vmem:[%s12392_s1 + $0x100] sm:$0xff] (!%p187_p2)  ;;  %8135 = vmatprep.subr.bf16.mxu0 (!%p187_p2), %v8134_v3  ;;  %v272_v14 = vld [vmem:[%s12392_s1 + $0x108] sm:$0xff] (!%p187_p2)  ;;  %v8140_v17 = vpack.c.bf16 (!%p187_p2), %v242_v12, %v241_v11  ;;  %vm4132_vm15 = vcmask (!%p187_p2), 261120  }
   0x9   : > { %228 = vst [vmem:[#allocation2 + $0x30] sm:$0xff] (!%p187_p2), %v9361_v8  ;;  %229 = vst [vmem:[#allocation2 + $0x38] sm:$0xff] (!%p187_p2), %v9361_v8  ;;  %v259_v15 = vld [vmem:[%s12392_s1 + $0xa0] sm:$0xff] (!%p187_p2)  ;;  %v260_v16 = vld [vmem:[%s12392_s1 + $0xa8] sm:$0xff] (!%p187_p2)  ;;  %8137 = vmatpush3.bf16.msra.mxu0 (!%p187_p2), %v8136_v9  ;;  %v8167_v18 = vpack.c.bf16 (!%p187_p2), %v272_v14, %v271_v13 }
   0xa   : > { %232 = vst [vmem:[#allocation2 + $0x50] sm:$0xff] (!%p187_p2), %v9361_v8  ;;  %v273_v19 = vld [vmem:[%s12392_s1 + $0x110] sm:$0xff] (!%p187_p2)  ;;  %8139 = vmatprep.subr.bf16.mxu0 (!%p187_p2), %v8138_v10  ;;  %v8142_v20 = vpack.c.bf16 (!%p187_p2), %v260_v16, %v259_v15  ;;  %v243_v21 = vld [vmem:[%s12392_s1 + $0x20] sm:$0xff] (!%p187_p2)  ;;  %v244_v22 = vld [vmem:[%s12392_s1 + $0x28] sm:$0xff] (!%p187_p2) }
   0xb   : > { %v274_v23 = vld [vmem:[%s12392_s1 + $0x118] sm:$0xff] (!%p187_p2)  ;;  %8168 = vmatpush3.bf16.msra.mxu1 (!%p187_p2), %v8167_v18  ;;  %v261_v25 = vld [vmem:[%s12392_s1 + $0xb0] sm:$0xff] (!%p187_p2)  ;;  %v275_v27 = vld [vmem:[%s12392_s1 + $0x120] sm:$0xff] (!%p187_p2)  ;;  %v8144_v29 = vpack.c.bf16 (!%p187_p2), %v244_v22, %v243_v21 }
   0xc   : > { %v8170_v24 = vpack.c.bf16 (!%p187_p2), %v274_v23, %v273_v19  ;;  %v262_v26 = vld [vmem:[%s12392_s1 + $0xb8] sm:$0xff] (!%p187_p2)  ;;  %8169 = vmatprep.subr.bf16.mxu1 (!%p187_p2), %v9360_v7  ;;  %v276_v28 = vld [vmem:[%s12392_s1 + $0x128] sm:$0xff] (!%p187_p2)  ;;  %v245_v31 = vld [vmem:[%s12392_s1 + $0x30] sm:$0xff] (!%p187_p2) }
   0xd   : > { %s12407_s19 = smov (!%p9422_p3, %s5226_s19), 1  ;;  %8141 = vmatpush3.bf16.msra.mxu0 %v8140_v17  ;;  %v8146_v30 = vpack.c.bf16 %v262_v26, %v261_v25  ;;  %v246_v32 = vld [vmem:[%s12392_s1 + $0x38] sm:$0xff]  ;;  %v8173_v33 = vpack.c.bf16 %v276_v28, %v275_v27  ;;  %v263_v34 = vld [vmem:[%s12392_s1 + $0xc0] sm:$0xff]  ;;  %v264_v35 = vld [vmem:[%s12392_s1 + $0xc8] sm:$0xff] }
   0xe   : > { %8143 = vmatprep.subr.bf16.mxu0 %v8142_v20  ;;  %s5231_s17 = sshll.u32 %s12407_s19, 3  ;;  %v277_v36 = vld [vmem:[%s12392_s1 + $0x130] sm:$0xff]  ;;  %v278_v37 = vld [vmem:[%s12392_s1 + $0x138] sm:$0xff]  ;;  %v8148_v38 = vpack.c.bf16 %v246_v32, %v245_v31  ;;  %v8150_v39 = vpack.c.bf16 %v264_v35, %v263_v34  ;;  %v247_v40 = vld [vmem:[%s12392_s1 + $0x40] sm:$0xff] }
   0xf   : > { %8171 = vmatpush3.bf16.msra.mxu1 %v8170_v24  ;;  %s216_s30 = scalar_lea.vmem %s12391_s0, %s5231_s17  ;;  %v248_v41 = vld [vmem:[%s12392_s1 + $0x48] sm:$0xff]  ;;  %v8176_v42 = vpack.c.bf16 %v278_v37, %v277_v36  ;;  %v265_v43 = vld [vmem:[%s12392_s1 + $0xd0] sm:$0xff]  ;;  %v266_v44 = vld [vmem:[%s12392_s1 + $0xd8] sm:$0xff] }
  0x10   : > { %8172 = vmatprep.subr.bf16.mxu1 %v9360_v7  ;;  %v279_v45 = vld [vmem:[%s12392_s1 + $0x140] sm:$0xff]  ;;  %v280_v46 = vld [vmem:[%s12392_s1 + $0x148] sm:$0xff]  ;;  %v8152_v48 = vpack.c.bf16 %v248_v41, %v247_v40  ;;  %v8154_v49 = vpack.c.bf16 %v266_v44, %v265_v43  ;;  %v249_v50 = vld [vmem:[%s12392_s1 + $0x50] sm:$0xff] }
  0x11   : > { %8145 = vmatpush3.bf16.msra.mxu0 %v8144_v29  ;;  %v234_v47 = vld [vmem:[%s216_s30] sm:$0xff]  ;;  %v250_v51 = vld [vmem:[%s12392_s1 + $0x58] sm:$0xff]  ;;  %v8179_v52 = vpack.c.bf16 %v280_v46, %v279_v45  ;;  %v268_v54 = vld [vmem:[%s12392_s1 + $0xe8] sm:$0xff]  ;;  %s6096_s30 = sshll.u32 %s12407_s19, 6 }
  0x12   : > { %8147 = vmatprep.subr.bf16.mxu0 %v8146_v30  ;;  %235 = vst [vmem:[#allocation2 + $0x10] sm:$0xff] %v234_v47  ;;  %358 = vmatprep.mubr.f32.mxu0 %v234_v47  ;;  %v267_v53 = vld [vmem:[%s12392_s1 + $0xe0] sm:$0xff]  ;;  %v281_v55 = vld [vmem:[%s12392_s1 + $0x150] sm:$0xff]  ;;  %v282_v56 = vld [vmem:[%s12392_s1 + $0x158] sm:$0xff]  ;;  %v8156_v57 = vpack.c.bf16 %v250_v51, %v249_v50  ;;  %s12378_s9 = scalar_lea.vmem %s12396_s5, %s6096_s30 }
  0x13   : > { %8174 = vmatpush3.bf16.msra.mxu1 %v8173_v33  ;;  %v8158_v58 = vpack.c.bf16 %v268_v54, %v267_v53  ;;  %v251_v59 = vld [vmem:[%s12392_s1 + $0x60] sm:$0xff]  ;;  %v252_v60 = vld [vmem:[%s12392_s1 + $0x68] sm:$0xff]  ;;  %v8182_v61 = vpack.c.bf16 %v282_v56, %v281_v55  ;;  %v269_v62 = vld [vmem:[%s12392_s1 + $0xf0] sm:$0xff] }
  0x14   : > { %8175 = vmatprep.subr.bf16.mxu1 %v9360_v7  ;;  %v270_v63 = vld [vmem:[%s12392_s1 + $0xf8] sm:$0xff]  ;;  %v283_v0 = vld [vmem:[%s12392_s1 + $0x160] sm:$0xff]  ;;  %v284_v1 = vld [vmem:[%s12392_s1 + $0x168] sm:$0xff]  ;;  %v8160_v2 = vpack.c.bf16 %v252_v60, %v251_v59 }
  0x15   : > { %8149 = vmatpush3.bf16.msra.mxu0 %v8148_v38  ;;  %v8162_v3 = vpack.c.bf16 %v270_v63, %v269_v62  ;;  %v253_v4 = vld [vmem:[%s12392_s1 + $0x70] sm:$0xff]  ;;  %v254_v5 = vld [vmem:[%s12392_s1 + $0x78] sm:$0xff]  ;;  %v8185_v6 = vpack.c.bf16 %v284_v1, %v283_v0  ;;  %v5251_v9 = vld [vmem:[%s12392_s1 + $0x200] sm:$0xff] }
  0x16   : > { %8151 = vmatprep.subr.bf16.mxu0 %v8150_v39  ;;  %v5252_v10 = vld [vmem:[%s12392_s1 + $0x208] sm:$0xff]  ;;  %v285_v11 = vld [vmem:[%s12392_s1 + $0x170] sm:$0xff]  ;;  %v286_v12 = vld [vmem:[%s12392_s1 + $0x178] sm:$0xff]  ;;  %v8164_v13 = vpack.c.bf16 %v254_v5, %v253_v4 }
  0x17   : > { %8177 = vmatpush3.bf16.msra.mxu1 %v8176_v42  ;;  %v8190_v14 = vpack.c.bf16 %v5252_v10, %v5251_v9  ;;  %v5235_v15 = vld [vmem:[%s12392_s1 + $0x180] sm:$0xff]  ;;  %v5236_v16 = vld [vmem:[%s12392_s1 + $0x188] sm:$0xff]  ;;  %v8188_v17 = vpack.c.bf16 %v286_v12, %v285_v11  ;;  %v5253_v18 = vld [vmem:[%s12392_s1 + $0x210] sm:$0xff] }
  0x18   : > { %8178 = vmatprep.subr.bf16.mxu1 %v9360_v7  ;;  %v5254_v19 = vld [vmem:[%s12392_s1 + $0x218] sm:$0xff]  ;;  %v5267_v20 = vld [vmem:[%s12392_s1 + $0x280] sm:$0xff]  ;;  %v5268_v21 = vld [vmem:[%s12392_s1 + $0x288] sm:$0xff]  ;;  %v8192_v23 = vpack.c.bf16 %v5236_v16, %v5235_v15 }
  0x19   : > { %8153 = vmatpush3.bf16.msra.mxu0 %v8152_v48  ;;  %v236_v22 = vld [vmem:[#allocation2 + $0xf] sm:$0xff]  ;;  %v8194_v24 = vpack.c.bf16 %v5254_v19, %v5253_v18  ;;  %v5238_v26 = vld [vmem:[%s12392_s1 + $0x198] sm:$0xff]  ;;  %v8223_v28 = vpack.c.bf16 %v5268_v21, %v5267_v20  ;;  %v5255_v29 = vld [vmem:[%s12392_s1 + $0x220] sm:$0xff] }
  0x1a   : > { %8155 = vmatprep.subr.bf16.mxu0 %v8154_v49  ;;  %v5237_v25 = vld [vmem:[%s12392_s1 + $0x190] sm:$0xff]  ;;  %v5256_v30 = vld [vmem:[%s12392_s1 + $0x228] sm:$0xff]  ;;  %v5270_v32 = vld [vmem:[%s12392_s1 + $0x298] sm:$0xff] }
  0x1b   : > { %8180 = vmatpush3.bf16.msra.mxu1 %v8179_v52  ;;  %v238_v27 = vld [vmem:[#allocation2 + $0x11] sm:$0xff]  ;;  %v8196_v33 = vpack.c.bf16 %v5238_v26, %v5237_v25  ;;  %v8198_v34 = vpack.c.bf16 %v5256_v30, %v5255_v29  ;;  %v5239_v35 = vld [vmem:[%s12392_s1 + $0x1a0] sm:$0xff]  ;;  %v5240_v36 = vld [vmem:[%s12392_s1 + $0x1a8] sm:$0xff] }
  0x1c   : > { %8181 = vmatprep.subr.bf16.mxu1 %v9360_v7  ;;  %v5269_v31 = vld [vmem:[%s12392_s1 + $0x290] sm:$0xff]  ;;  %v8200_v38 = vpack.c.bf16 %v5240_v36, %v5239_v35  ;;  %v5258_v40 = vld [vmem:[%s12392_s1 + $0x238] sm:$0xff]  ;;  %v5271_v44 = vld [vmem:[%s12392_s1 + $0x2a0] sm:$0xff] }
  0x1d   : > { %8157 = vmatpush3.bf16.msra.mxu0 %v8156_v57  ;;  %v8226_v37 = vpack.c.bf16 %v5270_v32, %v5269_v31  ;;  %v5257_v39 = vld [vmem:[%s12392_s1 + $0x230] sm:$0xff]  ;;  %v5242_v43 = vld [vmem:[%s12392_s1 + $0x1b8] sm:$0xff]  ;;  %v5272_v46 = vld [vmem:[%s12392_s1 + $0x2a8] sm:$0xff] }
  0x1e   : > { %8159 = vmatprep.subr.bf16.mxu0 %v8158_v58  ;;  %v8202_v41 = vpack.c.bf16 %v5258_v40, %v5257_v39  ;;  %v5241_v42 = vld [vmem:[%s12392_s1 + $0x1b0] sm:$0xff]  ;;  %v8229_v47 = vpack.c.bf16 %v5272_v46, %v5271_v44  ;;  %v5259_v48 = vld [vmem:[%s12392_s1 + $0x240] sm:$0xff]  ;;  %v5260_v49 = vld [vmem:[%s12392_s1 + $0x248] sm:$0xff] }
  0x1f   : > { %8183 = vmatpush3.bf16.msra.mxu1 %v8182_v61  ;;  %v8204_v45 = vpack.c.bf16 %v5242_v43, %v5241_v42  ;;  %v8206_v50 = vpack.c.bf16 %v5260_v49, %v5259_v48  ;;  %v5243_v51 = vld [vmem:[%s12392_s1 + $0x1c0] sm:$0xff]  ;;  %v5244_v52 = vld [vmem:[%s12392_s1 + $0x1c8] sm:$0xff]  ;;  %v5273_v53 = vld [vmem:[%s12392_s1 + $0x2b0] sm:$0xff] }
  0x20   : > { %8184 = vmatprep.subr.bf16.mxu1 %v9360_v7  ;;  %v8208_v54 = vpack.c.bf16 %v5244_v52, %v5243_v51  ;;  %v5274_v55 = vld [vmem:[%s12392_s1 + $0x2b8] sm:$0xff]  ;;  %v5261_v57 = vld [vmem:[%s12392_s1 + $0x250] sm:$0xff]  ;;  %v5275_v62 = vld [vmem:[%s12392_s1 + $0x2c0] sm:$0xff] }
  0x21   : > { %8161 = vmatpush3.bf16.msra.mxu0 %v8160_v2  ;;  %v8232_v56 = vpack.c.bf16 %v5274_v55, %v5273_v53  ;;  %v5262_v58 = vld [vmem:[%s12392_s1 + $0x258] sm:$0xff]  ;;  %v5245_v60 = vld [vmem:[%s12392_s1 + $0x1d0] sm:$0xff]  ;;  %v5276_v0 = vld [vmem:[%s12392_s1 + $0x2c8] sm:$0xff] }
  0x22   : > { %8163 = vmatprep.subr.bf16.mxu0 %v8162_v3  ;;  %v8210_v59 = vpack.c.bf16 %v5262_v58, %v5261_v57  ;;  %v5246_v61 = vld [vmem:[%s12392_s1 + $0x1d8] sm:$0xff]  ;;  %v8235_v1 = vpack.c.bf16 %v5276_v0, %v5275_v62  ;;  %v5263_v2 = vld [vmem:[%s12392_s1 + $0x260] sm:$0xff]  ;;  %v5264_v3 = vld [vmem:[%s12392_s1 + $0x268] sm:$0xff] }
  0x23   : > { %8186 = vmatpush3.bf16.msra.mxu1 %v8185_v6  ;;  %v8212_v63 = vpack.c.bf16 %v5246_v61, %v5245_v60  ;;  %v8214_v4 = vpack.c.bf16 %v5264_v3, %v5263_v2  ;;  %v5247_v5 = vld [vmem:[%s12392_s1 + $0x1e0] sm:$0xff]  ;;  %v5248_v6 = vld [vmem:[%s12392_s1 + $0x1e8] sm:$0xff]  ;;  %v5277_v9 = vld [vmem:[%s12392_s1 + $0x2d0] sm:$0xff] }
  0x24   : > { %8187 = vmatprep.subr.bf16.mxu1 %v9360_v7  ;;  %v8216_v10 = vpack.c.bf16 %v5248_v6, %v5247_v5  ;;  %v5278_v11 = vld [vmem:[%s12392_s1 + $0x2d8] sm:$0xff]  ;;  %v5249_v16 = vld [vmem:[%s12392_s1 + $0x1f0] sm:$0xff]  ;;  %v5279_v18 = vld [vmem:[%s12392_s1 + $0x2e0] sm:$0xff] }
  0x25   : > { %8165 = vmatpush3.bf16.msra.mxu0 %v8164_v13  ;;  %v8238_v12 = vpack.c.bf16 %v5278_v11, %v5277_v9  ;;  %v5265_v13 = vld [vmem:[%s12392_s1 + $0x270] sm:$0xff]  ;;  %v5280_v20 = vld [vmem:[%s12392_s1 + $0x2e8] sm:$0xff]  ;;  %v438_v25 = vld [vmem:[#allocation2 + $0x19] sm:$0xff] }
  0x26   : > { %8191 = vmatprep.subr.bf16.mxu0 %v8190_v14  ;;  %v5266_v14 = vld [vmem:[%s12392_s1 + $0x278] sm:$0xff]  ;;  %v8241_v21 = vpack.c.bf16 %v5280_v20, %v5279_v18  ;;  %v441_v26 = vmax.f32 %v438_v25, 0.0  ;;  %v5234_v29 = vld [vmem:[%s12393_s2] ss:$0 sm:$0xff]  ;;  %v437_v35 = vld [vmem:[#allocation2 + $0x7] sm:$0xff] }
  0x27   : > { %8189 = vmatpush3.bf16.msra.mxu1 %v8188_v17  ;;  %v8218_v15 = vpack.c.bf16 %v5266_v14, %v5265_v13  ;;  %v5250_v17 = vld [vmem:[%s12392_s1 + $0x1f8] sm:$0xff]  ;;  %v640_v36 = vld [vmem:[%s12394_s3] sm:$0xff]  ;;  %v439_v39 = vmax.f32 %v437_v35, 0.0  ;;  %v642_v42 = vld [vmem:[%s12394_s3 + $0x10] sm:$0xff] }
  0x28   : > { %359 = vmatmul.mubr.f32.vlgmr.msra.gmra.mrb[0].mxu0 %v236_v22  ;;  %8222 = vmatprep.subr.bf16.mxu1 %v9360_v7  ;;  %v8220_v19 = vpack.c.bf16 %v5250_v17, %v5249_v16  ;;  %v5281_v22 = vld [vmem:[%s12392_s1 + $0x2f0] sm:$0xff]  ;;  %v643_v43 = vld [vmem:[%s12394_s3 + $0x18] sm:$0xff]  ;;  %v645_v46 = vld [vmem:[%s12394_s3 + $0x28] sm:$0xff] }
  0x29   : > { %8193 = vmatpush3.bf16.msra.mxu0 %v8192_v23  ;;  %v5282_v23 = vld [vmem:[%s12392_s1 + $0x2f8] sm:$0xff]  ;;  %v8250_v44 = vpack.c.bf16 %v643_v43, %v642_v42  ;;  %v646_v48 = vld [vmem:[%s12394_s3 + $0x30] sm:$0xff]  ;;  %v648_v51 = vld [vmem:[%s12394_s3 + $0x40] sm:$0xff] }
  0x2a   : > { %7244 = vmatmul.mubr.f32.vlgmr.msra.gmra.mrb[0].mxu1 %v238_v27  ;;  %8195 = vmatprep.subr.bf16.mxu0 %v8194_v24  ;;  %v8244_v24 = vpack.c.bf16 %v5282_v23, %v5281_v22  ;;  %v647_v49 = vld [vmem:[%s12394_s3 + $0x38] sm:$0xff]  ;;  %v649_v52 = vld [vmem:[%s12394_s3 + $0x48] sm:$0xff]  ;;  %v652_v57 = vld [vmem:[%s12394_s3 + $0x60] sm:$0xff] }
  0x2b   : > { %8224 = vmatpush3.bf16.msra.mxu1 %v8223_v28  ;;  %7278 = vmatprep.mubr.msk.f32.mxu1 %vm9362_vm0, %v9361_v8  ;;  %v8259_v53 = vpack.c.bf16 %v649_v52, %v648_v51  ;;  %v651_v55 = vld [vmem:[%s12394_s3 + $0x58] sm:$0xff]  ;;  %v653_v58 = vld [vmem:[%s12394_s3 + $0x68] sm:$0xff]  ;;  %v654_v60 = vld [vmem:[%s12394_s3 + $0x70] sm:$0xff] }
  0x2c   : > { %8225 = vmatprep.subr.bf16.mxu1 %v9360_v7  ;;  %v655_v61 = vld [vmem:[%s12394_s3 + $0x78] sm:$0xff]  ;;  %v5303_v2 = vld [vmem:[%s12392_s1 + $0x388] sm:$0xff]  ;;  %v5304_v9 = vld [vmem:[%s12392_s1 + $0x390] sm:$0xff] }
  0x2d   : > { %8197 = vmatpush3.bf16.msra.mxu0 %v8196_v33  ;;  %v5287_v5 = vld [vmem:[%s12392_s1 + $0x308] sm:$0xff]  ;;  %v5289_v13 = vld [vmem:[%s12392_s1 + $0x318] sm:$0xff]  ;;  %v5290_v18 = vld [vmem:[%s12392_s1 + $0x320] sm:$0xff] }
  0x2e   : > { %8199 = vmatprep.subr.bf16.mxu0 %v8198_v34  ;;  %v5307_v16 = vld [vmem:[%s12392_s1 + $0x3a8] sm:$0xff]  ;;  %v5309_v22 = vld [vmem:[%s12392_s1 + $0x3b8] sm:$0xff]  ;;  %v5322_v42 = vld [vmem:[%s12392_s1 + $0x420] sm:$0xff] }
  0x2f   : > { %8227 = vmatpush3.bf16.msra.mxu1 %v8226_v37  ;;  %v641_v37 = vld [vmem:[%s12394_s3 + $0x8] sm:$0xff]  ;;  %v5293_v25 = vld [vmem:[%s12392_s1 + $0x338] sm:$0xff]  ;;  %v5326_v51 = vld [vmem:[%s12392_s1 + $0x440] sm:$0xff] }
  0x30   : > { %8228 = vmatprep.subr.bf16.mxu1 %v9360_v7  ;;  %v5323_v43 = vld [vmem:[%s12392_s1 + $0x428] sm:$0xff] }
  0x31   : > { %8201 = vmatpush3.bf16.msra.mxu0 %v8200_v38  ;;  %v5327_v52 = vld [vmem:[%s12392_s1 + $0x448] sm:$0xff] }
  0x32   : > { %8203 = vmatprep.subr.bf16.mxu0 %v8202_v41  ;;  %v8247_v41 = vpack.c.bf16 %v641_v37, %v640_v36 }
  0x33   : > { %8230 = vmatpush3.bf16.msra.mxu1 %v8229_v47 }
  0x34   : > { %8231 = vmatprep.subr.bf16.mxu1 %v9360_v7 }
  0x35   : > { %8205 = vmatpush3.bf16.msra.mxu0 %v8204_v45  ;;  %v644_v45 = vld [vmem:[%s12394_s3 + $0x20] sm:$0xff] }
  0x36   : > { %8207 = vmatprep.subr.bf16.mxu0 %v8206_v50  ;;  %v8253_v47 = vpack.c.bf16 %v645_v46, %v644_v45  ;;  %v8256_v50 = vpack.c.bf16 %v647_v49, %v646_v48  ;;  %v5324_v45 = vld [vmem:[%s12392_s1 + $0x430] sm:$0xff]  ;;  %v5325_v46 = vld [vmem:[%s12392_s1 + $0x438] sm:$0xff]  ;;  %v5310_v48 = vld [vmem:[%s12392_s1 + $0x3c0] sm:$0xff] }
  0x37   : > { %8233 = vmatpush3.bf16.msra.mxu1 %v8232_v56  ;;  %v5311_v49 = vld [vmem:[%s12392_s1 + $0x3c8] sm:$0xff] }
  0x38   : > { %8234 = vmatprep.subr.bf16.mxu1 %v9360_v7 }
  0x39   : > { %8209 = vmatpush3.bf16.msra.mxu0 %v8208_v54  ;;  %v650_v54 = vld [vmem:[%s12394_s3 + $0x50] sm:$0xff] }
  0x3a   : > { %8211 = vmatprep.subr.bf16.mxu0 %v8210_v59  ;;  %v8262_v56 = vpack.c.bf16 %v651_v55, %v650_v54  ;;  %v8265_v59 = vpack.c.bf16 %v653_v58, %v652_v57  ;;  %v8315_v54 = vpack.c.bf16 %v5327_v52, %v5326_v51  ;;  %v5295_v55 = vld [vmem:[%s12392_s1 + $0x348] sm:$0xff]  ;;  %v5312_v57 = vld [vmem:[%s12392_s1 + $0x3d0] sm:$0xff]  ;;  %v5313_v58 = vld [vmem:[%s12392_s1 + $0x3d8] sm:$0xff] }
  0x3b   : > { %8236 = vmatpush3.bf16.msra.mxu1 %v8235_v1  ;;  %v5302_v1 = vld [vmem:[%s12392_s1 + $0x380] sm:$0xff]  ;;  %v5349_v51 = vld [vmem:[%s12394_s3 + $0xe8] sm:$0xff] }
  0x3c   : > { %8237 = vmatprep.subr.bf16.mxu1 %v9360_v7  ;;  %v8270_v3 = vpack.c.bf16 %v5303_v2, %v5302_v1  ;;  %v5314_v2 = vld [vmem:[%s12392_s1 + $0x3e0] sm:$0xff] }
  0x3d   : > { %8213 = vmatpush3.bf16.msra.mxu0 %v8212_v63  ;;  %v8268_v63 = vpack.c.bf16 %v655_v61, %v654_v60  ;;  %v5328_v60 = vld [vmem:[%s12392_s1 + $0x450] sm:$0xff]  ;;  %v5329_v61 = vld [vmem:[%s12392_s1 + $0x458] sm:$0xff] }
  0x3e   : > { %8215 = vmatprep.subr.bf16.mxu0 %v8214_v4  ;;  %v5286_v4 = vld [vmem:[%s12392_s1 + $0x300] sm:$0xff] }
  0x3f   : > { %8239 = vmatpush3.bf16.msra.mxu1 %v8238_v12  ;;  %v8272_v6 = vpack.c.bf16 %v5287_v5, %v5286_v4  ;;  %v5288_v12 = vld [vmem:[%s12392_s1 + $0x310] sm:$0xff]  ;;  %v5330_v5 = vld [vmem:[%s12392_s1 + $0x460] sm:$0xff] }
  0x40   : > { %8240 = vmatprep.subr.bf16.mxu1 %v9360_v7  ;;  %v8276_v14 = vpack.c.bf16 %v5289_v13, %v5288_v12  ;;  %v5316_v13 = vld [vmem:[%s12392_s1 + $0x3f0] sm:$0xff] }
  0x41   : > { %8217 = vmatpush3.bf16.msra.mxu0 %v8216_v10  ;;  %v5305_v10 = vld [vmem:[%s12392_s1 + $0x398] sm:$0xff] }
  0x42   : > { %8219 = vmatprep.subr.bf16.mxu0 %v8218_v15  ;;  %v8274_v11 = vpack.c.bf16 %v5305_v10, %v5304_v9  ;;  %v5306_v15 = vld [vmem:[%s12392_s1 + $0x3a0] sm:$0xff] }
  0x43   : > { %8242 = vmatpush3.bf16.msra.mxu1 %v8241_v21  ;;  %v8278_v17 = vpack.c.bf16 %v5307_v16, %v5306_v15  ;;  %v5308_v21 = vld [vmem:[%s12392_s1 + $0x3b0] sm:$0xff]  ;;  %v5298_v9 = vld [vmem:[%s12392_s1 + $0x360] sm:$0xff] }
  0x44   : > { %8243 = vmatprep.subr.bf16.mxu1 %v9360_v7  ;;  %v8282_v23 = vpack.c.bf16 %v5309_v22, %v5308_v21  ;;  %v5332_v16 = vld [vmem:[%s12392_s1 + $0x470] sm:$0xff]  ;;  %v5285_v22 = vld [vmem:[%s12395_s4] ss:$0 sm:$0xff] }
  0x45   : > { %8221 = vmatpush3.bf16.msra.mxu0 %v8220_v19  ;;  %v5291_v19 = vld [vmem:[%s12392_s1 + $0x328] sm:$0xff] }
  0x46   : > { %8246 = vmatprep.subr.bf16.mxu0 %v9360_v7  ;;  %v8280_v20 = vpack.c.bf16 %v5291_v19, %v5290_v18  ;;  %v5300_v18 = vld [vmem:[%s12392_s1 + $0x370] sm:$0xff] }
  0x47   : > { %8245 = vmatpush3.bf16.msra.mxu1 %v8244_v24  ;;  %v5292_v24 = vld [vmem:[%s12392_s1 + $0x330] sm:$0xff] }
  0x48   : > { %8271 = vmatprep.subr.bf16.mxu1 %v8270_v3  ;;  %v5315_v3 = vld [vmem:[%s12392_s1 + $0x3e8] sm:$0xff] }
  0x49   : > { %v8294_v4 = vpack.c.bf16 %v5315_v3, %v5314_v2  ;;  %v5357_v2 = vld [vmem:[%s12392_s1 + $0x498] sm:$0xff] }
  0x4a   : > { %7279 = vmatmul.mubr.f32.vlgmr.msra.gmra.mrb[2].mxu1 %v441_v26  ;;  %v8284_v26 = vpack.c.bf16 %v5293_v25, %v5292_v24 }
  0x4b   : > { %8273 = vmatpush3.bf16.msra.mxu1 %v8272_v6  ;;  %v5331_v6 = vld [vmem:[%s12392_s1 + $0x468] sm:$0xff] }
  0x4c   : > { %8275 = vmatprep.subr.bf16.mxu1 %v8274_v11  ;;  %v8321_v10 = vpack.c.bf16 %v5331_v6, %v5330_v5  ;;  %v5299_v11 = vld [vmem:[%s12392_s1 + $0x368] sm:$0xff] }
  0x4d   : > { %v8296_v12 = vpack.c.bf16 %v5299_v11, %v5298_v9  ;;  %v5375_v5 = vld [vmem:[%s12392_s1 + $0x528] sm:$0xff]  ;;  %v5358_v9 = vld [vmem:[%s12392_s1 + $0x4a0] sm:$0xff] }
  0x4f   : > { %8277 = vmatpush3.bf16.msra.mxu1 %v8276_v14  ;;  %v5317_v14 = vld [vmem:[%s12392_s1 + $0x3f8] sm:$0xff] }
  0x50   : > { %8279 = vmatprep.subr.bf16.mxu1 %v8278_v17  ;;  %v8298_v15 = vpack.c.bf16 %v5317_v14, %v5316_v13  ;;  %v5333_v17 = vld [vmem:[%s12392_s1 + $0x478] sm:$0xff] }
  0x51   : > { %v8324_v19 = vpack.c.bf16 %v5333_v17, %v5332_v16  ;;  %v5377_v13 = vld [vmem:[%s12392_s1 + $0x538] sm:$0xff] }
  0x52   : > { %v5361_v16 = vld [vmem:[%s12392_s1 + $0x4b8] sm:$0xff] }
  0x53   : > { %8281 = vmatpush3.bf16.msra.mxu1 %v8280_v20  ;;  %v5301_v20 = vld [vmem:[%s12392_s1 + $0x378] sm:$0xff] }
  0x54   : > { %8283 = vmatprep.subr.bf16.mxu1 %v8282_v23  ;;  %v8300_v21 = vpack.c.bf16 %v5301_v20, %v5300_v18 }
  0x57   : > { %8285 = vmatpush3.bf16.msra.mxu1 %v8284_v26 }
  0xfb   : > { %v6129_v27 = vpop.f32.mrb[0].mxu0 }
  0xfc   : > { %v6130_v28 = vpop.f32.mrb[1].mxu0 }
  0xfd   : > { %v6131_v30 = vadd.f32 %v6130_v28, %v6129_v27  ;;  %v430_v31 = vpop.f32.mrb[0].mxu1 }
  0xfe   : > { %v7245_v32 = vpop.f32.mrb[1].mxu1 }
  0xff   : > { %v361_v33 = vadd.f32 %v6131_v30, %v5234_v29  ;;  %v5284_v29 = vld [vmem:[%s12393_s2 + $0x1] ss:$0 sm:$0xff] }
 0x100   : > { %v5318_v32 = vld [vmem:[%s12392_s1 + $0x400] sm:$0xff] }
 0x101   : > { %v9737_v34 = vadd.f32 %v430_v31, %v361_v33  ;;  %v5319_v33 = vld [vmem:[%s12392_s1 + $0x408] sm:$0xff] }
 0x102   : > { %v8303_v36 = vpack.c.bf16 %v5319_v33, %v5318_v32 }
 0x103   : > { %v434_v38 = vmax.f32 %v9737_v34, 0.0 }
 0x105   : > { %v440_v40 = vmax.f32 %v434_v38, 0.0 }
 0x107   : > { %563 = vmatprep.mubr.f32.mxu0 %v440_v40  ;;  %v5321_v40 = vld [vmem:[%s12392_s1 + $0x418] sm:$0xff] }
 0x108   : > { %564 = vmatmul.mubr.f32.vlgmr.msra.gmra.mrb[2].mxu0 %v439_v39  ;;  %v5320_v39 = vld [vmem:[%s12392_s1 + $0x410] sm:$0xff] }
 0x109   : > { %8248 = vmatpush3.bf16.msra.mxu0 %v8247_v41  ;;  %7313 = vmatprep.mubr.msk.f32.mxu0 %vm9362_vm0, %v9361_v8  ;;  %v8306_v41 = vpack.c.bf16 %v5321_v40, %v5320_v39  ;;  %v5341_v39 = vld [vmem:[%s12394_s3 + $0xa8] sm:$0xff] }
 0x10a   : > { %8249 = vmatprep.subr.bf16.mxu0 %v9360_v7 }
 0x10d   : > { %8251 = vmatpush3.bf16.msra.mxu0 %v8250_v44  ;;  %v8309_v44 = vpack.c.bf16 %v5323_v43, %v5322_v42  ;;  %v5343_v42 = vld [vmem:[%s12394_s3 + $0xb8] sm:$0xff] }
 0x10e   : > { %8252 = vmatprep.subr.bf16.mxu0 %v9360_v7 }
 0x111   : > { %8254 = vmatpush3.bf16.msra.mxu0 %v8253_v47  ;;  %v8312_v47 = vpack.c.bf16 %v5325_v46, %v5324_v45  ;;  %v5345_v45 = vld [vmem:[%s12394_s3 + $0xc8] sm:$0xff] }
 0x112   : > { %8255 = vmatprep.subr.bf16.mxu0 %v9360_v7 }
 0x115   : > { %8257 = vmatpush3.bf16.msra.mxu0 %v8256_v50  ;;  %v8286_v50 = vpack.c.bf16 %v5311_v49, %v5310_v48  ;;  %v5347_v48 = vld [vmem:[%s12394_s3 + $0xd8] sm:$0xff] }
 0x116   : > { %8258 = vmatprep.subr.bf16.mxu0 %v9360_v7 }
 0x117   : > { %8287 = vmatprep.subr.bf16.mxu1 %v8286_v50  ;;  %v5348_v50 = vld [vmem:[%s12394_s3 + $0xe0] sm:$0xff] }
 0x118   : > { %v8345_v52 = vpack.c.bf16 %v5349_v51, %v5348_v50  ;;  %v5396_v51 = vld [vmem:[%s12392_s1 + $0x5d0] sm:$0xff] }
 0x119   : > { %8260 = vmatpush3.bf16.msra.mxu0 %v8259_v53  ;;  %v5294_v53 = vld [vmem:[%s12392_s1 + $0x340] sm:$0xff] }
 0x11a   : > { %8261 = vmatprep.subr.bf16.mxu0 %v9360_v7 }
 0x11d   : > { %8263 = vmatpush3.bf16.msra.mxu0 %v8262_v56  ;;  %v635_v62 = vpop.f32.mrb[2].mxu1  ;;  %v8288_v56 = vpack.c.bf16 %v5295_v55, %v5294_v53  ;;  %v5350_v53 = vld [vmem:[%s12394_s3 + $0xf0] sm:$0xff] }
 0x11e   : > { %8264 = vmatprep.subr.bf16.mxu0 %v9360_v7  ;;  %v7280_v0 = vpop.f32.mrb[3].mxu1 }
 0x11f   : > { %8289 = vmatpush3.bf16.msra.mxu1 %v8288_v56  ;;  %v5297_v0 = vld [vmem:[%s12392_s1 + $0x358] sm:$0xff]  ;;  %v5370_v56 = vld [vmem:[%s12392_s1 + $0x500] sm:$0xff] }
 0x121   : > { %8266 = vmatpush3.bf16.msra.mxu0 %v8265_v59  ;;  %v8290_v59 = vpack.c.bf16 %v5313_v58, %v5312_v57  ;;  %v5371_v57 = vld [vmem:[%s12392_s1 + $0x508] sm:$0xff] }
 0x122   : > { %8267 = vmatprep.subr.bf16.mxu0 %v9360_v7  ;;  %v8350_v58 = vpack.c.bf16 %v5371_v57, %v5370_v56  ;;  %v5382_v57 = vld [vmem:[%s12392_s1 + $0x560] sm:$0xff] }
 0x123   : > { %8291 = vmatprep.subr.bf16.mxu1 %v8290_v59  ;;  %v5354_v59 = vld [vmem:[%s12392_s1 + $0x480] sm:$0xff] }
 0x125   : > { %8269 = vmatpush3.bf16.msra.mxu0 %v8268_v63  ;;  %v8318_v63 = vpack.c.bf16 %v5329_v61, %v5328_v60  ;;  %v5355_v60 = vld [vmem:[%s12392_s1 + $0x488] sm:$0xff] }
 0x126   : > { %8302 = vmatprep.subr.bf16.mxu0 %v9360_v7  ;;  %v8352_v61 = vpack.c.bf16 %v5355_v60, %v5354_v59  ;;  %v5398_v60 = vld [vmem:[%s12392_s1 + $0x5e0] sm:$0xff] }
 0x1db   : > { %v6181_v27 = vpop.f32.mrb[2].mxu0 }
 0x1dc   : > { %v6182_v28 = vpop.f32.mrb[3].mxu0 }
 0x1dd   : > { %v6183_v30 = vadd.f32 %v6182_v28, %v6181_v27  ;;  %v5336_v28 = vld [vmem:[%s12394_s3 + $0x80] sm:$0xff] }
 0x1df   : > { %v566_v31 = vadd.f32 %v6183_v30, %v5284_v29  ;;  %v5337_v29 = vld [vmem:[%s12394_s3 + $0x88] sm:$0xff] }
 0x1e0   : > { %v8327_v32 = vpack.c.bf16 %v5337_v29, %v5336_v28 }
 0x1e1   : > { %v636_v35 = vadd.f32 %v635_v62, %v566_v31  ;;  %v5296_v62 = vld [vmem:[%s12392_s1 + $0x350] sm:$0xff] }
 0x1e2   : > { %v8292_v1 = vpack.c.bf16 %v5297_v0, %v5296_v62  ;;  %v5372_v62 = vld [vmem:[%s12392_s1 + $0x510] sm:$0xff] }
 0x1e3   : > { %v639_v37 = vmax.f32 %v636_v35, 0.0  ;;  %v5339_v35 = vld [vmem:[%s12394_s3 + $0x98] sm:$0xff] }
 0x1e4   : > { %8293 = vmatpush3.bf16.msra.mxu1 %v8292_v1  ;;  %v5356_v1 = vld [vmem:[%s12392_s1 + $0x490] sm:$0xff] }
 0x1e5   : > { %7314 = vmatmul.mubr.f32.vlgmr.msra.gmra.mrb[4].mxu0 %v639_v37  ;;  %8295 = vmatprep.subr.bf16.mxu1 %v8294_v4  ;;  %v5340_v37 = vld [vmem:[%s12394_s3 + $0xa0] sm:$0xff]  ;;  %v8356_v3 = vpack.c.bf16 %v5357_v2, %v5356_v1  ;;  %v5384_v2 = vld [vmem:[%s12392_s1 + $0x570] sm:$0xff] }
 0x1e6   : > { %8304 = vmatpush3.bf16.msra.mxu0 %v8303_v36  ;;  %7348 = vmatprep.mubr.msk.f32.mxu0 %vm9362_vm0, %v9361_v8  ;;  %v8333_v40 = vpack.c.bf16 %v5341_v39, %v5340_v37  ;;  %v5374_v4 = vld [vmem:[%s12392_s1 + $0x520] sm:$0xff] }
 0x1e7   : > { %8305 = vmatprep.subr.bf16.mxu0 %v9360_v7  ;;  %v8358_v6 = vpack.c.bf16 %v5375_v5, %v5374_v4  ;;  %v5378_v39 = vld [vmem:[%s12392_s1 + $0x540] sm:$0xff]  ;;  %v5400_v5 = vld [vmem:[%s12392_s1 + $0x5f0] sm:$0xff] }
 0x1e8   : > { %8297 = vmatpush3.bf16.msra.mxu1 %v8296_v12  ;;  %v5376_v12 = vld [vmem:[%s12392_s1 + $0x530] sm:$0xff] }
 0x1e9   : > { %8299 = vmatprep.subr.bf16.mxu1 %v8298_v15  ;;  %v8362_v14 = vpack.c.bf16 %v5377_v13, %v5376_v12  ;;  %v5360_v15 = vld [vmem:[%s12392_s1 + $0x4b0] sm:$0xff]  ;;  %v5353_v13 = vld [vmem:[%s12395_s4 + $0x1] ss:$0 sm:$0xff] }
 0x1ea   : > { %8307 = vmatpush3.bf16.msra.mxu0 %v8306_v41  ;;  %v5342_v41 = vld [vmem:[%s12394_s3 + $0xb0] sm:$0xff]  ;;  %v8364_v17 = vpack.c.bf16 %v5361_v16, %v5360_v15 }
 0x1eb   : > { %8308 = vmatprep.subr.bf16.mxu0 %v9360_v7  ;;  %v8336_v43 = vpack.c.bf16 %v5343_v42, %v5342_v41  ;;  %v5394_v42 = vld [vmem:[%s12392_s1 + $0x5c0] sm:$0xff] }
 0x1ec   : > { %8301 = vmatpush3.bf16.msra.mxu1 %v8300_v21  ;;  %v5335_v21 = vld [vmem:[%s12393_s2 + $0x2] ss:$0 sm:$0xff] }
 0x1ed   : > { %8326 = vmatprep.subr.bf16.mxu1 %v9360_v7 }
 0x1ee   : > { %8310 = vmatpush3.bf16.msra.mxu0 %v8309_v44  ;;  %v5344_v44 = vld [vmem:[%s12394_s3 + $0xc0] sm:$0xff] }
 0x1ef   : > { %8311 = vmatprep.subr.bf16.mxu0 %v9360_v7  ;;  %v8339_v46 = vpack.c.bf16 %v5345_v45, %v5344_v44  ;;  %v5362_v44 = vld [vmem:[%s12392_s1 + $0x4c0] sm:$0xff] }
 0x1f2   : > { %8313 = vmatpush3.bf16.msra.mxu0 %v8312_v47  ;;  %v5346_v47 = vld [vmem:[%s12394_s3 + $0xd0] sm:$0xff] }
 0x1f3   : > { %8314 = vmatprep.subr.bf16.mxu0 %v9360_v7  ;;  %v8342_v49 = vpack.c.bf16 %v5347_v48, %v5346_v47  ;;  %v5380_v48 = vld [vmem:[%s12392_s1 + $0x550] sm:$0xff] }
 0x1f6   : > { %8316 = vmatpush3.bf16.msra.mxu0 %v8315_v54  ;;  %v5351_v54 = vld [vmem:[%s12394_s3 + $0xf8] sm:$0xff] }
 0x1f7   : > { %8317 = vmatprep.subr.bf16.mxu0 %v9360_v7  ;;  %v8348_v55 = vpack.c.bf16 %v5351_v54, %v5350_v53  ;;  %v5364_v53 = vld [vmem:[%s12392_s1 + $0x4d0] sm:$0xff] }
 0x1fa   : > { %8319 = vmatpush3.bf16.msra.mxu0 %v8318_v63  ;;  %v5373_v63 = vld [vmem:[%s12392_s1 + $0x518] sm:$0xff] }
 0x1fb   : > { %8320 = vmatprep.subr.bf16.mxu0 %v9360_v7  ;;  %v8354_v0 = vpack.c.bf16 %v5373_v63, %v5372_v62  ;;  %v5366_v62 = vld [vmem:[%s12392_s1 + $0x4e0] sm:$0xff] }
 0x1fe   : > { %8322 = vmatpush3.bf16.msra.mxu0 %v8321_v10  ;;  %v5359_v10 = vld [vmem:[%s12392_s1 + $0x4a8] sm:$0xff] }
 0x1ff   : > { %8323 = vmatprep.subr.bf16.mxu0 %v9360_v7  ;;  %v8360_v11 = vpack.c.bf16 %v5359_v10, %v5358_v9  ;;  %v5368_v9 = vld [vmem:[%s12392_s1 + $0x4f0] sm:$0xff] }
 0x202   : > { %8325 = vmatpush3.bf16.msra.mxu0 %v8324_v19 }
 0x203   : > { %8351 = vmatprep.subr.bf16.mxu0 %v8350_v58  ;;  %v5383_v58 = vld [vmem:[%s12392_s1 + $0x568] sm:$0xff] }
 0x204   : > { %v8374_v59 = vpack.c.bf16 %v5383_v58, %v5382_v57 }
 0x2b8   : > { %v729_v23 = vpop.f32.mrb[4].mxu0 }
 0x2b9   : > { %v730_v24 = vadd.f32 %v5285_v22, %v729_v23  ;;  %v7315_v25 = vpop.f32.mrb[5].mxu0 }
 0x2ba   : > { %v5386_v25 = vld [vmem:[%s12392_s1 + $0x580] sm:$0xff] }
 0x2bb   : > { %v9962_v26 = vadd.f32 %v730_v24, %v434_v38  ;;  %v5338_v38 = vld [vmem:[%s12394_s3 + $0x90] sm:$0xff] }
 0x2bc   : > { %v8330_v36 = vpack.c.bf16 %v5339_v35, %v5338_v38  ;;  %v5391_v38 = vld [vmem:[%s12392_s1 + $0x5a8] sm:$0xff] }
 0x2bd   : > { %734 = vst [vmem:[#allocation2 + $0x10] sm:$0xff] %v9962_v26  ;;  %v739_v27 = vmax.f32 %v9962_v26, 0.0 }
 0x2bf   : > { %862 = vmatprep.mubr.f32.mxu1 %v739_v27  ;;  %v5387_v27 = vld [vmem:[%s12392_s1 + $0x588] sm:$0xff] }
 0x2c0   : > { %v8383_v29 = vpack.c.bf16 %v5387_v27, %v5386_v25  ;;  %v5407_v27 = vld [vmem:[%s12394_s3 + $0x118] sm:$0xff] }
 0x2c4   : > { %v736_v30 = vld [vmem:[#allocation2 + $0xd] sm:$0xff] }
 0x2c5   : > { %v737_v31 = vld [vmem:[#allocation2 + $0x13] sm:$0xff]  ;;  %v738_v34 = vmax.f32 %v736_v30, 0.0 }
 0x2c6   : > { %v740_v33 = vmax.f32 %v737_v31, 0.0  ;;  %v5388_v31 = vld [vmem:[%s12392_s1 + $0x590] sm:$0xff] }
 0x2c7   : > { %863 = vmatmul.mubr.f32.vlgmr.msra.gmra.mrb[4].mxu1 %v738_v34  ;;  %v5390_v34 = vld [vmem:[%s12392_s1 + $0x5a0] sm:$0xff] }
 0x2c8   : > { %7349 = vmatmul.mubr.f32.vlgmr.msra.gmra.mrb[6].mxu0 %v740_v33  ;;  %8328 = vmatpush3.bf16.msra.mxu1 %v8327_v32  ;;  %v5389_v32 = vld [vmem:[%s12392_s1 + $0x598] sm:$0xff]  ;;  %v8389_v35 = vpack.c.bf16 %v5391_v38, %v5390_v34 }
 0x2c9   : > { %7383 = vmatprep.mubr.msk.f32.mxu1 %vm9362_vm0, %v9361_v8  ;;  %8329 = vmatprep.subr.bf16.mxu1 %v9360_v7  ;;  %v8386_v33 = vpack.c.bf16 %v5389_v32, %v5388_v31  ;;  %v5409_v31 = vld [vmem:[%s12394_s3 + $0x128] sm:$0xff]  ;;  %v5411_v34 = vld [vmem:[%s12394_s3 + $0x138] sm:$0xff] }
 0x2ca   : > { %8353 = vmatpush3.bf16.msra.mxu0 %v8352_v61  ;;  %v5399_v61 = vld [vmem:[%s12392_s1 + $0x5e8] sm:$0xff] }
 0x2cb   : > { %8355 = vmatprep.subr.bf16.mxu0 %v8354_v0  ;;  %v8401_v63 = vpack.c.bf16 %v5399_v61, %v5398_v60  ;;  %v5367_v0 = vld [vmem:[%s12392_s1 + $0x4e8] sm:$0xff]  ;;  %v5456_v61 = vld [vmem:[%s12392_s1 + $0x700] sm:$0xff] }
 0x2cc   : > { %8331 = vmatpush3.bf16.msra.mxu1 %v8330_v36  ;;  %v5392_v36 = vld [vmem:[%s12392_s1 + $0x5b0] sm:$0xff]  ;;  %v8376_v1 = vpack.c.bf16 %v5367_v0, %v5366_v62  ;;  %v5457_v62 = vld [vmem:[%s12392_s1 + $0x708] sm:$0xff] }
 0x2cd   : > { %8332 = vmatprep.subr.bf16.mxu1 %v9360_v7  ;;  %v5458_v0 = vld [vmem:[%s12392_s1 + $0x710] sm:$0xff] }
 0x2ce   : > { %8357 = vmatpush3.bf16.msra.mxu0 %v8356_v3  ;;  %v5385_v3 = vld [vmem:[%s12392_s1 + $0x578] sm:$0xff] }
 0x2cf   : > { %8359 = vmatprep.subr.bf16.mxu0 %v8358_v6  ;;  %v8378_v4 = vpack.c.bf16 %v5385_v3, %v5384_v2  ;;  %v5401_v6 = vld [vmem:[%s12392_s1 + $0x5f8] sm:$0xff]  ;;  %v5460_v3 = vld [vmem:[%s12392_s1 + $0x720] sm:$0xff] }
 0x2d0   : > { %8334 = vmatpush3.bf16.msra.mxu1 %v8333_v40  ;;  %v5379_v40 = vld [vmem:[%s12392_s1 + $0x548] sm:$0xff]  ;;  %v8404_v10 = vpack.c.bf16 %v5401_v6, %v5400_v5  ;;  %v5462_v6 = vld [vmem:[%s12392_s1 + $0x730] sm:$0xff] }
 0x2d1   : > { %8335 = vmatprep.subr.bf16.mxu1 %v9360_v7  ;;  %v8366_v41 = vpack.c.bf16 %v5379_v40, %v5378_v39  ;;  %v5415_v39 = vld [vmem:[%s12394_s3 + $0x158] sm:$0xff] }
 0x2d2   : > { %8361 = vmatpush3.bf16.msra.mxu0 %v8360_v11  ;;  %v5369_v11 = vld [vmem:[%s12392_s1 + $0x4f8] sm:$0xff] }
 0x2d3   : > { %8363 = vmatprep.subr.bf16.mxu0 %v8362_v14  ;;  %v8380_v12 = vpack.c.bf16 %v5369_v11, %v5368_v9  ;;  %v5463_v9 = vld [vmem:[%s12392_s1 + $0x738] sm:$0xff]  ;;  %v5464_v11 = vld [vmem:[%s12392_s1 + $0x740] sm:$0xff] }
 0x2d4   : > { %8337 = vmatpush3.bf16.msra.mxu1 %v8336_v43  ;;  %v5395_v43 = vld [vmem:[%s12392_s1 + $0x5c8] sm:$0xff] }
 0x2d5   : > { %8338 = vmatprep.subr.bf16.mxu1 %v9360_v7  ;;  %v8395_v45 = vpack.c.bf16 %v5395_v43, %v5394_v42  ;;  %v5417_v42 = vld [vmem:[%s12394_s3 + $0x168] sm:$0xff] }
 0x2d6   : > { %8365 = vmatpush3.bf16.msra.mxu0 %v8364_v17 }
 0x2d7   : > { %8367 = vmatprep.subr.bf16.mxu0 %v8366_v41  ;;  %v5416_v41 = vld [vmem:[%s12394_s3 + $0x160] sm:$0xff] }
 0x2d8   : > { %8340 = vmatpush3.bf16.msra.mxu1 %v8339_v46  ;;  %v5363_v46 = vld [vmem:[%s12392_s1 + $0x4c8] sm:$0xff]  ;;  %v8425_v43 = vpack.c.bf16 %v5417_v42, %v5416_v41  ;;  %v5446_v41 = vld [vmem:[%s12392_s1 + $0x6b0] sm:$0xff]  ;;  %v5447_v42 = vld [vmem:[%s12392_s1 + $0x6b8] sm:$0xff] }
 0x2d9   : > { %8341 = vmatprep.subr.bf16.mxu1 %v9360_v7  ;;  %v8368_v47 = vpack.c.bf16 %v5363_v46, %v5362_v44  ;;  %v5418_v44 = vld [vmem:[%s12394_s3 + $0x170] sm:$0xff] }
 0x2db   : > { %8369 = vmatpush3.bf16.msra.mxu0 %v8368_v47 }
 0x2dc   : > { %8343 = vmatpush3.bf16.msra.mxu1 %v8342_v49  ;;  %v5381_v49 = vld [vmem:[%s12392_s1 + $0x558] sm:$0xff] }
 0x2dd   : > { %8344 = vmatprep.subr.bf16.mxu1 %v9360_v7  ;;  %v8370_v50 = vpack.c.bf16 %v5381_v49, %v5380_v48 }
 0x2df   : > { %8371 = vmatprep.subr.bf16.mxu0 %v8370_v50  ;;  %v5403_v50 = vld [vmem:[%s12393_s2 + $0x3] ss:$0 sm:$0xff] }
 0x2e0   : > { %8346 = vmatpush3.bf16.msra.mxu1 %v8345_v52  ;;  %v5397_v52 = vld [vmem:[%s12392_s1 + $0x5d8] sm:$0xff] }
 0x2e1   : > { %8347 = vmatprep.subr.bf16.mxu1 %v9360_v7  ;;  %v8398_v54 = vpack.c.bf16 %v5397_v52, %v5396_v51 }
 0x2e4   : > { %8349 = vmatpush3.bf16.msra.mxu1 %v8348_v55  ;;  %v5365_v55 = vld [vmem:[%s12392_s1 + $0x4d8] sm:$0xff] }
 0x2e5   : > { %8382 = vmatprep.subr.bf16.mxu1 %v9360_v7  ;;  %v8372_v56 = vpack.c.bf16 %v5365_v55, %v5364_v53  ;;  %v1338_v55 = vlaneseq }
 0x2e7   : > { %8373 = vmatpush3.bf16.msra.mxu0 %v8372_v56  ;;  %v1342_v56 = vand.u32 127, %v1338_v55  ;;  %v10251_v57 = vshrl.u32 %v1338_v55, 7 }
 0x2e8   : > { %8375 = vmatprep.subr.bf16.mxu0 %v8374_v59 }
 0x2e9   : > { %v10253_v58 = vmul.u32 2, %v1342_v56  ;;  %v5434_v56 = vld [vmem:[%s12392_s1 + $0x650] sm:$0xff] }
 0x2eb   : > { %8377 = vmatpush3.bf16.msra.mxu0 %v8376_v1  ;;  %v1344_v59 = vsub.s32 %v10251_v57, %v10253_v58  ;;  %v5459_v1 = vld [vmem:[%s12392_s1 + $0x718] sm:$0xff] }
 0x2ec   : > { %8379 = vmatprep.subr.bf16.mxu0 %v8378_v4  ;;  %v8466_v2 = vpack.c.bf16 %v5459_v1, %v5458_v0  ;;  %v5461_v4 = vld [vmem:[%s12392_s1 + $0x728] sm:$0xff]  ;;  %v5468_v1 = vld [vmem:[%s12392_s1 + $0x760] sm:$0xff] }
 0x2ed   : > { %vm1346_vm1 = vcmp.ge.s32.totalorder %v1344_v59, 0  ;;  %vm1348_vm2 = vcmp.le.s32.totalorder %v1344_v59, 1  ;;  %v8470_v5 = vpack.c.bf16 %v5461_v4, %v5460_v3  ;;  %v5435_v59 = vld [vmem:[%s12392_s1 + $0x658] sm:$0xff]  ;;  %v5436_v3 = vld [vmem:[%s12392_s1 + $0x660] sm:$0xff] }
 0x2ee   : > { %vm1350_vm3 = vmand %vm1346_vm1, %vm1348_vm2 }
 0x2ef   : > { %8381 = vmatpush3.bf16.msra.mxu0 %v8380_v12  ;;  %v5465_v12 = vld [vmem:[%s12392_s1 + $0x748] sm:$0xff] }
 0x2f0   : > { %8406 = vmatprep.subr.bf16.mxu0 %v9360_v7 }
 0x39a   : > { %v6250_v19 = vpop.f32.mrb[4].mxu1 }
 0x39b   : > { %v934_v18 = vpop.f32.mrb[6].mxu0  ;;  %v6251_v22 = vpop.f32.mrb[5].mxu1 }
 0x39c   : > { %v7350_v20 = vpop.f32.mrb[7].mxu0  ;;  %v6252_v23 = vadd.f32 %v6251_v22, %v6250_v19  ;;  %v5404_v19 = vld [vmem:[%s12394_s3 + $0x100] sm:$0xff] }
 0x39d   : > { %v5405_v20 = vld [vmem:[%s12394_s3 + $0x108] sm:$0xff] }
 0x39e   : > { %v865_v24 = vadd.f32 %v6252_v23, %v5335_v21  ;;  %v8407_v23 = vpack.c.bf16 %v5405_v20, %v5404_v19  ;;  %v5421_v20 = vld [vmem:[%s12395_s4 + $0x2] ss:$0 sm:$0xff] }
 0x3a0   : > { %v935_v28 = vadd.f32 %v934_v18, %v865_v24 }
 0x3a2   : > { %v938_v30 = vmax.f32 %v935_v28, 0.0 }
 0x3a4   : > { %7384 = vmatmul.mubr.f32.vlgmr.msra.gmra.mrb[6].mxu1 %v938_v30  ;;  %v5408_v30 = vld [vmem:[%s12394_s3 + $0x120] sm:$0xff] }
 0x3a5   : > { %8384 = vmatpush3.bf16.msra.mxu1 %v8383_v29  ;;  %7418 = vmatprep.mubr.msk.f32.mxu1 %vm9362_vm0, %v9361_v8  ;;  %v5393_v8 = vld [vmem:[%s12392_s1 + $0x5b8] sm:$0xff]  ;;  %v10201_v29 = vld [vmem:[#allocation2 + $0x8] sm:$0xff]  ;;  %v8413_v32 = vpack.c.bf16 %v5409_v31, %v5408_v30 }
 0x3a6   : > { %8385 = vmatprep.subr.bf16.mxu1 %v9360_v7  ;;  %v8392_v37 = vpack.c.bf16 %v5393_v8, %v5392_v36  ;;  %v5413_v36 = vld [vmem:[%s12394_s3 + $0x148] sm:$0xff]  ;;  %v10258_v60 = vsel %vm1350_vm3, 1.0, %v10201_v29  ;;  %v5443_v30 = vld [vmem:[%s12392_s1 + $0x698] sm:$0xff] }
 0x3a9   : > { %8387 = vmatpush3.bf16.msra.mxu1 %v8386_v33  ;;  %v5410_v33 = vld [vmem:[%s12394_s3 + $0x130] sm:$0xff] }
 0x3aa   : > { %8388 = vmatprep.subr.bf16.mxu1 %v9360_v7  ;;  %v8416_v38 = vpack.c.bf16 %v5411_v34, %v5410_v33 }
 0x3ad   : > { %8390 = vmatpush3.bf16.msra.mxu1 %v8389_v35  ;;  %v5412_v35 = vld [vmem:[%s12394_s3 + $0x140] sm:$0xff] }
 0x3ae   : > { %8391 = vmatprep.subr.bf16.mxu1 %v9360_v7  ;;  %v8419_v8 = vpack.c.bf16 %v5413_v36, %v5412_v35  ;;  %v5426_v35 = vld [vmem:[%s12392_s1 + $0x610] sm:$0xff]  ;;  %v5427_v36 = vld [vmem:[%s12392_s1 + $0x618] sm:$0xff] }
 0x3b1   : > { %8393 = vmatpush3.bf16.msra.mxu1 %v8392_v37  ;;  %v5414_v37 = vld [vmem:[%s12394_s3 + $0x150] sm:$0xff] }
 0x3b2   : > { %8394 = vmatprep.subr.bf16.mxu1 %v9360_v7  ;;  %v8422_v40 = vpack.c.bf16 %v5415_v39, %v5414_v37  ;;  %v5428_v39 = vld [vmem:[%s12392_s1 + $0x620] sm:$0xff] }
 0x3b5   : > { %8396 = vmatpush3.bf16.msra.mxu1 %v8395_v45  ;;  %v5419_v45 = vld [vmem:[%s12394_s3 + $0x178] sm:$0xff] }
 0x3b6   : > { %8397 = vmatprep.subr.bf16.mxu1 %v9360_v7  ;;  %v8428_v46 = vpack.c.bf16 %v5419_v45, %v5418_v44  ;;  %v8442_v44 = vpack.c.bf16 %v5447_v42, %v5446_v41  ;;  %v5430_v45 = vld [vmem:[%s12392_s1 + $0x630] sm:$0xff]  ;;  %v5495_v41 = vld [vmem:[%s12392_s1 + $0x828] sm:$0xff] }
 0x3b9   : > { %8399 = vmatpush3.bf16.msra.mxu1 %v8398_v54 }
 0x3ba   : > { %8400 = vmatprep.subr.bf16.mxu1 %v9360_v7 }
 0x3bd   : > { %8402 = vmatpush3.bf16.msra.mxu1 %v8401_v63  ;;  %v8462_v63 = vpack.c.bf16 %v5457_v62, %v5456_v61  ;;  %v8452_v61 = vpack.c.bf16 %v5435_v59, %v5434_v56  ;;  %v5452_v62 = vld [vmem:[%s12392_s1 + $0x6e0] sm:$0xff]  ;;  %v5483_v59 = vld [vmem:[%s12392_s1 + $0x7c8] sm:$0xff] }
 0x3be   : > { %8403 = vmatprep.subr.bf16.mxu1 %v9360_v7  ;;  %v5482_v56 = vld [vmem:[%s12392_s1 + $0x7c0] sm:$0xff] }
 0x3c1   : > { %8405 = vmatpush3.bf16.msra.mxu1 %v8404_v10  ;;  %v8474_v10 = vpack.c.bf16 %v5463_v9, %v5462_v6  ;;  %v5454_v9 = vld [vmem:[%s12392_s1 + $0x6f0] sm:$0xff] }
 0x477   : > { %v1030_v14 = vpop.f32.mrb[6].mxu1 }
 0x478   : > { %v1031_v15 = vadd.f32 %v5353_v13, %v1030_v14  ;;  %v7385_v16 = vpop.f32.mrb[7].mxu1  ;;  %v8478_v13 = vpack.c.bf16 %v5465_v12, %v5464_v11  ;;  %v5466_v14 = vld [vmem:[%s12392_s1 + $0x750] sm:$0xff] }
 0x479   : > { %v5470_v12 = vld [vmem:[%s12392_s1 + $0x770] sm:$0xff] }
 0x47a   : > { %v10185_v17 = vadd.f32 %v1031_v15, %v9962_v26  ;;  %v5406_v26 = vld [vmem:[%s12394_s3 + $0x110] sm:$0xff]  ;;  %v5467_v15 = vld [vmem:[%s12392_s1 + $0x758] sm:$0xff] }
 0x47b   : > { %v8410_v28 = vpack.c.bf16 %v5407_v27, %v5406_v26  ;;  %v8482_v16 = vpack.c.bf16 %v5467_v15, %v5466_v14  ;;  %v5424_v26 = vld [vmem:[%s12392_s1 + $0x600] sm:$0xff]  ;;  %v5425_v27 = vld [vmem:[%s12392_s1 + $0x608] sm:$0xff]  ;;  %v5438_v14 = vld [vmem:[%s12392_s1 + $0x670] sm:$0xff] }
 0x47c   : > { %1035 = vst [vmem:[#allocation2 + $0x10] sm:$0xff] %v10185_v17  ;;  %v1040_v18 = vmax.f32 %v10185_v17, 0.0  ;;  %v8432_v34 = vpack.c.bf16 %v5425_v27, %v5424_v26  ;;  %v5474_v27 = vld [vmem:[%s12392_s1 + $0x780] sm:$0xff] }
 0x47e   : > { %1163 = vmatprep.mubr.f32.mxu0 %v1040_v18  ;;  %v1340_v18 = vadd.s32 8, %v10251_v57 }
 0x480   : > { %v1345_v19 = vsub.s32 %v1340_v18, %v10253_v58 }
 0x482   : > { %vm1347_vm5 = vcmp.ge.s32.totalorder %v1345_v19, 0  ;;  %vm1349_vm6 = vcmp.le.s32.totalorder %v1345_v19, 1  ;;  %v5490_v19 = vld [vmem:[%s12392_s1 + $0x800] sm:$0xff] }
 0x483   : > { %v1037_v21 = vld [vmem:[#allocation2 + $0xf] sm:$0xff]  ;;  %vm1351_vm7 = vmand %vm1347_vm5, %vm1349_vm6 }
 0x484   : > { %v1038_v22 = vld [vmem:[#allocation2 + $0x11] sm:$0xff]  ;;  %v1039_v25 = vmax.f32 %v1037_v21, 0.0  ;;  %v10323_v33 = vsel %vm1351_vm7, 1.0, %v10201_v29 }
 0x485   : > { %v1041_v24 = vmax.f32 %v1038_v22, 0.0  ;;  %v5440_v22 = vld [vmem:[%s12392_s1 + $0x680] sm:$0xff] }
 0x486   : > { %1164 = vmatmul.mubr.f32.vlgmr.msra.gmra.mrb[8].mxu0 %v1039_v25 }
 0x487   : > { %7419 = vmatmul.mubr.f32.vlgmr.msra.gmra.mrb[8].mxu1 %v1041_v24  ;;  %8408 = vmatpush3.bf16.msra.mxu0 %v8407_v23  ;;  %v5441_v23 = vld [vmem:[%s12392_s1 + $0x688] sm:$0xff] }
 0x488   : > { %7453 = vmatprep.mubr.msk.f32.mxu0 %vm9362_vm0, %v10201_v29  ;;  %8409 = vmatprep.subr.bf16.mxu0 %v9360_v7  ;;  %v5445_v29 = vld [vmem:[%s12392_s1 + $0x6a8] sm:$0xff] }
 0x489   : > { %7458 = vmatprep.mubr.msk.f32.mxu1 %vm1354_vm4, %v10258_v60 }
 0x48b   : > { %8411 = vmatpush3.bf16.msra.mxu0 %v8410_v28  ;;  %v5442_v28 = vld [vmem:[%s12392_s1 + $0x690] sm:$0xff] }
 0x48c   : > { %8412 = vmatprep.subr.bf16.mxu0 %v9360_v7 }
 0x48f   : > { %8414 = vmatpush3.bf16.msra.mxu0 %v8413_v32  ;;  %v8430_v32 = vpack.c.bf16 %v5441_v23, %v5440_v22  ;;  %v5506_v22 = vld [vmem:[%s12392_s1 + $0x880] sm:$0xff]  ;;  %v5507_v23 = vld [vmem:[%s12392_s1 + $0x888] sm:$0xff] }
 0x490   : > { %8415 = vmatprep.subr.bf16.mxu0 %v9360_v7 }
 0x493   : > { %8417 = vmatpush3.bf16.msra.mxu0 %v8416_v38  ;;  %v8434_v38 = vpack.c.bf16 %v5443_v30, %v5442_v28  ;;  %v5475_v28 = vld [vmem:[%s12392_s1 + $0x788] sm:$0xff]  ;;  %v5492_v30 = vld [vmem:[%s12392_s1 + $0x810] sm:$0xff] }
 0x494   : > { %8418 = vmatprep.subr.bf16.mxu0 %v9360_v7 }
 0x497   : > { %8420 = vmatpush3.bf16.msra.mxu0 %v8419_v8  ;;  %v8436_v8 = vpack.c.bf16 %v5427_v36, %v5426_v35  ;;  %v5476_v35 = vld [vmem:[%s12392_s1 + $0x790] sm:$0xff] }
 0x498   : > { %8421 = vmatprep.subr.bf16.mxu0 %v9360_v7 }
 0x49b   : > { %8423 = vmatpush3.bf16.msra.mxu0 %v8422_v40  ;;  %v5429_v40 = vld [vmem:[%s12392_s1 + $0x628] sm:$0xff] }
 0x49c   : > { %8424 = vmatprep.subr.bf16.mxu0 %v9360_v7 }
 0x49f   : > { %8426 = vmatpush3.bf16.msra.mxu0 %v8425_v43  ;;  %v8440_v43 = vpack.c.bf16 %v5429_v40, %v5428_v39  ;;  %v5494_v40 = vld [vmem:[%s12392_s1 + $0x820] sm:$0xff] }
 0x4a0   : > { %8427 = vmatprep.subr.bf16.mxu0 %v9360_v7 }
 0x4a3   : > { %8429 = vmatpush3.bf16.msra.mxu0 %v8428_v46  ;;  %v5431_v46 = vld [vmem:[%s12392_s1 + $0x638] sm:$0xff] }
 0x4a4   : > { %8463 = vmatprep.subr.bf16.mxu0 %v8462_v63 }
 0x559   : > { %v6319_v48 = vpop.f32.mrb[8].mxu0 }
 0x55a   : > { %v1235_v47 = vpop.f32.mrb[8].mxu1  ;;  %v6320_v51 = vpop.f32.mrb[9].mxu0 }
 0x55b   : > { %v7420_v49 = vpop.f32.mrb[9].mxu1  ;;  %v6321_v52 = vadd.f32 %v6320_v51, %v6319_v48  ;;  %v5449_v48 = vld [vmem:[%s12392_s1 + $0x6c8] sm:$0xff]  ;;  %v5432_v51 = vld [vmem:[%s12392_s1 + $0x640] sm:$0xff] }
 0x55c   : > { %v8444_v49 = vpack.c.bf16 %v5431_v46, %v5430_v45  ;;  %v5478_v45 = vld [vmem:[%s12392_s1 + $0x7a0] sm:$0xff]  ;;  %v5479_v46 = vld [vmem:[%s12392_s1 + $0x7a8] sm:$0xff] }
 0x55d   : > { %v1166_v7 = vadd.f32 %v6321_v52, %v5403_v50  ;;  %v5433_v52 = vld [vmem:[%s12392_s1 + $0x648] sm:$0xff] }
 0x55f   : > { %v1236_v53 = vadd.f32 %v1235_v47, %v1166_v7  ;;  %v5448_v47 = vld [vmem:[%s12392_s1 + $0x6c0] sm:$0xff]  ;;  %v5450_v7 = vld [vmem:[%s12392_s1 + $0x6d0] sm:$0xff] }
 0x560   : > { %v8446_v50 = vpack.c.bf16 %v5449_v48, %v5448_v47  ;;  %v5496_v47 = vld [vmem:[%s12392_s1 + $0x830] sm:$0xff]  ;;  %v5497_v48 = vld [vmem:[%s12392_s1 + $0x838] sm:$0xff] }
 0x561   : > { %v1239_v54 = vmax.f32 %v1236_v53, 0.0  ;;  %v5451_v53 = vld [vmem:[%s12392_s1 + $0x6d8] sm:$0xff] }
 0x562   : > { %v8450_v55 = vpack.c.bf16 %v5451_v53, %v5450_v7  ;;  %v5498_v53 = vld [vmem:[%s12392_s1 + $0x840] sm:$0xff] }
 0x563   : > { %7454 = vmatmul.mubr.f32.vlgmr.msra.gmra.mrb[10].mxu0 %v1239_v54  ;;  %v8448_v54 = vpack.c.bf16 %v5433_v52, %v5432_v51  ;;  %v5480_v51 = vld [vmem:[%s12392_s1 + $0x7b0] sm:$0xff]  ;;  %v5481_v52 = vld [vmem:[%s12392_s1 + $0x7b8] sm:$0xff] }
 0x564   : > { %8465 = vmatpush3.bf16.msra.mxu0 %v8462_v63  ;;  %v5453_v63 = vld [vmem:[%s12392_s1 + $0x6e8] sm:$0xff]  ;;  %v8508_v7 = vpack.c.bf16 %v5481_v52, %v5480_v51  ;;  %v5526_v51 = vld [vmem:[%s12394_s3 + $0x190] sm:$0xff]  ;;  %v5527_v52 = vld [vmem:[%s12394_s3 + $0x198] sm:$0xff] }
 0x565   : > { %8467 = vmatprep.subr.bf16.mxu0 %v8466_v2  ;;  %v8454_v0 = vpack.c.bf16 %v5453_v63, %v5452_v62  ;;  %v5511_v62 = vld [vmem:[%s12392_s1 + $0x8a8] sm:$0xff]  ;;  %v8512_v63 = vpack.c.bf16 %v5483_v59, %v5482_v56  ;;  %v5528_v59 = vld [vmem:[%s12394_s3 + $0x1a0] sm:$0xff] }
 0x568   : > { %8469 = vmatpush3.bf16.msra.mxu0 %v8466_v2  ;;  %v5469_v2 = vld [vmem:[%s12392_s1 + $0x768] sm:$0xff] }
 0x569   : > { %8471 = vmatprep.subr.bf16.mxu0 %v8470_v5  ;;  %v8486_v4 = vpack.c.bf16 %v5469_v2, %v5468_v1  ;;  %v5500_v1 = vld [vmem:[%s12392_s1 + $0x850] sm:$0xff]  ;;  %v5501_v2 = vld [vmem:[%s12392_s1 + $0x858] sm:$0xff] }
 0x56c   : > { %8473 = vmatpush3.bf16.msra.mxu0 %v8470_v5  ;;  %v5437_v5 = vld [vmem:[%s12392_s1 + $0x668] sm:$0xff] }
 0x56d   : > { %8475 = vmatprep.subr.bf16.mxu0 %v8474_v10  ;;  %v8456_v6 = vpack.c.bf16 %v5437_v5, %v5436_v3  ;;  %v8514_v3 = vpack.c.bf16 %v5501_v2, %v5500_v1  ;;  %v5485_v5 = vld [vmem:[%s12392_s1 + $0x7d8] sm:$0xff] }
 0x56e   : > { %v5531_v1 = vld [vmem:[%s12394_s3 + $0x1b8] sm:$0xff] }
 0x570   : > { %8477 = vmatpush3.bf16.msra.mxu0 %v8474_v10  ;;  %v5455_v10 = vld [vmem:[%s12392_s1 + $0x6f8] sm:$0xff] }
 0x571   : > { %8479 = vmatprep.subr.bf16.mxu0 %v8478_v13  ;;  %v8458_v11 = vpack.c.bf16 %v5455_v10, %v5454_v9  ;;  %v5513_v9 = vld [vmem:[%s12392_s1 + $0x8b8] sm:$0xff] }
 0x574   : > { %8481 = vmatpush3.bf16.msra.mxu0 %v8478_v13  ;;  %v5471_v13 = vld [vmem:[%s12392_s1 + $0x778] sm:$0xff] }
 0x575   : > { %8483 = vmatprep.subr.bf16.mxu0 %v8482_v16  ;;  %v8490_v15 = vpack.c.bf16 %v5471_v13, %v5470_v12  ;;  %v5502_v12 = vld [vmem:[%s12392_s1 + $0x860] sm:$0xff]  ;;  %v5503_v13 = vld [vmem:[%s12392_s1 + $0x868] sm:$0xff] }
 0x578   : > { %8485 = vmatpush3.bf16.msra.mxu0 %v8482_v16  ;;  %v5439_v16 = vld [vmem:[%s12392_s1 + $0x678] sm:$0xff] }
 0x579   : > { %8487 = vmatprep.subr.bf16.mxu0 %v8486_v4  ;;  %v8460_v18 = vpack.c.bf16 %v5439_v16, %v5438_v14  ;;  %v8518_v14 = vpack.c.bf16 %v5503_v13, %v5502_v12  ;;  %v5487_v16 = vld [vmem:[%s12392_s1 + $0x7e8] sm:$0xff] }
 0x57c   : > { %8489 = vmatpush3.bf16.msra.mxu0 %v8486_v4  ;;  %v5484_v4 = vld [vmem:[%s12392_s1 + $0x7d0] sm:$0xff] }
 0x57d   : > { %8491 = vmatprep.subr.bf16.mxu0 %v8490_v15  ;;  %v8516_v10 = vpack.c.bf16 %v5485_v5, %v5484_v4  ;;  %v1658_v4 = vld [vmem:[#allocation2 + $0x21] sm:$0xff] }
 0x580   : > { %8493 = vmatpush3.bf16.msra.mxu0 %v8490_v15  ;;  %v5486_v15 = vld [vmem:[%s12392_s1 + $0x7e0] sm:$0xff] }
 0x636   : > { %v1331_v21 = vpop.f32.mrb[10].mxu0 }
 0x637   : > { %v1332_v24 = vadd.f32 %v5421_v20, %v1331_v21  ;;  %v7455_v25 = vpop.f32.mrb[11].mxu0  ;;  %v5491_v20 = vld [vmem:[%s12392_s1 + $0x808] sm:$0xff] }
 0x638   : > { %v8494_v21 = vpack.c.bf16 %v5491_v20, %v5490_v19  ;;  %v5515_v19 = vld [vmem:[%s12392_s1 + $0x8c8] sm:$0xff]  ;;  %v8520_v20 = vpack.c.bf16 %v5487_v16, %v5486_v15  ;;  %v5535_v15 = vld [vmem:[%s12394_s3 + $0x1d8] sm:$0xff] }
 0x639   : > { %v1335_v31 = vadd.f32 %v1332_v24, %v10185_v17  ;;  %v5444_v17 = vld [vmem:[%s12392_s1 + $0x6a0] sm:$0xff]  ;;  %v8526_v24 = vpack.c.bf16 %v5507_v23, %v5506_v22  ;;  %v5504_v22 = vld [vmem:[%s12392_s1 + $0x870] sm:$0xff]  ;;  %v5505_v23 = vld [vmem:[%s12392_s1 + $0x878] sm:$0xff] }
 0x63a   : > { %v8438_v37 = vpack.c.bf16 %v5445_v29, %v5444_v17 }
 0x63b   : > { %7456 = vmatprep.subr.mxu1 %v1335_v31  ;;  %8527 = vmatprep.subr.bf16.mxu0 %v8526_v24 }
 0x63c   : > { %7457 = vmatpush3.msra.mxu1 %v1335_v31  ;;  %v5493_v31 = vld [vmem:[%s12392_s1 + $0x818] sm:$0xff] }
 0x63d   : > { %7459 = vmatmul.mubr.msk.f32.vlgmr.msra.gmra.mrb[10].mxu1 %vm1354_vm4, %v10323_v33  ;;  %8431 = vmatprep.subr.bf16.mxu1 %v8430_v32  ;;  %v5508_v32 = vld [vmem:[%s12392_s1 + $0x890] sm:$0xff]  ;;  %v8498_v29 = vpack.c.bf16 %v5493_v31, %v5492_v30 }
 0x63e   : > { %8433 = vmatpush3.bf16.msra.mxu1 %v8432_v34  ;;  %v5509_v34 = vld [vmem:[%s12392_s1 + $0x898] sm:$0xff] }
 0x63f   : > { %8435 = vmatprep.subr.bf16.mxu1 %v8434_v38  ;;  %v8496_v38 = vpack.c.bf16 %v5475_v28, %v5474_v27  ;;  %v5516_v27 = vld [vmem:[%s12392_s1 + $0x8d0] sm:$0xff]  ;;  %v5517_v28 = vld [vmem:[%s12392_s1 + $0x8d8] sm:$0xff] }
 0x640   : > { %v8546_v31 = vpack.c.bf16 %v5517_v28, %v5516_v27  ;;  %v5575_v28 = vld [vmem:[%s12392_s1 + $0xa08] sm:$0xff] }
 0x642   : > { %8437 = vmatpush3.bf16.msra.mxu1 %v8436_v8  ;;  %v5477_v8 = vld [vmem:[%s12392_s1 + $0x798] sm:$0xff] }
 0x643   : > { %8439 = vmatprep.subr.bf16.mxu1 %v8438_v37  ;;  %v8530_v37 = vpack.c.bf16 %v5509_v34, %v5508_v32  ;;  %v8500_v42 = vpack.c.bf16 %v5477_v8, %v5476_v35  ;;  %v5518_v32 = vld [vmem:[%s12392_s1 + $0x8e0] sm:$0xff]  ;;  %v5519_v34 = vld [vmem:[%s12392_s1 + $0x8e8] sm:$0xff] }
 0x644   : > { %v8550_v35 = vpack.c.bf16 %v5519_v34, %v5518_v32  ;;  %v5525_v8 = vld [vmem:[%s12394_s3 + $0x188] sm:$0xff] }
 0x646   : > { %8441 = vmatpush3.bf16.msra.mxu1 %v8440_v43 }
 0x647   : > { %8443 = vmatprep.subr.bf16.mxu1 %v8442_v44  ;;  %v8502_v44 = vpack.c.bf16 %v5495_v41, %v5494_v40 }
 0x64a   : > { %8445 = vmatpush3.bf16.msra.mxu1 %v8444_v49  ;;  %v8504_v49 = vpack.c.bf16 %v5479_v46, %v5478_v45 }
 0x64b   : > { %8447 = vmatprep.subr.bf16.mxu1 %v8446_v50  ;;  %v8506_v50 = vpack.c.bf16 %v5497_v48, %v5496_v47  ;;  %v1655_v47 = vld [vmem:[#allocation2 + $0x7] sm:$0xff] }
 0x64e   : > { %8449 = vmatpush3.bf16.msra.mxu1 %v8448_v54  ;;  %v5499_v54 = vld [vmem:[%s12392_s1 + $0x848] sm:$0xff] }
 0x64f   : > { %8451 = vmatprep.subr.bf16.mxu1 %v8450_v55  ;;  %v8510_v55 = vpack.c.bf16 %v5499_v54, %v5498_v53 }
 0x652   : > { %8453 = vmatpush3.bf16.msra.mxu1 %v8452_v61  ;;  %v5510_v61 = vld [vmem:[%s12392_s1 + $0x8a0] sm:$0xff] }
 0x653   : > { %8455 = vmatprep.subr.bf16.mxu1 %v8454_v0  ;;  %v8534_v0 = vpack.c.bf16 %v5511_v62, %v5510_v61  ;;  %v5529_v61 = vld [vmem:[%s12394_s3 + $0x1a8] sm:$0xff] }
 0x656   : > { %8457 = vmatpush3.bf16.msra.mxu1 %v8456_v6  ;;  %v5512_v6 = vld [vmem:[%s12392_s1 + $0x8b0] sm:$0xff] }
 0x657   : > { %8459 = vmatprep.subr.bf16.mxu1 %v8458_v11  ;;  %v8538_v11 = vpack.c.bf16 %v5513_v9, %v5512_v6  ;;  %v5532_v6 = vld [vmem:[%s12394_s3 + $0x1c0] sm:$0xff]  ;;  %v5533_v9 = vld [vmem:[%s12394_s3 + $0x1c8] sm:$0xff] }
 0x658   : > { %v8574_v13 = vpack.c.bf16 %v5533_v9, %v5532_v6 }
 0x65a   : > { %8461 = vmatpush3.bf16.msra.mxu1 %v8460_v18  ;;  %v5514_v18 = vld [vmem:[%s12392_s1 + $0x8c0] sm:$0xff] }
 0x65b   : > { %8495 = vmatprep.subr.bf16.mxu1 %v8494_v21  ;;  %v8542_v21 = vpack.c.bf16 %v5515_v19, %v5514_v18  ;;  %v5536_v18 = vld [vmem:[%s12394_s3 + $0x1e0] sm:$0xff]  ;;  %v5537_v19 = vld [vmem:[%s12394_s3 + $0x1e8] sm:$0xff] }
 0x710   : > { %v7460_v25 = vpop.f32.mrb[10].mxu1 }
 0x711   : > { %1437 = vst [vmem:[#allocation2 + $0x18] sm:$0xff] %v7460_v25  ;;  %v1427_v26 = vpop.f32.mrb[11].mxu1 }
 0x712   : > { %1436 = vst [vmem:[#allocation2 + $0x10] sm:$0xff] %v1427_v26  ;;  %1565 = vmatprep.mubr.f32.mxu1 %v1427_v26  ;;  %v5489_v26 = vld [vmem:[%s12392_s1 + $0x7f8] sm:$0xff] }
 0x718   : > { %v1443_v39 = vld [vmem:[#allocation2 + $0x19] sm:$0xff] }
 0x719   : > { %v1442_v36 = vld [vmem:[#allocation2 + $0x11] sm:$0xff] }
 0x71a   : > { %v1438_v17 = vld [vmem:[#allocation2 + $0xf] sm:$0xff]  ;;  %7493 = vmatprep.mubr.f32.mxu0 %v1442_v36  ;;  %v1439_v43 = vld [vmem:[#allocation2 + $0x17] sm:$0xff] }
 0x71b   : > { %1566 = vmatmul.mubr.f32.vlgmr.msra.gmra.mrb[12].mxu1 %v1438_v17  ;;  %7494 = vmatmul.mubr.f32.vlgmr.msra.gmra.mrb[12].mxu0 %v1443_v39  ;;  %v5521_v36 = vld [vmem:[%s12392_s1 + $0x8f8] sm:$0xff] }
 0x71c   : > { %1570 = vmatprep.mubr.f32.mxu1 %v7460_v25  ;;  %8497 = vmatpush3.bf16.msra.mxu1 %v8496_v38  ;;  %v5488_v25 = vld [vmem:[%s12392_s1 + $0x7f0] sm:$0xff] }
 0x71d   : > { %8529 = vmatpush3.bf16.msra.mxu0 %v8526_v24  ;;  %8499 = vmatprep.subr.bf16.mxu1 %v8498_v29  ;;  %v8522_v24 = vpack.c.bf16 %v5505_v23, %v5504_v22  ;;  %v8524_v30 = vpack.c.bf16 %v5489_v26, %v5488_v25  ;;  %v5520_v38 = vld [vmem:[%s12392_s1 + $0x8f0] sm:$0xff]  ;;  %v5524_v29 = vld [vmem:[%s12394_s3 + $0x180] sm:$0xff]  ;;  %v5539_v22 = vld [vmem:[%s12394_s3 + $0x1f8] sm:$0xff] }
 0x71e   : > { %8531 = vmatprep.subr.bf16.mxu0 %v8530_v37  ;;  %v8554_v17 = vpack.c.bf16 %v5521_v36, %v5520_v38  ;;  %v5559_v25 = vld [vmem:[%s12392_s1 + $0x988] sm:$0xff]  ;;  %v5574_v26 = vld [vmem:[%s12392_s1 + $0xa00] sm:$0xff]  ;;  %v5560_v38 = vld [vmem:[%s12392_s1 + $0x990] sm:$0xff] }
 0x71f   : > { %1571 = vmatmul.mubr.f32.gmra.mrb[14].mxu1 %v1439_v43  ;;  %v8622_v32 = vpack.c.bf16 %v5575_v28, %v5574_v26  ;;  %v5568_v26 = vld [vmem:[%s12392_s1 + $0x9d0] sm:$0xff] }
 0x720   : > { %8501 = vmatpush3.bf16.msra.mxu1 %v8500_v42  ;;  %v5473_v42 = vld [vmem:[%s12393_s2 + $0x4] ss:$0 sm:$0xff] }
 0x721   : > { %8533 = vmatpush3.bf16.msra.mxu0 %v8530_v37  ;;  %8503 = vmatprep.subr.bf16.mxu1 %v8502_v44  ;;  %v8558_v37 = vpack.c.bf16 %v5525_v8, %v5524_v29  ;;  %v5545_v29 = vld [vmem:[%s12392_s1 + $0x918] sm:$0xff] }
 0x722   : > { %8535 = vmatprep.subr.bf16.mxu0 %v8534_v0 }
 0x724   : > { %8505 = vmatpush3.bf16.msra.mxu1 %v8504_v49 }
 0x725   : > { %8507 = vmatprep.subr.bf16.mxu1 %v8506_v50  ;;  %8537 = vmatpush3.bf16.msra.mxu0 %v8534_v0  ;;  %v5530_v0 = vld [vmem:[%s12394_s3 + $0x1b0] sm:$0xff] }
 0x726   : > { %8539 = vmatprep.subr.bf16.mxu0 %v8538_v11  ;;  %v8570_v5 = vpack.c.bf16 %v5531_v1, %v5530_v0 }
 0x728   : > { %8509 = vmatpush3.bf16.msra.mxu1 %v8508_v7  ;;  %v1659_v7 = vmax.f32 %v1655_v47, 0.0  ;;  %v5548_v47 = vld [vmem:[%s12392_s1 + $0x930] sm:$0xff] }
 0x729   : > { %8511 = vmatprep.subr.bf16.mxu1 %v8510_v55  ;;  %8541 = vmatpush3.bf16.msra.mxu0 %v8538_v11  ;;  %v8562_v55 = vpack.c.bf16 %v5527_v52, %v5526_v51  ;;  %v1664_v11 = vmax.f32 %v1658_v4, 0.0  ;;  %v5577_v4 = vld [vmem:[%s12392_s1 + $0xa18] sm:$0xff] }
 0x72a   : > { %8543 = vmatprep.subr.bf16.mxu0 %v8542_v21 }
 0x72c   : > { %8513 = vmatpush3.bf16.msra.mxu1 %v8512_v63  ;;  %v8566_v63 = vpack.c.bf16 %v5529_v61, %v5528_v59  ;;  %v5523_v59 = vld [vmem:[%s12393_s2 + $0x5] ss:$0 sm:$0xff] }
 0x72d   : > { %8515 = vmatprep.subr.bf16.mxu1 %v8514_v3  ;;  %8545 = vmatpush3.bf16.msra.mxu0 %v8542_v21  ;;  %v5538_v21 = vld [vmem:[%s12394_s3 + $0x1f0] sm:$0xff] }
 0x72e   : > { %8547 = vmatprep.subr.bf16.mxu0 %v8546_v31  ;;  %v8586_v23 = vpack.c.bf16 %v5539_v22, %v5538_v21  ;;  %v5583_v21 = vld [vmem:[%s12392_s1 + $0xa48] sm:$0xff]  ;;  %v5550_v22 = vld [vmem:[%s12392_s1 + $0x940] sm:$0xff] }
 0x730   : > { %8517 = vmatpush3.bf16.msra.mxu1 %v8516_v10 }
 0x731   : > { %8519 = vmatprep.subr.bf16.mxu1 %v8518_v14  ;;  %8549 = vmatpush3.bf16.msra.mxu0 %v8546_v31  ;;  %v5534_v14 = vld [vmem:[%s12394_s3 + $0x1d0] sm:$0xff]  ;;  %v5543_v31 = vld [vmem:[%s12392_s1 + $0x908] sm:$0xff] }
 0x732   : > { %8551 = vmatprep.subr.bf16.mxu0 %v8550_v35  ;;  %v8578_v16 = vpack.c.bf16 %v5535_v15, %v5534_v14  ;;  %v5581_v14 = vld [vmem:[%s12392_s1 + $0xa38] sm:$0xff] }
 0x734   : > { %8521 = vmatpush3.bf16.msra.mxu1 %v8520_v20  ;;  %v8582_v20 = vpack.c.bf16 %v5537_v19, %v5536_v18  ;;  %v5567_v18 = vld [vmem:[%s12392_s1 + $0x9c8] sm:$0xff] }
 0x735   : > { %8523 = vmatprep.subr.bf16.mxu1 %v8522_v24  ;;  %8553 = vmatpush3.bf16.msra.mxu0 %v8550_v35  ;;  %v5558_v24 = vld [vmem:[%s12392_s1 + $0x980] sm:$0xff]  ;;  %v5561_v35 = vld [vmem:[%s12392_s1 + $0x998] sm:$0xff] }
 0x736   : > { %8555 = vmatprep.subr.bf16.mxu0 %v8554_v17  ;;  %v8590_v27 = vpack.c.bf16 %v5559_v25, %v5558_v24  ;;  %v8594_v36 = vpack.c.bf16 %v5561_v35, %v5560_v38  ;;  %v5551_v24 = vld [vmem:[%s12392_s1 + $0x948] sm:$0xff]  ;;  %v5553_v38 = vld [vmem:[%s12392_s1 + $0x958] sm:$0xff] }
 0x737   : > { %v8608_v25 = vpack.c.bf16 %v5551_v24, %v5550_v22  ;;  %v5600_v22 = vld [vmem:[%s12394_s3 + $0x240] sm:$0xff] }
 0x738   : > { %8525 = vmatpush3.bf16.msra.mxu1 %v8524_v30  ;;  %v5542_v30 = vld [vmem:[%s12392_s1 + $0x900] sm:$0xff] }
 0x739   : > { %8557 = vmatpush3.bf16.msra.mxu0 %v8554_v17  ;;  %8559 = vmatprep.subr.bf16.mxu1 %v8558_v37  ;;  %v8592_v34 = vpack.c.bf16 %v5543_v31, %v5542_v30  ;;  %v5544_v17 = vld [vmem:[%s12392_s1 + $0x910] sm:$0xff]  ;;  %v5585_v31 = vld [vmem:[%s12392_s1 + $0xa58] sm:$0xff] }
 0x73a   : > { %8591 = vmatprep.subr.bf16.mxu0 %v8590_v27  ;;  %v8596_v8 = vpack.c.bf16 %v5545_v29, %v5544_v17  ;;  %v5569_v27 = vld [vmem:[%s12392_s1 + $0x9d8] sm:$0xff]  ;;  %v5584_v30 = vld [vmem:[%s12392_s1 + $0xa50] sm:$0xff]  ;;  %v5571_v17 = vld [vmem:[%s12392_s1 + $0x9e8] sm:$0xff] }
 0x73b   : > { %v8610_v28 = vpack.c.bf16 %v5569_v27, %v5568_v26  ;;  %v5603_v26 = vld [vmem:[%s12394_s3 + $0x258] sm:$0xff] }
 0x7ee   : > { %v6391_v39 = vpop.f32.mrb[12].mxu1  ;;  %v7495_v40 = vpop.f32.mrb[12].mxu0 }
 0x7ef   : > { %v6392_v41 = vpop.f32.mrb[13].mxu1  ;;  %v1642_v44 = vpop.f32.mrb[13].mxu0 }
 0x7f0   : > { %v6393_v43 = vadd.f32 %v6392_v41, %v6391_v39  ;;  %v5563_v39 = vld [vmem:[%s12392_s1 + $0x9a8] sm:$0xff]  ;;  %v5546_v41 = vld [vmem:[%s12392_s1 + $0x920] sm:$0xff] }
 0x7f2   : > { %v1568_v45 = vadd.f32 %v6393_v43, %v5473_v42  ;;  %v6394_v46 = vpop.f32.mrb[14].mxu1 }
 0x7f3   : > { %v6395_v48 = vpop.f32.mrb[15].mxu1 }
 0x7f4   : > { %v10570_v49 = vadd.f32 %v1642_v44, %v1568_v45  ;;  %v6396_v50 = vadd.f32 %v6395_v48, %v6394_v46  ;;  %v5564_v44 = vld [vmem:[%s12392_s1 + $0x9b0] sm:$0xff]  ;;  %v5565_v45 = vld [vmem:[%s12392_s1 + $0x9b8] sm:$0xff] }
 0x7f5   : > { %v8602_v46 = vpack.c.bf16 %v5565_v45, %v5564_v44  ;;  %v5549_v48 = vld [vmem:[%s12392_s1 + $0x938] sm:$0xff] }
 0x7f6   : > { %1651 = vst [vmem:[#allocation2 + $0x10] sm:$0xff] %v10570_v49  ;;  %v1573_v53 = vadd.f32 %v6396_v50, %v5473_v42  ;;  %v1660_v54 = vmax.f32 %v10570_v49, 0.0  ;;  %v5547_v42 = vld [vmem:[%s12392_s1 + $0x928] sm:$0xff]  ;;  %v8604_v50 = vpack.c.bf16 %v5549_v48, %v5548_v47  ;;  %v5573_v44 = vld [vmem:[%s12392_s1 + $0x9f8] sm:$0xff]  ;;  %v5556_v48 = vld [vmem:[%s12392_s1 + $0x970] sm:$0xff] }
 0x7f7   : > { %v8600_v43 = vpack.c.bf16 %v5547_v42, %v5546_v41  ;;  %v5555_v41 = vld [vmem:[%s12392_s1 + $0x968] sm:$0xff]  ;;  %v5589_v47 = vld [vmem:[%s12392_s1 + $0xa78] sm:$0xff] }
 0x7f8   : > { %v10580_v56 = vadd.f32 %v7495_v40, %v1573_v53  ;;  %1786 = vmatprep.mubr.f32.mxu1 %v1660_v54 }
 0x7f9   : > { %1787 = vmatmul.mubr.f32.vlgmr.msra.gmra.mrb[16].mxu1 %v1659_v7 }
 0x7fa   : > { %1652 = vst [vmem:[#allocation2 + $0x18] sm:$0xff] %v10580_v56  ;;  %v1663_v62 = vmax.f32 %v10580_v56, 0.0  ;;  %8561 = vmatpush3.bf16.msra.mxu1 %v8558_v37  ;;  %v5562_v37 = vld [vmem:[%s12392_s1 + $0x9a0] sm:$0xff] }
 0x7fb   : > { %8563 = vmatprep.subr.bf16.mxu1 %v8562_v55  ;;  %v8598_v40 = vpack.c.bf16 %v5563_v39, %v5562_v37  ;;  %v5587_v37 = vld [vmem:[%s12392_s1 + $0xa68] sm:$0xff]  ;;  %v5554_v39 = vld [vmem:[%s12392_s1 + $0x960] sm:$0xff] }
 0x7fc   : > { %1791 = vmatprep.mubr.f32.mxu1 %v1663_v62  ;;  %v8616_v42 = vpack.c.bf16 %v5555_v41, %v5554_v39  ;;  %v5611_v39 = vld [vmem:[%s12392_s1 + $0xa88] sm:$0xff] }
 0x7fd   : > { %v1656_v2 = vld [vmem:[#allocation2 + $0xf] sm:$0xff] }
 0x7fe   : > { %v1662_v3 = vmax.f32 %v1656_v2, 0.0  ;;  %8565 = vmatpush3.bf16.msra.mxu1 %v8562_v55 }
 0x7ff   : > { %8567 = vmatprep.subr.bf16.mxu1 %v8566_v63 }
 0x800   : > { %1792 = vmatmul.mubr.f32.gmra.mrb[18].mxu1 %v1662_v3  ;;  %v5576_v3 = vld [vmem:[%s12392_s1 + $0xa10] sm:$0xff] }
 0x801   : > { %v1657_v10 = vld [vmem:[#allocation2 + $0x19] sm:$0xff]  ;;  %v8626_v9 = vpack.c.bf16 %v5577_v4, %v5576_v3  ;;  %v5594_v4 = vld [vmem:[%s12394_s3 + $0x210] sm:$0xff] }
 0x802   : > { %v1661_v12 = vmax.f32 %v1657_v10, 0.0  ;;  %8569 = vmatpush3.bf16.msra.mxu1 %v8566_v63  ;;  %v5578_v10 = vld [vmem:[%s12392_s1 + $0xa20] sm:$0xff] }
 0x803   : > { %8571 = vmatprep.subr.bf16.mxu1 %v8570_v5 }
 0x804   : > { %7528 = vmatprep.mubr.f32.mxu0 %v1661_v12 }
 0x805   : > { %7529 = vmatmul.mubr.f32.vlgmr.msra.gmra.mrb[14].mxu0 %v1664_v11  ;;  %v5579_v11 = vld [vmem:[%s12392_s1 + $0xa28] sm:$0xff] }
 0x806   : > { %8573 = vmatpush3.bf16.msra.mxu1 %v8570_v5  ;;  %8593 = vmatpush3.bf16.msra.mxu0 %v8592_v34  ;;  %v8630_v12 = vpack.c.bf16 %v5579_v11, %v5578_v10  ;;  %v8642_v34 = vpack.c.bf16 %v5585_v31, %v5584_v30  ;;  %v5605_v30 = vld [vmem:[%s12394_s3 + $0x268] sm:$0xff] }
 0x807   : > { %8575 = vmatprep.subr.bf16.mxu1 %v8574_v13  ;;  %8595 = vmatprep.subr.bf16.mxu0 %v8594_v36  ;;  %v5570_v36 = vld [vmem:[%s12392_s1 + $0x9e0] sm:$0xff] }
 0x808   : > { %v8614_v29 = vpack.c.bf16 %v5571_v17, %v5570_v36  ;;  %v5627_v36 = vld [vmem:[%s12392_s1 + $0xb08] sm:$0xff]  ;;  %v5642_v17 = vld [vmem:[%s12392_s1 + $0xb80] sm:$0xff] }
 0x80a   : > { %8577 = vmatpush3.bf16.msra.mxu1 %v8574_v13  ;;  %8597 = vmatpush3.bf16.msra.mxu0 %v8596_v8  ;;  %v5580_v13 = vld [vmem:[%s12392_s1 + $0xa30] sm:$0xff]  ;;  %v5586_v8 = vld [vmem:[%s12392_s1 + $0xa60] sm:$0xff] }
 0x80b   : > { %8579 = vmatprep.subr.bf16.mxu1 %v8578_v16  ;;  %8599 = vmatprep.subr.bf16.mxu0 %v8598_v40  ;;  %v8634_v15 = vpack.c.bf16 %v5581_v14, %v5580_v13  ;;  %v8646_v40 = vpack.c.bf16 %v5587_v37, %v5586_v8  ;;  %v5596_v14 = vld [vmem:[%s12394_s3 + $0x220] sm:$0xff]  ;;  %v5643_v8 = vld [vmem:[%s12392_s1 + $0xb88] sm:$0xff] }
 0x80c   : > { %v5610_v37 = vld [vmem:[%s12392_s1 + $0xa80] sm:$0xff] }
 0x80d   : > { %v8688_v41 = vpack.c.bf16 %v5611_v39, %v5610_v37  ;;  %v5652_v37 = vld [vmem:[%s12392_s1 + $0xbd0] sm:$0xff]  ;;  %v5653_v39 = vld [vmem:[%s12392_s1 + $0xbd8] sm:$0xff] }
 0x80e   : > { %8581 = vmatpush3.bf16.msra.mxu1 %v8578_v16  ;;  %8601 = vmatpush3.bf16.msra.mxu0 %v8600_v43  ;;  %v5566_v16 = vld [vmem:[%s12392_s1 + $0x9c0] sm:$0xff]  ;;  %v5572_v43 = vld [vmem:[%s12392_s1 + $0x9f0] sm:$0xff] }
 0x80f   : > { %8583 = vmatprep.subr.bf16.mxu1 %v8582_v20  ;;  %8603 = vmatprep.subr.bf16.mxu0 %v8602_v46  ;;  %v8606_v19 = vpack.c.bf16 %v5567_v18, %v5566_v16  ;;  %v8618_v45 = vpack.c.bf16 %v5573_v44, %v5572_v43  ;;  %v5588_v46 = vld [vmem:[%s12392_s1 + $0xa70] sm:$0xff]  ;;  %v5629_v43 = vld [vmem:[%s12392_s1 + $0xb18] sm:$0xff] }
 0x812   : > { %8585 = vmatpush3.bf16.msra.mxu1 %v8582_v20  ;;  %8605 = vmatpush3.bf16.msra.mxu0 %v8604_v50  ;;  %v5582_v20 = vld [vmem:[%s12392_s1 + $0xa40] sm:$0xff]  ;;  %v8650_v50 = vpack.c.bf16 %v5589_v47, %v5588_v46  ;;  %v5613_v46 = vld [vmem:[%s12392_s1 + $0xa98] sm:$0xff] }
 0x813   : > { %8587 = vmatprep.subr.bf16.mxu1 %v8586_v23  ;;  %8607 = vmatprep.subr.bf16.mxu0 %v8606_v19  ;;  %v5598_v19 = vld [vmem:[%s12394_s3 + $0x230] sm:$0xff] }
 0x816   : > { %8589 = vmatpush3.bf16.msra.mxu1 %v8586_v23  ;;  %v8638_v23 = vpack.c.bf16 %v5583_v21, %v5582_v20  ;;  %8609 = vmatpush3.bf16.msra.mxu0 %v8608_v25  ;;  %v5599_v20 = vld [vmem:[%s12394_s3 + $0x238] sm:$0xff]  ;;  %v5602_v25 = vld [vmem:[%s12394_s3 + $0x250] sm:$0xff] }
 0x817   : > { %8623 = vmatprep.subr.bf16.mxu1 %v8622_v32  ;;  %8611 = vmatprep.subr.bf16.mxu0 %v8610_v28  ;;  %v8666_v21 = vpack.c.bf16 %v5599_v20, %v5598_v19  ;;  %v8674_v27 = vpack.c.bf16 %v5603_v26, %v5602_v25  ;;  %v5604_v28 = vld [vmem:[%s12394_s3 + $0x260] sm:$0xff]  ;;  %v5649_v25 = vld [vmem:[%s12392_s1 + $0xbb8] sm:$0xff] }
 0x818   : > { %v8678_v31 = vpack.c.bf16 %v5605_v30, %v5604_v28  ;;  %v5635_v28 = vld [vmem:[%s12392_s1 + $0xb48] sm:$0xff] }
 0x8cc   : > { %v6447_v51 = vpop.f32.mrb[16].mxu1 }
 0x8cd   : > { %v6448_v52 = vpop.f32.mrb[17].mxu1 }
 0x8ce   : > { %v6449_v7 = vadd.f32 %v6448_v52, %v6447_v51  ;;  %v5557_v51 = vld [vmem:[%s12392_s1 + $0x978] sm:$0xff] }
 0x8cf   : > { %v8620_v52 = vpack.c.bf16 %v5557_v51, %v5556_v48  ;;  %v5630_v48 = vld [vmem:[%s12392_s1 + $0xb20] sm:$0xff] }
 0x8d0   : > { %v1789_v63 = vadd.f32 %v6449_v7, %v5523_v59  ;;  %v5592_v7 = vld [vmem:[%s12394_s3 + $0x200] sm:$0xff] }
 0x8d3   : > { %v6450_v53 = vpop.f32.mrb[18].mxu1 }
 0x8d4   : > { %v6451_v54 = vpop.f32.mrb[19].mxu1 }
 0x8d5   : > { %v6452_v55 = vadd.f32 %v6451_v54, %v6450_v53  ;;  %v5593_v53 = vld [vmem:[%s12394_s3 + $0x208] sm:$0xff] }
 0x8d6   : > { %v8654_v54 = vpack.c.bf16 %v5593_v53, %v5592_v7  ;;  %v5615_v7 = vld [vmem:[%s12392_s1 + $0xaa8] sm:$0xff] }
 0x8d7   : > { %v1794_v61 = vadd.f32 %v6452_v55, %v5523_v59  ;;  %v5541_v55 = vld [vmem:[%s12395_s4 + $0x3] ss:$0 sm:$0xff] }
 0x8d8   : > { %v7530_v62 = vpop.f32.mrb[14].mxu0 }
 0x8d9   : > { %v1869_v0 = vadd.f32 %v7530_v62, %v1794_v61  ;;  %v1863_v1 = vpop.f32.mrb[15].mxu0 }
 0x8da   : > { %v1864_v2 = vadd.f32 %v1863_v1, %v1789_v63 }
 0x8db   : > { %v1873_v6 = vmax.f32 %v1869_v0, 0.0 }
 0x8dc   : > { %v1872_v5 = vmax.f32 %v1864_v2, 0.0 }
 0x8de   : > { %7563 = vmatprep.mubr.f32.mxu1 %v1872_v5 }
 0x8df   : > { %7564 = vmatmul.mubr.f32.vlgmr.msra.gmra.mrb[20].mxu1 %v1873_v6 }
 0x8e0   : > { %8625 = vmatpush3.bf16.msra.mxu1 %v8622_v32  ;;  %v5552_v32 = vld [vmem:[%s12392_s1 + $0x950] sm:$0xff] }
 0x8e1   : > { %8627 = vmatprep.subr.bf16.mxu1 %v8626_v9  ;;  %v8612_v35 = vpack.c.bf16 %v5553_v38, %v5552_v32  ;;  %v5606_v32 = vld [vmem:[%s12394_s3 + $0x270] sm:$0xff] }
 0x8e3   : > { %8613 = vmatpush3.bf16.msra.mxu0 %v8612_v35  ;;  %v5626_v35 = vld [vmem:[%s12392_s1 + $0xb00] sm:$0xff] }
 0x8e4   : > { %8629 = vmatpush3.bf16.msra.mxu1 %v8626_v9  ;;  %8615 = vmatprep.subr.bf16.mxu0 %v8614_v29  ;;  %v8686_v29 = vpack.c.bf16 %v5627_v36, %v5626_v35  ;;  %v5619_v35 = vld [vmem:[%s12392_s1 + $0xac8] sm:$0xff] }
 0x8e5   : > { %8631 = vmatprep.subr.bf16.mxu1 %v8630_v12 }
 0x8e7   : > { %8617 = vmatpush3.bf16.msra.mxu0 %v8616_v42  ;;  %v5628_v42 = vld [vmem:[%s12392_s1 + $0xb10] sm:$0xff] }
 0x8e8   : > { %8633 = vmatpush3.bf16.msra.mxu1 %v8630_v12  ;;  %8619 = vmatprep.subr.bf16.mxu0 %v8618_v45  ;;  %v8690_v44 = vpack.c.bf16 %v5629_v43, %v5628_v42  ;;  %v5612_v45 = vld [vmem:[%s12392_s1 + $0xa90] sm:$0xff]  ;;  %v5621_v42 = vld [vmem:[%s12392_s1 + $0xad8] sm:$0xff] }
 0x8e9   : > { %8635 = vmatprep.subr.bf16.mxu1 %v8634_v15  ;;  %v8692_v47 = vpack.c.bf16 %v5613_v46, %v5612_v45  ;;  %v5639_v45 = vld [vmem:[%s12392_s1 + $0xb68] sm:$0xff] }
 0x8eb   : > { %8621 = vmatpush3.bf16.msra.mxu0 %v8620_v52  ;;  %v5614_v52 = vld [vmem:[%s12392_s1 + $0xaa0] sm:$0xff] }
 0x8ec   : > { %8637 = vmatpush3.bf16.msra.mxu1 %v8634_v15  ;;  %8655 = vmatprep.subr.bf16.mxu0 %v8654_v54  ;;  %v5597_v15 = vld [vmem:[%s12394_s3 + $0x228] sm:$0xff]  ;;  %v8696_v53 = vpack.c.bf16 %v5615_v7, %v5614_v52  ;;  %v5640_v7 = vld [vmem:[%s12392_s1 + $0xb70] sm:$0xff] }
 0x8ed   : > { %8639 = vmatprep.subr.bf16.mxu1 %v8638_v23  ;;  %v8662_v18 = vpack.c.bf16 %v5597_v15, %v5596_v14  ;;  %v5644_v15 = vld [vmem:[%s12392_s1 + $0xb90] sm:$0xff]  ;;  %v5623_v52 = vld [vmem:[%s12392_s1 + $0xae8] sm:$0xff] }
 0x8f0   : > { %8641 = vmatpush3.bf16.msra.mxu1 %v8638_v23  ;;  %v5601_v23 = vld [vmem:[%s12394_s3 + $0x248] sm:$0xff] }
 0x8f1   : > { %8643 = vmatprep.subr.bf16.mxu1 %v8642_v34  ;;  %v8670_v24 = vpack.c.bf16 %v5601_v23, %v5600_v22  ;;  %v5647_v22 = vld [vmem:[%s12392_s1 + $0xba8] sm:$0xff] }
 0x8f4   : > { %8645 = vmatpush3.bf16.msra.mxu1 %v8642_v34  ;;  %v5607_v34 = vld [vmem:[%s12394_s3 + $0x278] sm:$0xff] }
 0x8f5   : > { %8647 = vmatprep.subr.bf16.mxu1 %v8646_v40  ;;  %v8682_v38 = vpack.c.bf16 %v5607_v34, %v5606_v32  ;;  %v5651_v32 = vld [vmem:[%s12392_s1 + $0xbc8] sm:$0xff]  ;;  %v5618_v34 = vld [vmem:[%s12392_s1 + $0xac0] sm:$0xff] }
 0x8f6   : > { %v8704_v36 = vpack.c.bf16 %v5619_v35, %v5618_v34  ;;  %v5668_v34 = vld [vmem:[%s12394_s3 + $0x2c0] sm:$0xff] }
 0x8f8   : > { %8649 = vmatpush3.bf16.msra.mxu1 %v8646_v40  ;;  %v8718_v40 = vpack.c.bf16 %v5643_v8, %v5642_v17  ;;  %v5636_v17 = vld [vmem:[%s12392_s1 + $0xb50] sm:$0xff] }
 0x8f9   : > { %8651 = vmatprep.subr.bf16.mxu1 %v8650_v50 }
 0x8fc   : > { %8653 = vmatpush3.bf16.msra.mxu1 %v8650_v50  ;;  %v5631_v50 = vld [vmem:[%s12392_s1 + $0xb28] sm:$0xff] }
 0x8fd   : > { %8687 = vmatprep.subr.bf16.mxu1 %v8686_v29  ;;  %v8694_v51 = vpack.c.bf16 %v5631_v50, %v5630_v48  ;;  %v5637_v29 = vld [vmem:[%s12392_s1 + $0xb58] sm:$0xff]  ;;  %v5655_v48 = vld [vmem:[%s12392_s1 + $0xbe8] sm:$0xff]  ;;  %v5622_v50 = vld [vmem:[%s12392_s1 + $0xae0] sm:$0xff] }
 0x8fe   : > { %v8706_v8 = vpack.c.bf16 %v5637_v29, %v5636_v17  ;;  %v5671_v17 = vld [vmem:[%s12394_s3 + $0x2d8] sm:$0xff] }
 0x9b2   : > { %v7565_v59 = vpop.f32.mrb[20].mxu1 }
 0x9b3   : > { %v1971_v61 = vadd.f32 %v7565_v59, %v5541_v55  ;;  %v1965_v62 = vpop.f32.mrb[21].mxu1 }
 0x9b4   : > { %v1966_v63 = vadd.f32 %v5541_v55, %v1965_v62  ;;  %v5633_v55 = vld [vmem:[%s12392_s1 + $0xb38] sm:$0xff] }
 0x9b5   : > { %v10777_v0 = vadd.f32 %v1971_v61, %v10580_v56  ;;  %v5595_v56 = vld [vmem:[%s12394_s3 + $0x218] sm:$0xff]  ;;  %v5616_v61 = vld [vmem:[%s12392_s1 + $0xab0] sm:$0xff] }
 0x9b6   : > { %v10780_v1 = vadd.f32 %v1966_v63, %v10570_v49  ;;  %v8658_v13 = vpack.c.bf16 %v5595_v56, %v5594_v4  ;;  %v5617_v62 = vld [vmem:[%s12392_s1 + $0xab8] sm:$0xff]  ;;  %v5591_v56 = vld [vmem:[%s12393_s2 + $0x6] ss:$0 sm:$0xff] }
 0x9b7   : > { %1977 = vst [vmem:[#allocation2 + $0x18] sm:$0xff] %v10777_v0  ;;  %v1988_v12 = vmax.f32 %v10777_v0, 0.0  ;;  %v8700_v63 = vpack.c.bf16 %v5617_v62, %v5616_v61  ;;  %v5657_v61 = vld [vmem:[%s12392_s1 + $0xbf8] sm:$0xff]  ;;  %v5624_v62 = vld [vmem:[%s12392_s1 + $0xaf0] sm:$0xff] }
 0x9b8   : > { %1976 = vst [vmem:[#allocation2 + $0x10] sm:$0xff] %v10780_v1  ;;  %v1985_v2 = vmax.f32 %v10780_v1, 0.0 }
 0x9ba   : > { %2111 = vmatprep.mubr.f32.mxu0 %v1985_v2 }
 0x9be   : > { %v1983_v3 = vld [vmem:[#allocation2 + $0x1b] sm:$0xff] }
 0x9bf   : > { %v1982_v5 = vld [vmem:[#allocation2 + $0x13] sm:$0xff]  ;;  %v1989_v11 = vmax.f32 %v1983_v3, 0.0 }
 0x9c0   : > { %v1980_v6 = vld [vmem:[#allocation2 + $0xd] sm:$0xff]  ;;  %v1986_v49 = vmax.f32 %v1982_v5, 0.0  ;;  %v1981_v10 = vld [vmem:[#allocation2 + $0x15] sm:$0xff] }
 0x9c1   : > { %v1984_v9 = vmax.f32 %v1980_v6, 0.0  ;;  %v1987_v16 = vmax.f32 %v1981_v10, 0.0 }
 0x9c2   : > { %7598 = vmatprep.mubr.f32.mxu1 %v1986_v49 }
 0x9c3   : > { %2112 = vmatmul.mubr.f32.vlgmr.msra.gmra.mrb[16].mxu0 %v1984_v9  ;;  %7599 = vmatmul.mubr.f32.vlgmr.msra.gmra.mrb[22].mxu1 %v1989_v11 }
 0x9c4   : > { %2116 = vmatprep.mubr.f32.mxu0 %v1988_v12  ;;  %8657 = vmatpush3.bf16.msra.mxu0 %v8654_v54  ;;  %v5632_v54 = vld [vmem:[%s12392_s1 + $0xb30] sm:$0xff] }
 0x9c5   : > { %8659 = vmatprep.subr.bf16.mxu0 %v8658_v13  ;;  %8689 = vmatpush3.bf16.msra.mxu1 %v8688_v41  ;;  %v8698_v59 = vpack.c.bf16 %v5633_v55, %v5632_v54  ;;  %v8738_v41 = vpack.c.bf16 %v5653_v39, %v5652_v37  ;;  %v8712_v54 = vpack.c.bf16 %v5623_v52, %v5622_v50  ;;  %v5673_v37 = vld [vmem:[%s12394_s3 + $0x2e8] sm:$0xff] }
 0x9c6   : > { %8691 = vmatprep.subr.bf16.mxu1 %v8690_v44  ;;  %v5638_v44 = vld [vmem:[%s12392_s1 + $0xb60] sm:$0xff] }
 0x9c7   : > { %2117 = vmatmul.mubr.f32.gmra.mrb[18].mxu0 %v1987_v16  ;;  %v5645_v16 = vld [vmem:[%s12392_s1 + $0xb98] sm:$0xff]  ;;  %v8710_v46 = vpack.c.bf16 %v5639_v45, %v5638_v44 }
 0x9c8   : > { %8661 = vmatpush3.bf16.msra.mxu0 %v8658_v13  ;;  %v8722_v20 = vpack.c.bf16 %v5645_v16, %v5644_v15  ;;  %v5662_v16 = vld [vmem:[%s12394_s3 + $0x290] sm:$0xff] }
 0x9c9   : > { %8663 = vmatprep.subr.bf16.mxu0 %v8662_v18  ;;  %8693 = vmatpush3.bf16.msra.mxu1 %v8692_v47  ;;  %v5654_v47 = vld [vmem:[%s12392_s1 + $0xbe0] sm:$0xff] }
 0x9ca   : > { %8695 = vmatprep.subr.bf16.mxu1 %v8694_v51  ;;  %v8742_v51 = vpack.c.bf16 %v5655_v48, %v5654_v47 }
 0x9cc   : > { %8665 = vmatpush3.bf16.msra.mxu0 %v8662_v18 }
 0x9cd   : > { %8667 = vmatprep.subr.bf16.mxu0 %v8666_v21  ;;  %8697 = vmatpush3.bf16.msra.mxu1 %v8696_v53  ;;  %v5641_v53 = vld [vmem:[%s12392_s1 + $0xb78] sm:$0xff] }
 0x9ce   : > { %8699 = vmatprep.subr.bf16.mxu1 %v8698_v59  ;;  %v8714_v55 = vpack.c.bf16 %v5641_v53, %v5640_v7  ;;  %v5656_v59 = vld [vmem:[%s12392_s1 + $0xbf0] sm:$0xff] }
 0x9d0   : > { %8669 = vmatpush3.bf16.msra.mxu0 %v8666_v21  ;;  %v5646_v21 = vld [vmem:[%s12392_s1 + $0xba0] sm:$0xff] }
 0x9d1   : > { %8671 = vmatprep.subr.bf16.mxu0 %v8670_v24  ;;  %8701 = vmatpush3.bf16.msra.mxu1 %v8700_v63  ;;  %v8726_v23 = vpack.c.bf16 %v5647_v22, %v5646_v21  ;;  %v8746_v63 = vpack.c.bf16 %v5657_v61, %v5656_v59 }
 0x9d4   : > { %8673 = vmatpush3.bf16.msra.mxu0 %v8670_v24  ;;  %v5648_v24 = vld [vmem:[%s12392_s1 + $0xbb0] sm:$0xff] }
 0x9d5   : > { %8675 = vmatprep.subr.bf16.mxu0 %v8674_v27  ;;  %v8730_v26 = vpack.c.bf16 %v5649_v25, %v5648_v24  ;;  %v5664_v25 = vld [vmem:[%s12394_s3 + $0x2a0] sm:$0xff] }
 0x9d8   : > { %8677 = vmatpush3.bf16.msra.mxu0 %v8674_v27  ;;  %v5634_v27 = vld [vmem:[%s12392_s1 + $0xb40] sm:$0xff] }
 0x9d9   : > { %8679 = vmatprep.subr.bf16.mxu0 %v8678_v31  ;;  %v8702_v30 = vpack.c.bf16 %v5635_v28, %v5634_v27 }
 0x9db   : > { %8703 = vmatprep.subr.bf16.mxu1 %v8702_v30  ;;  %v5666_v30 = vld [vmem:[%s12394_s3 + $0x2b0] sm:$0xff] }
 0x9dc   : > { %8681 = vmatpush3.bf16.msra.mxu0 %v8678_v31  ;;  %v5650_v31 = vld [vmem:[%s12392_s1 + $0xbc0] sm:$0xff]  ;;  %8705 = vmatpush3.bf16.msra.mxu1 %v8704_v36  ;;  %v5670_v36 = vld [vmem:[%s12394_s3 + $0x2d0] sm:$0xff] }
 0x9dd   : > { %8683 = vmatprep.subr.bf16.mxu0 %v8682_v38  ;;  %8707 = vmatprep.subr.bf16.mxu1 %v8706_v8  ;;  %v8770_v29 = vpack.c.bf16 %v5671_v17, %v5670_v36  ;;  %v5672_v8 = vld [vmem:[%s12394_s3 + $0x2e0] sm:$0xff]  ;;  %v2631_v17 = vadd.s32 24, %v10251_v57 }
 0x9de   : > { %v8774_v39 = vpack.c.bf16 %v5673_v37, %v5672_v8  ;;  %v5677_v36 = vld [vmem:[%s12395_s4 + $0x5] ss:$0 sm:$0xff] }
 0x9e0   : > { %8685 = vmatpush3.bf16.msra.mxu0 %v8682_v38  ;;  %v8734_v38 = vpack.c.bf16 %v5651_v32, %v5650_v31  ;;  %v5667_v31 = vld [vmem:[%s12394_s3 + $0x2b8] sm:$0xff] }
 0x9e1   : > { %8719 = vmatprep.subr.bf16.mxu0 %v8718_v40  ;;  %v8762_v32 = vpack.c.bf16 %v5667_v31, %v5666_v30  ;;  %v5691_v30 = vld [vmem:[%s12392_s1 + $0xc48] sm:$0xff]  ;;  %v5708_v31 = vld [vmem:[%s12392_s1 + $0xcd0] sm:$0xff] }
 0xa96   : > { %v6521_v2 = vpop.f32.mrb[16].mxu0  ;;  %v7600_v3 = vpop.f32.mrb[22].mxu1 }
 0xa97   : > { %v6522_v4 = vpop.f32.mrb[17].mxu0  ;;  %v2188_v6 = vpop.f32.mrb[23].mxu1 }
 0xa98   : > { %v6523_v5 = vadd.f32 %v6522_v4, %v6521_v2  ;;  %v5625_v2 = vld [vmem:[%s12392_s1 + $0xaf8] sm:$0xff]  ;;  %v5660_v4 = vld [vmem:[%s12394_s3 + $0x280] sm:$0xff] }
 0xa9a   : > { %v2114_v49 = vadd.f32 %v6523_v5, %v5591_v56  ;;  %v6524_v9 = vpop.f32.mrb[18].mxu0 }
 0xa9b   : > { %v6525_v10 = vpop.f32.mrb[19].mxu0 }
 0xa9c   : > { %v2189_v11 = vadd.f32 %v2188_v6, %v2114_v49  ;;  %v6526_v12 = vadd.f32 %v6525_v10, %v6524_v9  ;;  %v5609_v6 = vld [vmem:[%s12395_s4 + $0x4] ss:$0 sm:$0xff] }
 0xa9e   : > { %v2197_v13 = vmax.f32 %v2189_v11, 0.0  ;;  %v2119_v14 = vadd.f32 %v6526_v12, %v5591_v56  ;;  %v5661_v56 = vld [vmem:[%s12394_s3 + $0x288] sm:$0xff] }
 0xa9f   : > { %v8750_v5 = vpack.c.bf16 %v5661_v56, %v5660_v4  ;;  %v5683_v4 = vld [vmem:[%s12392_s1 + $0xc08] sm:$0xff] }
 0xaa0   : > { %v2194_v18 = vadd.f32 %v7600_v3, %v2119_v14  ;;  %7633 = vmatprep.mubr.f32.mxu0 %v2197_v13  ;;  %v8716_v3 = vpack.c.bf16 %v5625_v2, %v5624_v62  ;;  %v5698_v62 = vld [vmem:[%s12392_s1 + $0xc80] sm:$0xff] }
 0xaa1   : > { %v5682_v2 = vld [vmem:[%s12392_s1 + $0xc00] sm:$0xff] }
 0xaa2   : > { %v2198_v19 = vmax.f32 %v2194_v18, 0.0  ;;  %v8788_v56 = vpack.c.bf16 %v5683_v4, %v5682_v2  ;;  %v5693_v4 = vld [vmem:[%s12392_s1 + $0xc58] sm:$0xff] }
 0xaa4   : > { %7634 = vmatmul.mubr.f32.vlgmr.msra.gmra.mrb[20].mxu0 %v2198_v19 }
 0xaa5   : > { %8721 = vmatpush3.bf16.msra.mxu0 %v8718_v40  ;;  %v5620_v40 = vld [vmem:[%s12392_s1 + $0xad0] sm:$0xff] }
 0xaa6   : > { %8723 = vmatprep.subr.bf16.mxu0 %v8722_v20  ;;  %v8708_v43 = vpack.c.bf16 %v5621_v42, %v5620_v40  ;;  %v5674_v40 = vld [vmem:[%s12394_s3 + $0x2f0] sm:$0xff] }
 0xaa8   : > { %8709 = vmatpush3.bf16.msra.mxu1 %v8708_v43 }
 0xaa9   : > { %8725 = vmatpush3.bf16.msra.mxu0 %v8722_v20  ;;  %8711 = vmatprep.subr.bf16.mxu1 %v8710_v46  ;;  %v5659_v46 = vld [vmem:[%s12393_s2 + $0x7] ss:$0 sm:$0xff] }
 0xaaa   : > { %8727 = vmatprep.subr.bf16.mxu0 %v8726_v23 }
 0xaac   : > { %8713 = vmatpush3.bf16.msra.mxu1 %v8712_v54 }
 0xaad   : > { %8729 = vmatpush3.bf16.msra.mxu0 %v8726_v23  ;;  %8715 = vmatprep.subr.bf16.mxu1 %v8714_v55 }
 0xaae   : > { %8731 = vmatprep.subr.bf16.mxu0 %v8730_v26 }
 0xab0   : > { %8717 = vmatpush3.bf16.msra.mxu1 %v8716_v3 }
 0xab1   : > { %8733 = vmatpush3.bf16.msra.mxu0 %v8730_v26  ;;  %8751 = vmatprep.subr.bf16.mxu1 %v8750_v5  ;;  %v5665_v26 = vld [vmem:[%s12394_s3 + $0x2a8] sm:$0xff] }
 0xab2   : > { %8735 = vmatprep.subr.bf16.mxu0 %v8734_v38  ;;  %v8758_v28 = vpack.c.bf16 %v5665_v26, %v5664_v25  ;;  %v5707_v25 = vld [vmem:[%s12392_s1 + $0xcc8] sm:$0xff] }
 0xab5   : > { %8737 = vmatpush3.bf16.msra.mxu0 %v8734_v38  ;;  %v5669_v38 = vld [vmem:[%s12394_s3 + $0x2c8] sm:$0xff] }
 0xab6   : > { %8739 = vmatprep.subr.bf16.mxu0 %v8738_v41  ;;  %v8766_v35 = vpack.c.bf16 %v5669_v38, %v5668_v34 }
 0xab9   : > { %8741 = vmatpush3.bf16.msra.mxu0 %v8738_v41  ;;  %v5675_v41 = vld [vmem:[%s12394_s3 + $0x2f8] sm:$0xff] }
 0xaba   : > { %8743 = vmatprep.subr.bf16.mxu0 %v8742_v51  ;;  %v8778_v42 = vpack.c.bf16 %v5675_v41, %v5674_v40 }
 0xabd   : > { %8745 = vmatpush3.bf16.msra.mxu0 %v8742_v51 }
 0xabe   : > { %8747 = vmatprep.subr.bf16.mxu0 %v8746_v63 }
 0xac1   : > { %8749 = vmatpush3.bf16.msra.mxu0 %v8746_v63  ;;  %v5699_v63 = vld [vmem:[%s12392_s1 + $0xc88] sm:$0xff] }
 0xac2   : > { %v8786_v3 = vpack.c.bf16 %v5699_v63, %v5698_v62  ;;  %v5722_v62 = vld [vmem:[%s12392_s1 + $0xd40] sm:$0xff]  ;;  %v5723_v63 = vld [vmem:[%s12392_s1 + $0xd48] sm:$0xff] }
 0xac3   : > { %v8834_v2 = vpack.c.bf16 %v5723_v63, %v5722_v62 }
 0xac4   : > { %8787 = vmatprep.subr.bf16.mxu0 %v8786_v3  ;;  %v5692_v3 = vld [vmem:[%s12392_s1 + $0xc50] sm:$0xff] }
 0xb77   : > { %v7635_v49 = vpop.f32.mrb[20].mxu0 }
 0xb78   : > { %v2296_v9 = vadd.f32 %v7635_v49, %v5609_v6  ;;  %v2290_v10 = vpop.f32.mrb[21].mxu0  ;;  %v5684_v49 = vld [vmem:[%s12392_s1 + $0xc10] sm:$0xff] }
 0xb79   : > { %v2291_v11 = vadd.f32 %v5609_v6, %v2290_v10  ;;  %v5701_v6 = vld [vmem:[%s12392_s1 + $0xc98] sm:$0xff] }
 0xb7a   : > { %v10985_v12 = vadd.f32 %v2296_v9, %v10777_v0  ;;  %v5663_v0 = vld [vmem:[%s12394_s3 + $0x298] sm:$0xff] }
 0xb7b   : > { %v10988_v13 = vadd.f32 %v2291_v11, %v10780_v1  ;;  %v8754_v24 = vpack.c.bf16 %v5663_v0, %v5662_v16  ;;  %v5685_v10 = vld [vmem:[%s12392_s1 + $0xc18] sm:$0xff]  ;;  %v5686_v0 = vld [vmem:[%s12392_s1 + $0xc20] sm:$0xff] }
 0xb7c   : > { %2302 = vst [vmem:[#allocation2 + $0x18] sm:$0xff] %v10985_v12  ;;  %v2313_v23 = vmax.f32 %v10985_v12, 0.0  ;;  %v8792_v11 = vpack.c.bf16 %v5685_v10, %v5684_v49  ;;  %v5710_v49 = vld [vmem:[%s12392_s1 + $0xce0] sm:$0xff]  ;;  %v5711_v10 = vld [vmem:[%s12392_s1 + $0xce8] sm:$0xff] }
 0xb7d   : > { %2301 = vst [vmem:[#allocation2 + $0x10] sm:$0xff] %v10988_v13  ;;  %v2310_v14 = vmax.f32 %v10988_v13, 0.0 }
 0xb7f   : > { %2436 = vmatprep.mubr.f32.mxu1 %v2310_v14  ;;  %v5702_v14 = vld [vmem:[%s12392_s1 + $0xca0] sm:$0xff] }
 0xb83   : > { %v2308_v15 = vld [vmem:[#allocation2 + $0x19] sm:$0xff] }
 0xb84   : > { %v2307_v18 = vld [vmem:[#allocation2 + $0x11] sm:$0xff]  ;;  %v2314_v22 = vmax.f32 %v2308_v15, 0.0  ;;  %v5703_v15 = vld [vmem:[%s12392_s1 + $0xca8] sm:$0xff] }
 0xb85   : > { %v2305_v19 = vld [vmem:[#allocation2 + $0xf] sm:$0xff]  ;;  %v2311_v1 = vmax.f32 %v2307_v18, 0.0  ;;  %v2306_v21 = vld [vmem:[#allocation2 + $0x17] sm:$0xff]  ;;  %v8794_v16 = vpack.c.bf16 %v5703_v15, %v5702_v14  ;;  %v8810_v15 = vpack.c.bf16 %v5711_v10, %v5710_v49  ;;  %v5756_v49 = vld [vmem:[%s12392_s1 + $0xe40] sm:$0xff] }
 0xb86   : > { %v2309_v20 = vmax.f32 %v2305_v19, 0.0  ;;  %v2312_v27 = vmax.f32 %v2306_v21, 0.0  ;;  %v5687_v18 = vld [vmem:[%s12392_s1 + $0xc28] sm:$0xff]  ;;  %v5704_v19 = vld [vmem:[%s12392_s1 + $0xcb0] sm:$0xff] }
 0xb87   : > { %7668 = vmatprep.mubr.f32.mxu0 %v2311_v1  ;;  %v5705_v1 = vld [vmem:[%s12392_s1 + $0xcb8] sm:$0xff]  ;;  %v5695_v14 = vld [vmem:[%s12392_s1 + $0xc68] sm:$0xff] }
 0xb88   : > { %2437 = vmatmul.mubr.f32.vlgmr.msra.gmra.mrb[24].mxu1 %v2309_v20  ;;  %7669 = vmatmul.mubr.f32.vlgmr.msra.gmra.mrb[22].mxu0 %v2314_v22  ;;  %v8796_v20 = vpack.c.bf16 %v5687_v18, %v5686_v0  ;;  %v8798_v21 = vpack.c.bf16 %v5705_v1, %v5704_v19  ;;  %v5688_v22 = vld [vmem:[%s12392_s1 + $0xc30] sm:$0xff]  ;;  %v5726_v0 = vld [vmem:[%s12392_s1 + $0xd60] sm:$0xff]  ;;  %v5727_v18 = vld [vmem:[%s12392_s1 + $0xd68] sm:$0xff] }
 0xb89   : > { %2441 = vmatprep.mubr.f32.mxu1 %v2313_v23  ;;  %8753 = vmatpush3.bf16.msra.mxu1 %v8750_v5  ;;  %v5700_v5 = vld [vmem:[%s12392_s1 + $0xc90] sm:$0xff]  ;;  %v5689_v23 = vld [vmem:[%s12392_s1 + $0xc38] sm:$0xff]  ;;  %v8842_v1 = vpack.c.bf16 %v5727_v18, %v5726_v0 }
 0xb8a   : > { %8755 = vmatprep.subr.bf16.mxu1 %v8754_v24  ;;  %v8790_v9 = vpack.c.bf16 %v5701_v6, %v5700_v5  ;;  %8789 = vmatpush3.bf16.msra.mxu0 %v8788_v56  ;;  %v8800_v26 = vpack.c.bf16 %v5689_v23, %v5688_v22  ;;  %v8808_v56 = vpack.c.bf16 %v5693_v4, %v5692_v3  ;;  %v5724_v5 = vld [vmem:[%s12392_s1 + $0xd50] sm:$0xff]  ;;  %v5725_v6 = vld [vmem:[%s12392_s1 + $0xd58] sm:$0xff] }
 0xb8b   : > { %v5712_v19 = vld [vmem:[%s12392_s1 + $0xcf0] sm:$0xff]  ;;  %v5697_v22 = vld [vmem:[%s12392_s1 + $0xc78] sm:$0xff] }
 0xb8c   : > { %2442 = vmatmul.mubr.f32.gmra.mrb[26].mxu1 %v2312_v27  ;;  %8791 = vmatprep.subr.bf16.mxu0 %v8790_v9  ;;  %v8838_v9 = vpack.c.bf16 %v5725_v6, %v5724_v5  ;;  %v5739_v5 = vld [vmem:[%s12392_s1 + $0xdb8] sm:$0xff]  ;;  %v5766_v18 = vld [vmem:[%s12392_s1 + $0xe90] sm:$0xff] }
 0xb8d   : > { %8757 = vmatpush3.bf16.msra.mxu1 %v8754_v24  ;;  %v5706_v24 = vld [vmem:[%s12392_s1 + $0xcc0] sm:$0xff]  ;;  %v5759_v0 = vld [vmem:[%s12392_s1 + $0xe58] sm:$0xff] }
 0xb8e   : > { %8759 = vmatprep.subr.bf16.mxu1 %v8758_v28  ;;  %8793 = vmatpush3.bf16.msra.mxu0 %v8792_v11  ;;  %v8802_v27 = vpack.c.bf16 %v5707_v25, %v5706_v24  ;;  %v5694_v11 = vld [vmem:[%s12392_s1 + $0xc60] sm:$0xff]  ;;  %v5728_v25 = vld [vmem:[%s12392_s1 + $0xd70] sm:$0xff] }
 0xb8f   : > { %8795 = vmatprep.subr.bf16.mxu0 %v8794_v16  ;;  %v8812_v16 = vpack.c.bf16 %v5695_v14, %v5694_v11  ;;  %v5740_v11 = vld [vmem:[%s12392_s1 + $0xdc0] sm:$0xff]  ;;  %v5741_v14 = vld [vmem:[%s12392_s1 + $0xdc8] sm:$0xff] }
 0xb91   : > { %8761 = vmatpush3.bf16.msra.mxu1 %v8758_v28  ;;  %v5690_v28 = vld [vmem:[%s12392_s1 + $0xc40] sm:$0xff] }
 0xb92   : > { %8763 = vmatprep.subr.bf16.mxu1 %v8762_v32  ;;  %8797 = vmatpush3.bf16.msra.mxu0 %v8796_v20  ;;  %v8804_v34 = vpack.c.bf16 %v5691_v30, %v5690_v28  ;;  %v5713_v20 = vld [vmem:[%s12392_s1 + $0xcf8] sm:$0xff]  ;;  %v5748_v28 = vld [vmem:[%s12392_s1 + $0xe00] sm:$0xff]  ;;  %v5749_v30 = vld [vmem:[%s12392_s1 + $0xe08] sm:$0xff] }
 0xb93   : > { %8799 = vmatprep.subr.bf16.mxu0 %v8798_v21  ;;  %v5696_v21 = vld [vmem:[%s12392_s1 + $0xc70] sm:$0xff]  ;;  %v8814_v23 = vpack.c.bf16 %v5713_v20, %v5712_v19  ;;  %v5767_v19 = vld [vmem:[%s12392_s1 + $0xe98] sm:$0xff] }
 0xb94   : > { %v8816_v24 = vpack.c.bf16 %v5697_v22, %v5696_v21  ;;  %v5742_v20 = vld [vmem:[%s12392_s1 + $0xdd0] sm:$0xff]  ;;  %v8886_v21 = vpack.c.bf16 %v5767_v19, %v5766_v18  ;;  %v5743_v22 = vld [vmem:[%s12392_s1 + $0xdd8] sm:$0xff] }
 0xb95   : > { %8765 = vmatpush3.bf16.msra.mxu1 %v8762_v32  ;;  %v5709_v32 = vld [vmem:[%s12392_s1 + $0xcd8] sm:$0xff] }
 0xb96   : > { %8767 = vmatprep.subr.bf16.mxu1 %v8766_v35  ;;  %8801 = vmatpush3.bf16.msra.mxu0 %v8800_v26  ;;  %v8806_v38 = vpack.c.bf16 %v5709_v32, %v5708_v31  ;;  %v5729_v26 = vld [vmem:[%s12392_s1 + $0xd78] sm:$0xff]  ;;  %v8850_v31 = vpack.c.bf16 %v5749_v30, %v5748_v28  ;;  %v5764_v32 = vld [vmem:[%s12392_s1 + $0xe80] sm:$0xff] }
 0xb97   : > { %8803 = vmatprep.subr.bf16.mxu0 %v8802_v27  ;;  %v8846_v27 = vpack.c.bf16 %v5729_v26, %v5728_v25  ;;  %v5761_v25 = vld [vmem:[%s12392_s1 + $0xe68] sm:$0xff]  ;;  %v5768_v26 = vld [vmem:[%s12392_s1 + $0xea0] sm:$0xff] }
 0xb99   : > { %8769 = vmatpush3.bf16.msra.mxu1 %v8766_v35  ;;  %v2630_v35 = vadd.s32 16, %v10251_v57 }
 0xb9a   : > { %8771 = vmatprep.subr.bf16.mxu1 %v8770_v29  ;;  %8805 = vmatpush3.bf16.msra.mxu0 %v8804_v34  ;;  %v5765_v34 = vld [vmem:[%s12392_s1 + $0xe88] sm:$0xff] }
 0xb9b   : > { %8807 = vmatprep.subr.bf16.mxu0 %v8806_v38  ;;  %v2632_v8 = vsub.s32 %v2630_v35, %v10253_v58  ;;  %v8882_v38 = vpack.c.bf16 %v5765_v34, %v5764_v32  ;;  %v5745_v32 = vld [vmem:[%s12392_s1 + $0xde8] sm:$0xff] }
 0xb9d   : > { %8773 = vmatpush3.bf16.msra.mxu1 %v8770_v29  ;;  %vm2634_vm9 = vcmp.ge.s32.totalorder %v2632_v8, 0  ;;  %vm2636_vm10 = vcmp.le.s32.totalorder %v2632_v8, 1  ;;  %v5733_v8 = vld [vmem:[%s12392_s1 + $0xd88] sm:$0xff] }
 0xb9e   : > { %8775 = vmatprep.subr.bf16.mxu1 %v8774_v39  ;;  %vm2638_vm11 = vmand %vm2634_vm9, %vm2636_vm10  ;;  %8809 = vmatpush3.bf16.msra.mxu0 %v8808_v56  ;;  %v5738_v56 = vld [vmem:[%s12392_s1 + $0xdb0] sm:$0xff] }
 0xb9f   : > { %8811 = vmatprep.subr.bf16.mxu0 %v8810_v15  ;;  %v8864_v6 = vpack.c.bf16 %v5739_v5, %v5738_v56  ;;  %v8868_v15 = vpack.c.bf16 %v5741_v14, %v5740_v11  ;;  %v2989_v56 = vld [vmem:[#allocation2 + $0x7] sm:$0xff]  ;;  %v5785_v11 = vld [vmem:[%s12394_s3 + $0x318] sm:$0xff] }
 0xba0   : > { %v2997_v14 = vmax.f32 %v2989_v56, 0.0 }
 0xba1   : > { %8777 = vmatpush3.bf16.msra.mxu1 %v8774_v39 }
 0xba2   : > { %8779 = vmatprep.subr.bf16.mxu1 %v8778_v42  ;;  %8813 = vmatpush3.bf16.msra.mxu0 %v8812_v16  ;;  %v5758_v16 = vld [vmem:[%s12392_s1 + $0xe50] sm:$0xff] }
 0xba3   : > { %8815 = vmatprep.subr.bf16.mxu0 %v8814_v23  ;;  %v8872_v23 = vpack.c.bf16 %v5743_v22, %v5742_v20 }
 0xba5   : > { %8781 = vmatpush3.bf16.msra.mxu1 %v8778_v42  ;;  %v2633_v42 = vsub.s32 %v2631_v17, %v10253_v58 }
 0xba6   : > { %8817 = vmatpush3.bf16.msra.mxu0 %v8816_v24  ;;  %v5760_v24 = vld [vmem:[%s12392_s1 + $0xe60] sm:$0xff] }
 0xba7   : > { %vm2635_vm12 = vcmp.ge.s32.totalorder %v2633_v42, 0  ;;  %vm2637_vm13 = vcmp.le.s32.totalorder %v2633_v42, 1  ;;  %8851 = vmatprep.subr.bf16.mxu0 %v8850_v31  ;;  %v8874_v28 = vpack.c.bf16 %v5761_v25, %v5760_v24  ;;  %v5744_v31 = vld [vmem:[%s12392_s1 + $0xde0] sm:$0xff]  ;;  %v5787_v24 = vld [vmem:[%s12394_s3 + $0x328] sm:$0xff] }
 0xba8   : > { %vm2639_vm14 = vmand %vm2635_vm12, %vm2637_vm13  ;;  %v8876_v34 = vpack.c.bf16 %v5745_v32, %v5744_v31 }
 0xc5b   : > { %v6595_v43 = vpop.f32.mrb[24].mxu1  ;;  %v7670_v44 = vpop.f32.mrb[22].mxu0 }
 0xc5c   : > { %v6596_v45 = vpop.f32.mrb[25].mxu1  ;;  %v2513_v48 = vpop.f32.mrb[23].mxu0 }
 0xc5d   : > { %v6597_v47 = vadd.f32 %v6596_v45, %v6595_v43  ;;  %v5714_v43 = vld [vmem:[%s12392_s1 + $0xd00] sm:$0xff] }
 0xc5f   : > { %v2439_v50 = vadd.f32 %v6597_v47, %v5659_v46  ;;  %v6598_v51 = vpop.f32.mrb[26].mxu1 }
 0xc60   : > { %v6599_v52 = vpop.f32.mrb[27].mxu1 }
 0xc61   : > { %v2514_v7 = vadd.f32 %v2513_v48, %v2439_v50  ;;  %v6600_v53 = vadd.f32 %v6599_v52, %v6598_v51  ;;  %v5717_v48 = vld [vmem:[%s12392_s1 + $0xd18] sm:$0xff]  ;;  %v9350_v50 = vld [vmem:[#allocation2 + $0x8] sm:$0xff]  ;;  %v5718_v52 = vld [vmem:[%s12392_s1 + $0xd20] sm:$0xff] }
 0xc62   : > { %v11128_v51 = vsel %vm2638_vm11, 1.0, %v9350_v50 }
 0xc63   : > { %v2522_v54 = vmax.f32 %v2514_v7, 0.0  ;;  %v2444_v55 = vadd.f32 %v6600_v53, %v5659_v46  ;;  %v5719_v7 = vld [vmem:[%s12392_s1 + $0xd28] sm:$0xff]  ;;  %v11140_v53 = vsel %vm2639_vm14, 1.0, %v9350_v50  ;;  %v5736_v50 = vld [vmem:[%s12392_s1 + $0xda0] sm:$0xff] }
 0xc65   : > { %v2519_v59 = vadd.f32 %v7670_v44, %v2444_v55  ;;  %7703 = vmatprep.mubr.f32.mxu1 %v2522_v54  ;;  %v5715_v44 = vld [vmem:[%s12392_s1 + $0xd08] sm:$0xff]  ;;  %v8826_v54 = vpack.c.bf16 %v5719_v7, %v5718_v52  ;;  %v5720_v55 = vld [vmem:[%s12392_s1 + $0xd30] sm:$0xff] }
 0xc66   : > { %v8818_v47 = vpack.c.bf16 %v5715_v44, %v5714_v43  ;;  %v5734_v43 = vld [vmem:[%s12392_s1 + $0xd90] sm:$0xff] }
 0xc67   : > { %v2523_v61 = vmax.f32 %v2519_v59, 0.0  ;;  %v5721_v59 = vld [vmem:[%s12392_s1 + $0xd38] sm:$0xff] }
 0xc69   : > { %7704 = vmatmul.mubr.f32.vlgmr.msra.gmra.mrb[28].mxu1 %v2523_v61  ;;  %v8830_v61 = vpack.c.bf16 %v5721_v59, %v5720_v55  ;;  %v5754_v59 = vld [vmem:[%s12392_s1 + $0xe30] sm:$0xff] }
 0xc6a   : > { %7710 = vmatprep.mubr.msk.f32.mxu1 %vm2642_vm8, %v10258_v60 }
 0xd3c   : > { %v7705_v29 = vpop.f32.mrb[28].mxu1 }
 0xd3d   : > { %v2621_v37 = vadd.f32 %v7705_v29, %v5677_v36  ;;  %v2615_v39 = vpop.f32.mrb[29].mxu1  ;;  %v5732_v29 = vld [vmem:[%s12392_s1 + $0xd80] sm:$0xff] }
 0xd3e   : > { %v2616_v40 = vadd.f32 %v5677_v36, %v2615_v39  ;;  %v5750_v39 = vld [vmem:[%s12392_s1 + $0xe10] sm:$0xff] }
 0xd3f   : > { %v2625_v41 = vadd.f32 %v2621_v37, %v10985_v12  ;;  %v5716_v12 = vld [vmem:[%s12392_s1 + $0xd10] sm:$0xff] }
 0xd40   : > { %v2624_v45 = vadd.f32 %v2616_v40, %v10988_v13  ;;  %v8822_v13 = vpack.c.bf16 %v5717_v48, %v5716_v12  ;;  %v5751_v40 = vld [vmem:[%s12392_s1 + $0xe18] sm:$0xff]  ;;  %v5753_v12 = vld [vmem:[%s12392_s1 + $0xe28] sm:$0xff] }
 0xd41   : > { %v8854_v42 = vpack.c.bf16 %v5751_v40, %v5750_v39  ;;  %v5747_v39 = vld [vmem:[%s12392_s1 + $0xdf8] sm:$0xff] }
 0xd42   : > { %v8782_v46 = vpack.c.bf16 %v2625_v41, %v2624_v45  ;;  %v8852_v41 = vpack.c.bf16 %v5733_v8, %v5732_v29  ;;  %v5746_v8 = vld [vmem:[%s12392_s1 + $0xdf0] sm:$0xff] }
 0xd43   : > { %v8880_v40 = vpack.c.bf16 %v5747_v39, %v5746_v8 }
 0xd44   : > { %8783 = vmatprep.subr.bf16.mxu1 %v8782_v46 }
 0xd45   : > { %8785 = vmatpush3.bf16.msra.mxu1 %v8782_v46  ;;  %v5735_v46 = vld [vmem:[%s12392_s1 + $0xd98] sm:$0xff] }
 0xd46   : > { %8819 = vmatprep.subr.bf16.mxu1 %v8818_v47  ;;  %v8856_v48 = vpack.c.bf16 %v5735_v46, %v5734_v43 }
 0xd48   : > { %7711 = vmatmul.mubr.msk.f32.vlgmr.msra.gmra.mrb[30].mxu1 %vm2642_vm8, %v10323_v33 }
 0xd49   : > { %7713 = vmatprep.mubr.msk.f32.mxu1 %vm2642_vm8, %v11128_v51  ;;  %8821 = vmatpush3.bf16.msra.mxu1 %v8818_v47  ;;  %v5752_v47 = vld [vmem:[%s12392_s1 + $0xe20] sm:$0xff] }
 0xd4a   : > { %8823 = vmatprep.subr.bf16.mxu1 %v8822_v13  ;;  %v8858_v7 = vpack.c.bf16 %v5753_v12, %v5752_v47  ;;  %v5776_v47 = vld [vmem:[%s12392_s1 + $0xee0] sm:$0xff]  ;;  %v5777_v12 = vld [vmem:[%s12392_s1 + $0xee8] sm:$0xff] }
 0xd4c   : > { %7714 = vmatmul.mubr.msk.f32.gmra.mrb[32].mxu1 %vm2642_vm8, %v11140_v53 }
 0xd4d   : > { %8825 = vmatpush3.bf16.msra.mxu1 %v8822_v13 }
 0xd4e   : > { %8827 = vmatprep.subr.bf16.mxu1 %v8826_v54 }
 0xd51   : > { %8829 = vmatpush3.bf16.msra.mxu1 %v8826_v54  ;;  %v5737_v54 = vld [vmem:[%s12392_s1 + $0xda8] sm:$0xff] }
 0xd52   : > { %8831 = vmatprep.subr.bf16.mxu1 %v8830_v61  ;;  %v8860_v63 = vpack.c.bf16 %v5737_v54, %v5736_v50  ;;  %v5778_v50 = vld [vmem:[%s12392_s1 + $0xef0] sm:$0xff]  ;;  %v5783_v54 = vld [vmem:[%s12394_s3 + $0x308] sm:$0xff] }
 0xd55   : > { %8833 = vmatpush3.bf16.msra.mxu1 %v8830_v61  ;;  %v5755_v61 = vld [vmem:[%s12392_s1 + $0xe38] sm:$0xff] }
 0xd56   : > { %8835 = vmatprep.subr.bf16.mxu1 %v8834_v2  ;;  %v8862_v3 = vpack.c.bf16 %v5755_v61, %v5754_v59 }
 0xd59   : > { %8837 = vmatpush3.bf16.msra.mxu1 %v8834_v2 }
 0xd5a   : > { %8839 = vmatprep.subr.bf16.mxu1 %v8838_v9 }
 0xd5d   : > { %8841 = vmatpush3.bf16.msra.mxu1 %v8838_v9  ;;  %v5757_v9 = vld [vmem:[%s12392_s1 + $0xe48] sm:$0xff] }
 0xd5e   : > { %8843 = vmatprep.subr.bf16.mxu1 %v8842_v1  ;;  %v8866_v10 = vpack.c.bf16 %v5757_v9, %v5756_v49 }
 0xd61   : > { %8845 = vmatpush3.bf16.msra.mxu1 %v8842_v1  ;;  %v8870_v1 = vpack.c.bf16 %v5759_v0, %v5758_v16 }
 0xd62   : > { %8847 = vmatprep.subr.bf16.mxu1 %v8846_v27 }
 0xd65   : > { %8849 = vmatpush3.bf16.msra.mxu1 %v8846_v27  ;;  %v5769_v27 = vld [vmem:[%s12392_s1 + $0xea8] sm:$0xff] }
 0xd66   : > { %8883 = vmatprep.subr.bf16.mxu1 %v8882_v38  ;;  %v8890_v30 = vpack.c.bf16 %v5769_v27, %v5768_v26 }
 0xe1b   : > { %v7712_v35 = vpop.f32.mrb[30].mxu1 }
 0xe1c   : > { %2739 = vst [vmem:[#allocation2 + $0x18] sm:$0xff] %v7712_v35  ;;  %v2719_v36 = vpop.f32.mrb[31].mxu1 }
 0xe1d   : > { %2738 = vst [vmem:[#allocation2 + $0x10] sm:$0xff] %v2719_v36  ;;  %2875 = vmatprep.mubr.f32.mxu0 %v2719_v36  ;;  %v5770_v36 = vld [vmem:[%s12392_s1 + $0xeb0] sm:$0xff] }
 0xe1f   : > { %v7715_v17 = vpop.f32.mrb[32].mxu1 }
 0xe20   : > { %2741 = vst [vmem:[#allocation2 + $0x28] sm:$0xff] %v7715_v17  ;;  %v2729_v37 = vpop.f32.mrb[33].mxu1 }
 0xe21   : > { %2740 = vst [vmem:[#allocation2 + $0x20] sm:$0xff] %v2729_v37 }
 0xe24   : > { %v2742_v44 = vld [vmem:[#allocation2 + $0xf] sm:$0xff]  ;;  %v2743_v52 = vld [vmem:[#allocation2 + $0x17] sm:$0xff] }
 0xe25   : > { %v2750_v45 = vld [vmem:[#allocation2 + $0x11] sm:$0xff]  ;;  %2876 = vmatmul.mubr.f32.vlgmr.msra.gmra.mrb[24].mxu0 %v2742_v44 }
 0xe26   : > { %7748 = vmatprep.mubr.f32.mxu1 %v2750_v45  ;;  %2880 = vmatprep.mubr.f32.mxu0 %v7712_v35  ;;  %v5763_v35 = vld [vmem:[%s12392_s1 + $0xe78] sm:$0xff]  ;;  %v5774_v44 = vld [vmem:[%s12392_s1 + $0xed0] sm:$0xff] }
 0xe27   : > { %8853 = vmatpush3.bf16.msra.mxu0 %v8852_v41  ;;  %v2753_v62 = vld [vmem:[#allocation2 + $0x29] sm:$0xff]  ;;  %v5772_v41 = vld [vmem:[%s12392_s1 + $0xec0] sm:$0xff]  ;;  %v5775_v45 = vld [vmem:[%s12392_s1 + $0xed8] sm:$0xff] }
 0xe28   : > { %8855 = vmatprep.subr.bf16.mxu0 %v8854_v42  ;;  %v2751_v13 = vld [vmem:[#allocation2 + $0x19] sm:$0xff]  ;;  %v2752_v55 = vld [vmem:[#allocation2 + $0x21] sm:$0xff]  ;;  %v8902_v46 = vpack.c.bf16 %v5775_v45, %v5774_v44 }
 0xe29   : > { %7749 = vmatmul.mubr.f32.vlgmr.msra.gmra.mrb[34].mxu1 %v2751_v13  ;;  %2881 = vmatmul.mubr.f32.gmra.mrb[26].mxu0 %v2743_v52  ;;  %v2744_v2 = vld [vmem:[#allocation2 + $0x1f] sm:$0xff]  ;;  %v2745_v4 = vld [vmem:[#allocation2 + $0x27] sm:$0xff] }
 0xe2a   : > { %7751 = vmatprep.mubr.f32.mxu1 %v2752_v55  ;;  %2885 = vmatprep.mubr.f32.mxu0 %v2729_v37  ;;  %v5773_v42 = vld [vmem:[%s12392_s1 + $0xec8] sm:$0xff]  ;;  %v5779_v13 = vld [vmem:[%s12392_s1 + $0xef8] sm:$0xff] }
 0xe2b   : > { %8857 = vmatpush3.bf16.msra.mxu0 %v8856_v48  ;;  %8885 = vmatpush3.bf16.msra.mxu1 %v8882_v38  ;;  %v5762_v38 = vld [vmem:[%s12392_s1 + $0xe70] sm:$0xff]  ;;  %v8898_v43 = vpack.c.bf16 %v5773_v42, %v5772_v41  ;;  %v8906_v48 = vpack.c.bf16 %v5777_v12, %v5776_v47  ;;  %v8910_v52 = vpack.c.bf16 %v5779_v13, %v5778_v50 }
 0xe2c   : > { %8859 = vmatprep.subr.bf16.mxu0 %v8858_v7  ;;  %8887 = vmatprep.subr.bf16.mxu1 %v8886_v21  ;;  %v8878_v29 = vpack.c.bf16 %v5763_v35, %v5762_v38  ;;  %v5782_v7 = vld [vmem:[%s12394_s3 + $0x300] sm:$0xff]  ;;  %v5789_v38 = vld [vmem:[%s12394_s3 + $0x338] sm:$0xff] }
 0xe2d   : > { %7752 = vmatmul.mubr.f32.gmra.mrb[36].mxu1 %v2753_v62  ;;  %2886 = vmatmul.mubr.f32.gmra.mrb[28].mxu0 %v2744_v2  ;;  %v8914_v55 = vpack.c.bf16 %v5783_v54, %v5782_v7  ;;  %v5731_v62 = vld [vmem:[%s12393_s2 + $0x8] ss:$0 sm:$0xff]  ;;  %v2996_v12 = vld [vmem:[#allocation2 + $0x31] sm:$0xff] }
 0xe2e   : > { %2890 = vmatprep.mubr.f32.mxu0 %v7715_v17  ;;  %v5771_v17 = vld [vmem:[%s12392_s1 + $0xeb8] sm:$0xff]  ;;  %v3008_v13 = vmax.f32 %v2996_v12, 0.0  ;;  %v5791_v7 = vld [vmem:[%s12394_s3 + $0x348] sm:$0xff] }
 0xe2f   : > { %8861 = vmatpush3.bf16.msra.mxu0 %v8860_v63  ;;  %8889 = vmatpush3.bf16.msra.mxu1 %v8886_v21  ;;  %v8894_v37 = vpack.c.bf16 %v5771_v17, %v5770_v36 }
 0xe30   : > { %8863 = vmatprep.subr.bf16.mxu0 %v8862_v3  ;;  %8891 = vmatprep.subr.bf16.mxu1 %v8890_v30 }
 0xe31   : > { %2891 = vmatmul.mubr.f32.gmra.mrb[30].mxu0 %v2745_v4 }
 0xe33   : > { %8865 = vmatpush3.bf16.msra.mxu0 %v8864_v6  ;;  %8893 = vmatpush3.bf16.msra.mxu1 %v8890_v30 }
 0xe34   : > { %8867 = vmatprep.subr.bf16.mxu0 %v8866_v10  ;;  %8895 = vmatprep.subr.bf16.mxu1 %v8894_v37  ;;  %v5784_v10 = vld [vmem:[%s12394_s3 + $0x310] sm:$0xff] }
 0xe35   : > { %v8918_v20 = vpack.c.bf16 %v5785_v11, %v5784_v10  ;;  %v5801_v11 = vld [vmem:[%s12392_s1 + $0xf08] sm:$0xff] }
 0xe37   : > { %8869 = vmatpush3.bf16.msra.mxu0 %v8868_v15  ;;  %8897 = vmatpush3.bf16.msra.mxu1 %v8894_v37 }
 0xe38   : > { %8871 = vmatprep.subr.bf16.mxu0 %v8870_v1  ;;  %8899 = vmatprep.subr.bf16.mxu1 %v8898_v43 }
 0xe3b   : > { %8873 = vmatpush3.bf16.msra.mxu0 %v8872_v23  ;;  %8901 = vmatpush3.bf16.msra.mxu1 %v8898_v43  ;;  %v5786_v23 = vld [vmem:[%s12394_s3 + $0x320] sm:$0xff] }
 0xe3c   : > { %8875 = vmatprep.subr.bf16.mxu0 %v8874_v28  ;;  %8903 = vmatprep.subr.bf16.mxu1 %v8902_v46  ;;  %v8922_v30 = vpack.c.bf16 %v5787_v24, %v5786_v23  ;;  %v5820_v24 = vld [vmem:[%s12392_s1 + $0xfa0] sm:$0xff] }
 0xe3f   : > { %8877 = vmatpush3.bf16.msra.mxu0 %v8876_v34  ;;  %8905 = vmatpush3.bf16.msra.mxu1 %v8902_v46  ;;  %v5788_v34 = vld [vmem:[%s12394_s3 + $0x330] sm:$0xff] }
 0xe40   : > { %8879 = vmatprep.subr.bf16.mxu0 %v8878_v29  ;;  %8907 = vmatprep.subr.bf16.mxu1 %v8906_v48  ;;  %v8926_v8 = vpack.c.bf16 %v5789_v38, %v5788_v34 }
 0xe43   : > { %8881 = vmatpush3.bf16.msra.mxu0 %v8880_v40  ;;  %8909 = vmatpush3.bf16.msra.mxu1 %v8906_v48 }
 0xe44   : > { %8911 = vmatprep.subr.bf16.mxu1 %v8910_v52  ;;  %8915 = vmatprep.subr.bf16.mxu0 %v8914_v55 }
 0xe47   : > { %8913 = vmatpush3.bf16.msra.mxu1 %v8910_v52  ;;  %v5790_v52 = vld [vmem:[%s12394_s3 + $0x340] sm:$0xff] }
 0xe48   : > { %v8930_v54 = vpack.c.bf16 %v5791_v7, %v5790_v52 }
 0xef8   : > { %v6675_v59 = vpop.f32.mrb[24].mxu0 }
 0xef9   : > { %v6676_v61 = vpop.f32.mrb[25].mxu0 }
 0xefa   : > { %v6677_v63 = vadd.f32 %v6676_v61, %v6675_v59  ;;  %v5793_v59 = vld [vmem:[%s12394_s3 + $0x358] sm:$0xff] }
 0xefc   : > { %v7750_v2 = vpop.f32.mrb[34].mxu1  ;;  %v6678_v3 = vpop.f32.mrb[26].mxu0  ;;  %v2878_v4 = vadd.f32 %v6677_v63, %v5731_v62  ;;  %v5795_v63 = vld [vmem:[%s12394_s3 + $0x368] sm:$0xff] }
 0xefd   : > { %v2962_v5 = vpop.f32.mrb[35].mxu1  ;;  %v6679_v6 = vpop.f32.mrb[27].mxu0 }
 0xefe   : > { %v11357_v49 = vadd.f32 %v2962_v5, %v2878_v4  ;;  %v6680_v9 = vadd.f32 %v6679_v6, %v6678_v3  ;;  %v5796_v3 = vld [vmem:[%s12394_s3 + $0x370] sm:$0xff]  ;;  %v5797_v4 = vld [vmem:[%s12394_s3 + $0x378] sm:$0xff]  ;;  %v5816_v5 = vld [vmem:[%s12392_s1 + $0xf80] sm:$0xff] }
 0xeff   : > { %v8942_v56 = vpack.c.bf16 %v5797_v4, %v5796_v3  ;;  %v5817_v6 = vld [vmem:[%s12392_s1 + $0xf88] sm:$0xff] }
 0xf00   : > { %2981 = vst [vmem:[#allocation2 + $0x10] sm:$0xff] %v11357_v49  ;;  %v2883_v15 = vadd.f32 %v6680_v9, %v5731_v62  ;;  %v7753_v16 = vpop.f32.mrb[36].mxu1  ;;  %v6681_v0 = vpop.f32.mrb[28].mxu0  ;;  %v2998_v18 = vmax.f32 %v11357_v49, 0.0  ;;  %v5800_v9 = vld [vmem:[%s12392_s1 + $0xf00] sm:$0xff]  ;;  %v8946_v10 = vpack.c.bf16 %v5817_v6, %v5816_v5 }
 0xf01   : > { %v2972_v19 = vpop.f32.mrb[37].mxu1  ;;  %v6682_v1 = vpop.f32.mrb[29].mxu0 }
 0xf02   : > { %v11367_v21 = vadd.f32 %v7750_v2, %v2883_v15  ;;  %v6683_v22 = vadd.f32 %v6682_v1, %v6681_v0  ;;  %3130 = vmatprep.mubr.f32.mxu0 %v2998_v18  ;;  %v5833_v15 = vld [vmem:[%s12392_s1 + $0x1008] sm:$0xff]  ;;  %v5818_v18 = vld [vmem:[%s12392_s1 + $0xf90] sm:$0xff]  ;;  %8947 = vmatprep.subr.bf16.mxu1 %v8946_v10  ;;  %v5836_v10 = vld [vmem:[%s12392_s1 + $0x1020] sm:$0xff] }
 0xf03   : > { %3131 = vmatmul.mubr.f32.vlgmr.msra.gmra.mrb[32].mxu0 %v2997_v14  ;;  %v5832_v14 = vld [vmem:[%s12392_s1 + $0x1000] sm:$0xff]  ;;  %v5802_v1 = vld [vmem:[%s12392_s1 + $0xf10] sm:$0xff] }
 0xf04   : > { %2982 = vst [vmem:[#allocation2 + $0x18] sm:$0xff] %v11367_v21  ;;  %v2888_v25 = vadd.f32 %v6683_v22, %v5731_v62  ;;  %v6684_v26 = vpop.f32.mrb[30].mxu0  ;;  %v3001_v27 = vmax.f32 %v11367_v21, 0.0  ;;  %8917 = vmatpush3.bf16.msra.mxu0 %v8914_v55  ;;  %v5792_v55 = vld [vmem:[%s12394_s3 + $0x350] sm:$0xff]  ;;  %v8978_v0 = vpack.c.bf16 %v5833_v15, %v5832_v14  ;;  %v5803_v22 = vld [vmem:[%s12392_s1 + $0xf18] sm:$0xff] }
 0xf05   : > { %v6685_v28 = vpop.f32.mrb[31].mxu0  ;;  %8919 = vmatprep.subr.bf16.mxu0 %v8918_v20  ;;  %v8934_v61 = vpack.c.bf16 %v5793_v59, %v5792_v55  ;;  %v8952_v23 = vpack.c.bf16 %v5803_v22, %v5802_v1  ;;  %v5834_v59 = vld [vmem:[%s12392_s1 + $0x1010] sm:$0xff]  ;;  %v5808_v22 = vld [vmem:[%s12392_s1 + $0xf40] sm:$0xff] }
 0xf06   : > { %v11377_v31 = vadd.f32 %v2972_v19, %v2888_v25  ;;  %v6686_v32 = vadd.f32 %v6685_v28, %v6684_v26  ;;  %3135 = vmatprep.mubr.f32.mxu0 %v3001_v27  ;;  %v5819_v19 = vld [vmem:[%s12392_s1 + $0xf98] sm:$0xff]  ;;  %v5821_v25 = vld [vmem:[%s12392_s1 + $0xfa8] sm:$0xff]  ;;  %v5804_v27 = vld [vmem:[%s12392_s1 + $0xf20] sm:$0xff] }
 0xf07   : > { %v2990_v35 = vld [vmem:[#allocation2 + $0xf] sm:$0xff]  ;;  %v8954_v26 = vpack.c.bf16 %v5821_v25, %v5820_v24 }
 0xf08   : > { %2983 = vst [vmem:[#allocation2 + $0x20] sm:$0xff] %v11377_v31  ;;  %v2893_v36 = vadd.f32 %v6686_v32, %v5731_v62  ;;  %v3000_v17 = vmax.f32 %v2990_v35, 0.0  ;;  %v3004_v29 = vmax.f32 %v11377_v31, 0.0  ;;  %8921 = vmatpush3.bf16.msra.mxu0 %v8918_v20  ;;  %v5794_v62 = vld [vmem:[%s12394_s3 + $0x360] sm:$0xff]  ;;  %v8950_v20 = vpack.c.bf16 %v5819_v19, %v5818_v18  ;;  %v5805_v28 = vld [vmem:[%s12392_s1 + $0xf28] sm:$0xff]  ;;  %v5823_v32 = vld [vmem:[%s12392_s1 + $0xfb8] sm:$0xff] }
 0xf09   : > { %8923 = vmatprep.subr.bf16.mxu0 %v8922_v30  ;;  %v8938_v2 = vpack.c.bf16 %v5795_v63, %v5794_v62  ;;  %v8956_v34 = vpack.c.bf16 %v5805_v28, %v5804_v27  ;;  %v5806_v35 = vld [vmem:[%s12392_s1 + $0xf30] sm:$0xff]  ;;  %v5839_v19 = vld [vmem:[%s12392_s1 + $0x1038] sm:$0xff]  ;;  %v5841_v27 = vld [vmem:[%s12392_s1 + $0x1048] sm:$0xff] }
 0xf0a   : > { %v11387_v37 = vadd.f32 %v7753_v16, %v2893_v36  ;;  %3136 = vmatmul.mubr.f32.gmra.mrb[34].mxu0 %v3000_v17  ;;  %v8948_v16 = vpack.c.bf16 %v5801_v11, %v5800_v9  ;;  %v5807_v36 = vld [vmem:[%s12392_s1 + $0xf38] sm:$0xff]  ;;  %v5837_v11 = vld [vmem:[%s12392_s1 + $0x1028] sm:$0xff]  ;;  %v5838_v18 = vld [vmem:[%s12392_s1 + $0x1030] sm:$0xff] }
 0xf0b   : > { %3140 = vmatprep.mubr.f32.mxu0 %v3004_v29  ;;  %v2991_v39 = vld [vmem:[#allocation2 + $0x17] sm:$0xff]  ;;  %v8960_v17 = vpack.c.bf16 %v5807_v36, %v5806_v35  ;;  %v8990_v1 = vpack.c.bf16 %v5839_v19, %v5838_v18 }
 0xf0c   : > { %2984 = vst [vmem:[#allocation2 + $0x28] sm:$0xff] %v11387_v37  ;;  %v3003_v40 = vmax.f32 %v2991_v39, 0.0  ;;  %v3007_v41 = vmax.f32 %v11387_v37, 0.0  ;;  %8925 = vmatpush3.bf16.msra.mxu0 %v8922_v30  ;;  %v5822_v30 = vld [vmem:[%s12392_s1 + $0xfb0] sm:$0xff] }
 0xf0d   : > { %8927 = vmatprep.subr.bf16.mxu0 %v8926_v8  ;;  %v8958_v38 = vpack.c.bf16 %v5823_v32, %v5822_v30  ;;  %v5826_v28 = vld [vmem:[%s12392_s1 + $0xfd0] sm:$0xff]  ;;  %v5827_v32 = vld [vmem:[%s12392_s1 + $0xfd8] sm:$0xff] }
 0xf0e   : > { %3141 = vmatmul.mubr.f32.gmra.mrb[36].mxu0 %v3003_v40  ;;  %v8966_v35 = vpack.c.bf16 %v5827_v32, %v5826_v28 }
 0xf0f   : > { %v2993_v42 = vld [vmem:[#allocation2 + $0x19] sm:$0xff]  ;;  %3145 = vmatprep.mubr.f32.mxu0 %v3007_v41 }
 0xf10   : > { %v2992_v43 = vld [vmem:[#allocation2 + $0x1f] sm:$0xff]  ;;  %v2999_v44 = vmax.f32 %v2993_v42, 0.0  ;;  %8929 = vmatpush3.bf16.msra.mxu0 %v8926_v8 }
 0xf11   : > { %v3006_v45 = vmax.f32 %v2992_v43, 0.0  ;;  %8931 = vmatprep.subr.bf16.mxu0 %v8930_v54 }
 0xf12   : > { %7786 = vmatprep.mubr.f32.mxu1 %v2999_v44 }
 0xf13   : > { %3146 = vmatmul.mubr.f32.gmra.mrb[38].mxu0 %v3006_v45  ;;  %v2994_v46 = vld [vmem:[#allocation2 + $0x21] sm:$0xff]  ;;  %v2995_v47 = vld [vmem:[#allocation2 + $0x29] sm:$0xff] }
 0xf14   : > { %v3002_v48 = vmax.f32 %v2994_v46, 0.0  ;;  %v3005_v50 = vmax.f32 %v2995_v47, 0.0  ;;  %8933 = vmatpush3.bf16.msra.mxu0 %v8930_v54  ;;  %v5781_v46 = vld [vmem:[%s12393_s2 + $0x9] ss:$0 sm:$0xff] }
 0xf15   : > { %8935 = vmatprep.subr.bf16.mxu0 %v8934_v61 }
 0xf16   : > { %7787 = vmatmul.mubr.f32.vlgmr.msra.gmra.mrb[38].mxu1 %v3002_v48 }
 0xf17   : > { %7789 = vmatprep.mubr.f32.mxu1 %v3005_v50  ;;  %8949 = vmatpush3.bf16.msra.mxu1 %v8948_v16  ;;  %v8986_v16 = vpack.c.bf16 %v5837_v11, %v5836_v10 }
 0xf18   : > { %8937 = vmatpush3.bf16.msra.mxu0 %v8934_v61  ;;  %8951 = vmatprep.subr.bf16.mxu1 %v8950_v20  ;;  %v5835_v61 = vld [vmem:[%s12392_s1 + $0x1018] sm:$0xff]  ;;  %v5825_v20 = vld [vmem:[%s12392_s1 + $0xfc8] sm:$0xff] }
 0xf19   : > { %8939 = vmatprep.subr.bf16.mxu0 %v8938_v2  ;;  %v8982_v6 = vpack.c.bf16 %v5835_v61, %v5834_v59  ;;  %v5850_v61 = vld [vmem:[%s12394_s3 + $0x380] sm:$0xff] }
 0xf1a   : > { %7790 = vmatmul.mubr.f32.gmra.mrb[40].mxu1 %v3008_v13 }
 0xf1b   : > { %8953 = vmatpush3.bf16.msra.mxu1 %v8952_v23  ;;  %v5809_v23 = vld [vmem:[%s12392_s1 + $0xf48] sm:$0xff] }
 0xf1c   : > { %8941 = vmatpush3.bf16.msra.mxu0 %v8938_v2  ;;  %8955 = vmatprep.subr.bf16.mxu1 %v8954_v26  ;;  %v8964_v25 = vpack.c.bf16 %v5809_v23, %v5808_v22  ;;  %v5840_v26 = vld [vmem:[%s12392_s1 + $0x1040] sm:$0xff] }
 0xf1d   : > { %8943 = vmatprep.subr.bf16.mxu0 %v8942_v56  ;;  %v8994_v30 = vpack.c.bf16 %v5841_v27, %v5840_v26 }
 0xf1f   : > { %8957 = vmatpush3.bf16.msra.mxu1 %v8956_v34  ;;  %v5810_v34 = vld [vmem:[%s12392_s1 + $0xf50] sm:$0xff] }
 0xf20   : > { %8945 = vmatpush3.bf16.msra.mxu0 %v8942_v56  ;;  %8959 = vmatprep.subr.bf16.mxu1 %v8958_v38  ;;  %v5811_v38 = vld [vmem:[%s12392_s1 + $0xf58] sm:$0xff] }
 0xf21   : > { %8979 = vmatprep.subr.bf16.mxu0 %v8978_v0  ;;  %v8968_v36 = vpack.c.bf16 %v5811_v38, %v5810_v34 }
 0xf23   : > { %8961 = vmatpush3.bf16.msra.mxu1 %v8960_v17  ;;  %v5842_v17 = vld [vmem:[%s12392_s1 + $0x1050] sm:$0xff] }
 0xfd6   : > { %v6739_v29 = vpop.f32.mrb[32].mxu0 }
 0xfd7   : > { %v6740_v8 = vpop.f32.mrb[33].mxu0 }
 0xfd8   : > { %v6741_v39 = vadd.f32 %v6740_v8, %v6739_v29  ;;  %v5843_v29 = vld [vmem:[%s12392_s1 + $0x1058] sm:$0xff]  ;;  %v5828_v8 = vld [vmem:[%s12392_s1 + $0xfe0] sm:$0xff] }
 0xfda   : > { %v3133_v52 = vadd.f32 %v6741_v39, %v5781_v46  ;;  %v8998_v39 = vpack.c.bf16 %v5843_v29, %v5842_v17  ;;  %v5856_v17 = vld [vmem:[%s12394_s3 + $0x3b0] sm:$0xff]  ;;  %v5857_v29 = vld [vmem:[%s12394_s3 + $0x3b8] sm:$0xff] }
 0xfdd   : > { %v6742_v40 = vpop.f32.mrb[34].mxu0 }
 0xfde   : > { %v6743_v41 = vpop.f32.mrb[35].mxu0 }
 0xfdf   : > { %v6744_v42 = vadd.f32 %v6743_v41, %v6742_v40  ;;  %v5829_v40 = vld [vmem:[%s12392_s1 + $0xfe8] sm:$0xff]  ;;  %v5812_v41 = vld [vmem:[%s12392_s1 + $0xf60] sm:$0xff] }
 0xfe1   : > { %v6745_v43 = vpop.f32.mrb[36].mxu0  ;;  %v3138_v50 = vadd.f32 %v6744_v42, %v5781_v46  ;;  %v5813_v42 = vld [vmem:[%s12392_s1 + $0xf68] sm:$0xff] }
 0xfe2   : > { %v6746_v44 = vpop.f32.mrb[37].mxu0 }
 0xfe3   : > { %v6747_v45 = vadd.f32 %v6746_v44, %v6745_v43  ;;  %v8970_v43 = vpack.c.bf16 %v5829_v40, %v5828_v8  ;;  %v8972_v44 = vpack.c.bf16 %v5813_v42, %v5812_v41  ;;  %v9022_v42 = vpack.c.bf16 %v5857_v29, %v5856_v17 }
 0xfe5   : > { %v3143_v3 = vadd.f32 %v6747_v45, %v5781_v46  ;;  %v5844_v45 = vld [vmem:[%s12392_s1 + $0x1060] sm:$0xff] }
 0xfe6   : > { %v6748_v47 = vpop.f32.mrb[38].mxu0 }
 0xfe7   : > { %v6749_v12 = vpop.f32.mrb[39].mxu0 }
 0xfe8   : > { %v6750_v48 = vadd.f32 %v6749_v12, %v6748_v47  ;;  %v5830_v47 = vld [vmem:[%s12392_s1 + $0xff0] sm:$0xff] }
 0xfe9   : > { %v7788_v13 = vpop.f32.mrb[38].mxu1 }
 0xfea   : > { %v3223_v7 = vadd.f32 %v7788_v13, %v3138_v50  ;;  %v3217_v54 = vpop.f32.mrb[39].mxu1  ;;  %v3148_v62 = vadd.f32 %v6750_v48, %v5781_v46  ;;  %v5845_v46 = vld [vmem:[%s12392_s1 + $0x1068] sm:$0xff]  ;;  %v5831_v48 = vld [vmem:[%s12392_s1 + $0xff8] sm:$0xff]  ;;  %v5814_v50 = vld [vmem:[%s12392_s1 + $0xf70] sm:$0xff] }
 0xfeb   : > { %v3218_v55 = vadd.f32 %v3217_v54, %v3133_v52  ;;  %v9002_v12 = vpack.c.bf16 %v5845_v46, %v5844_v45  ;;  %v5815_v13 = vld [vmem:[%s12392_s1 + $0xf78] sm:$0xff]  ;;  %v8974_v52 = vpack.c.bf16 %v5831_v48, %v5830_v47  ;;  %v5846_v54 = vld [vmem:[%s12392_s1 + $0x1070] sm:$0xff] }
 0xfec   : > { %v3237_v4 = vmax.f32 %v3223_v7, 0.0  ;;  %v8976_v7 = vpack.c.bf16 %v5815_v13, %v5814_v50  ;;  %v5860_v47 = vld [vmem:[%s12394_s3 + $0x3d0] sm:$0xff]  ;;  %v5862_v50 = vld [vmem:[%s12394_s3 + $0x3e0] sm:$0xff]  ;;  %v5863_v13 = vld [vmem:[%s12394_s3 + $0x3e8] sm:$0xff] }
 0xfed   : > { %v3236_v63 = vmax.f32 %v3218_v55, 0.0  ;;  %v7791_v2 = vpop.f32.mrb[40].mxu1  ;;  %v5847_v55 = vld [vmem:[%s12392_s1 + $0x1078] sm:$0xff] }
 0xfee   : > { %v3233_v56 = vadd.f32 %v7791_v2, %v3148_v62  ;;  %v3227_v5 = vpop.f32.mrb[41].mxu1  ;;  %v9006_v59 = vpack.c.bf16 %v5847_v55, %v5846_v54  ;;  %v5851_v62 = vld [vmem:[%s12394_s3 + $0x388] sm:$0xff]  ;;  %v5799_v2 = vld [vmem:[%s12395_s4 + $0x6] ss:$0 sm:$0xff]  ;;  %v5865_v54 = vld [vmem:[%s12394_s3 + $0x3f8] sm:$0xff] }
 0xfef   : > { %v3228_v9 = vadd.f32 %v3227_v5, %v3143_v3  ;;  %7824 = vmatprep.mubr.f32.mxu0 %v3236_v63  ;;  %v9010_v63 = vpack.c.bf16 %v5851_v62, %v5850_v61  ;;  %v5885_v61 = vld [vmem:[%s12392_s1 + $0x1108] sm:$0xff]  ;;  %v5868_v62 = vld [vmem:[%s12392_s1 + $0x1080] sm:$0xff] }
 0xff0   : > { %7825 = vmatmul.mubr.f32.vlgmr.msra.gmra.mrb[40].mxu0 %v3237_v4  ;;  %v3239_v15 = vmax.f32 %v3233_v56, 0.0 }
 0xff1   : > { %v3238_v14 = vmax.f32 %v3228_v9, 0.0  ;;  %8981 = vmatpush3.bf16.msra.mxu0 %v8978_v0  ;;  %v5824_v0 = vld [vmem:[%s12392_s1 + $0xfc0] sm:$0xff] }
 0xff2   : > { %8983 = vmatprep.subr.bf16.mxu0 %v8982_v6  ;;  %v8962_v24 = vpack.c.bf16 %v5825_v20, %v5824_v0 }
 0xff3   : > { %7827 = vmatprep.mubr.f32.mxu0 %v3238_v14 }
 0xff4   : > { %7828 = vmatmul.mubr.f32.gmra.mrb[42].mxu0 %v3239_v15  ;;  %8963 = vmatprep.subr.bf16.mxu1 %v8962_v24  ;;  %v5854_v24 = vld [vmem:[%s12394_s3 + $0x3a0] sm:$0xff] }
 0xff5   : > { %8985 = vmatpush3.bf16.msra.mxu0 %v8982_v6  ;;  %8965 = vmatpush3.bf16.msra.mxu1 %v8964_v25  ;;  %v5855_v25 = vld [vmem:[%s12394_s3 + $0x3a8] sm:$0xff] }
 0xff6   : > { %8987 = vmatprep.subr.bf16.mxu0 %v8986_v16  ;;  %8967 = vmatprep.subr.bf16.mxu1 %v8966_v35 }
 0xff9   : > { %8989 = vmatpush3.bf16.msra.mxu0 %v8986_v16  ;;  %8969 = vmatpush3.bf16.msra.mxu1 %v8968_v36  ;;  %v9018_v36 = vpack.c.bf16 %v5855_v25, %v5854_v24  ;;  %v5874_v25 = vld [vmem:[%s12392_s1 + $0x10b0] sm:$0xff] }
 0xffa   : > { %8991 = vmatprep.subr.bf16.mxu0 %v8990_v1  ;;  %8971 = vmatprep.subr.bf16.mxu1 %v8970_v43  ;;  %v5858_v43 = vld [vmem:[%s12394_s3 + $0x3c0] sm:$0xff] }
 0xffd   : > { %8993 = vmatpush3.bf16.msra.mxu0 %v8990_v1  ;;  %8973 = vmatpush3.bf16.msra.mxu1 %v8972_v44  ;;  %v5859_v44 = vld [vmem:[%s12394_s3 + $0x3c8] sm:$0xff] }
 0xffe   : > { %8995 = vmatprep.subr.bf16.mxu0 %v8994_v30  ;;  %8975 = vmatprep.subr.bf16.mxu1 %v8974_v52  ;;  %v9026_v46 = vpack.c.bf16 %v5859_v44, %v5858_v43  ;;  %v9034_v52 = vpack.c.bf16 %v5863_v13, %v5862_v50 }
0x1001   : > { %8997 = vmatpush3.bf16.msra.mxu0 %v8994_v30  ;;  %8977 = vmatpush3.bf16.msra.mxu1 %v8976_v7  ;;  %v5864_v7 = vld [vmem:[%s12394_s3 + $0x3f0] sm:$0xff] }
0x1002   : > { %8999 = vmatprep.subr.bf16.mxu0 %v8998_v39  ;;  %9011 = vmatprep.subr.bf16.mxu1 %v9010_v63  ;;  %v9038_v55 = vpack.c.bf16 %v5865_v54, %v5864_v7 }
0x1005   : > { %9001 = vmatpush3.bf16.msra.mxu0 %v8998_v39 }
0x1006   : > { %9003 = vmatprep.subr.bf16.mxu0 %v9002_v12 }
0x1009   : > { %9005 = vmatpush3.bf16.msra.mxu0 %v9002_v12  ;;  %v5861_v12 = vld [vmem:[%s12394_s3 + $0x3d8] sm:$0xff] }
0x100a   : > { %9007 = vmatprep.subr.bf16.mxu0 %v9006_v59  ;;  %v9030_v48 = vpack.c.bf16 %v5861_v12, %v5860_v47  ;;  %v5903_v47 = vld [vmem:[%s12392_s1 + $0x1198] sm:$0xff] }
0x100d   : > { %9009 = vmatpush3.bf16.msra.mxu0 %v9006_v59  ;;  %v5884_v59 = vld [vmem:[%s12392_s1 + $0x1100] sm:$0xff] }
0x10c3   : > { %v7826_v3 = vpop.f32.mrb[40].mxu0 }
0x10c4   : > { %v3337_v4 = vadd.f32 %v7826_v3, %v5799_v2  ;;  %v3331_v56 = vpop.f32.mrb[41].mxu0  ;;  %v5886_v3 = vld [vmem:[%s12392_s1 + $0x1110] sm:$0xff] }
0x10c5   : > { %v3332_v5 = vadd.f32 %v5799_v2, %v3331_v56 }
0x10c6   : > { %v11572_v6 = vadd.f32 %v3337_v4, %v11367_v21  ;;  %v5853_v21 = vld [vmem:[%s12394_s3 + $0x398] sm:$0xff] }
0x10c7   : > { %v11575_v9 = vadd.f32 %v3332_v5, %v11357_v49  ;;  %v7829_v10 = vpop.f32.mrb[42].mxu0  ;;  %v5852_v49 = vld [vmem:[%s12394_s3 + $0x390] sm:$0xff]  ;;  %v5887_v4 = vld [vmem:[%s12392_s1 + $0x1118] sm:$0xff] }
0x10c8   : > { %3355 = vst [vmem:[#allocation2 + $0x18] sm:$0xff] %v11572_v6  ;;  %v3347_v11 = vadd.f32 %v7829_v10, %v5799_v2  ;;  %v3341_v14 = vpop.f32.mrb[43].mxu0  ;;  %v9014_v22 = vpack.c.bf16 %v5853_v21, %v5852_v49  ;;  %v9046_v5 = vpack.c.bf16 %v5887_v4, %v5886_v3  ;;  %v5870_v10 = vld [vmem:[%s12392_s1 + $0x1090] sm:$0xff]  ;;  %v5889_v49 = vld [vmem:[%s12392_s1 + $0x1128] sm:$0xff]  ;;  %v5904_v3 = vld [vmem:[%s12392_s1 + $0x11a0] sm:$0xff] }
0x10c9   : > { %3354 = vst [vmem:[#allocation2 + $0x10] sm:$0xff] %v11575_v9  ;;  %v3342_v15 = vadd.f32 %v5799_v2, %v3341_v14  ;;  %v3371_v16 = vmax.f32 %v11575_v9, 0.0  ;;  %v5869_v2 = vld [vmem:[%s12392_s1 + $0x1088] sm:$0xff]  ;;  %v5900_v14 = vld [vmem:[%s12392_s1 + $0x1180] sm:$0xff] }
0x10ca   : > { %v11581_v18 = vadd.f32 %v3347_v11, %v11387_v37  ;;  %v9044_v56 = vpack.c.bf16 %v5869_v2, %v5868_v62  ;;  %v5871_v11 = vld [vmem:[%s12392_s1 + $0x1098] sm:$0xff]  ;;  %v5905_v4 = vld [vmem:[%s12392_s1 + $0x11a8] sm:$0xff] }
0x10cb   : > { %v11584_v19 = vadd.f32 %v3342_v15, %v11377_v31  ;;  %3503 = vmatprep.mubr.f32.mxu1 %v3371_v16  ;;  %v3374_v31 = vmax.f32 %v11572_v6, 0.0  ;;  %v5901_v15 = vld [vmem:[%s12392_s1 + $0x1188] sm:$0xff]  ;;  %v5888_v16 = vld [vmem:[%s12392_s1 + $0x1120] sm:$0xff]  ;;  %v9048_v21 = vpack.c.bf16 %v5871_v11, %v5870_v10 }
0x10cc   : > { %3357 = vst [vmem:[#allocation2 + $0x28] sm:$0xff] %v11581_v18  ;;  %v3380_v40 = vmax.f32 %v11581_v18, 0.0  ;;  %v5893_v10 = vld [vmem:[%s12392_s1 + $0x1148] sm:$0xff]  ;;  %v5876_v11 = vld [vmem:[%s12392_s1 + $0x10c0] sm:$0xff] }
0x10cd   : > { %3356 = vst [vmem:[#allocation2 + $0x20] sm:$0xff] %v11584_v19  ;;  %v3377_v34 = vmax.f32 %v11584_v19, 0.0 }
0x10d0   : > { %v3366_v0 = vld [vmem:[#allocation2 + $0x13] sm:$0xff] }
0x10d1   : > { %v3362_v1 = vld [vmem:[#allocation2 + $0xd] sm:$0xff]  ;;  %v3372_v37 = vmax.f32 %v3366_v0, 0.0  ;;  %v3363_v23 = vld [vmem:[#allocation2 + $0x15] sm:$0xff]  ;;  %v9074_v0 = vpack.c.bf16 %v5901_v15, %v5900_v14 }
0x10d2   : > { %v3370_v20 = vmax.f32 %v3362_v1, 0.0  ;;  %v3373_v30 = vmax.f32 %v3363_v23, 0.0  ;;  %v9050_v1 = vpack.c.bf16 %v5889_v49, %v5888_v16  ;;  %v5877_v14 = vld [vmem:[%s12392_s1 + $0x10c8] sm:$0xff]  ;;  %v5906_v49 = vld [vmem:[%s12392_s1 + $0x11b0] sm:$0xff] }
0x10d3   : > { %7862 = vmatprep.mubr.f32.mxu0 %v3372_v37  ;;  %v3369_v38 = vld [vmem:[#allocation2 + $0x2b] sm:$0xff]  ;;  %v5872_v37 = vld [vmem:[%s12392_s1 + $0x10a0] sm:$0xff]  ;;  %v9060_v16 = vpack.c.bf16 %v5877_v14, %v5876_v11 }
0x10d4   : > { %3504 = vmatmul.mubr.f32.vlgmr.msra.gmra.mrb[42].mxu1 %v3370_v20  ;;  %v3367_v26 = vld [vmem:[#allocation2 + $0x1b] sm:$0xff]  ;;  %v3368_v27 = vld [vmem:[#allocation2 + $0x23] sm:$0xff]  ;;  %v3381_v8 = vmax.f32 %v3369_v38, 0.0 }
0x10d5   : > { %3508 = vmatprep.mubr.f32.mxu1 %v3374_v31  ;;  %9013 = vmatpush3.bf16.msra.mxu1 %v9010_v63  ;;  %v3375_v28 = vmax.f32 %v3367_v26, 0.0  ;;  %v3378_v32 = vmax.f32 %v3368_v27, 0.0  ;;  %v3364_v35 = vld [vmem:[#allocation2 + $0x1d] sm:$0xff]  ;;  %v3365_v41 = vld [vmem:[#allocation2 + $0x25] sm:$0xff]  ;;  %v9042_v63 = vpack.c.bf16 %v5885_v61, %v5884_v59 }
0x10d6   : > { %9015 = vmatprep.subr.bf16.mxu1 %v9014_v22  ;;  %v3376_v39 = vmax.f32 %v3364_v35, 0.0  ;;  %v3379_v45 = vmax.f32 %v3365_v41, 0.0  ;;  %v5873_v20 = vld [vmem:[%s12392_s1 + $0x10a8] sm:$0xff]  ;;  %v5891_v31 = vld [vmem:[%s12392_s1 + $0x1138] sm:$0xff] }
0x10d7   : > { %7863 = vmatmul.mubr.f32.vlgmr.msra.gmra.mrb[44].mxu0 %v3375_v28  ;;  %9043 = vmatprep.subr.bf16.mxu0 %v9042_v63  ;;  %v9052_v23 = vpack.c.bf16 %v5873_v20, %v5872_v37  ;;  %v5875_v26 = vld [vmem:[%s12392_s1 + $0x10b8] sm:$0xff]  ;;  %v5878_v20 = vld [vmem:[%s12392_s1 + $0x10d0] sm:$0xff] }
0x10d8   : > { %3509 = vmatmul.mubr.f32.gmra.mrb[44].mxu1 %v3373_v30  ;;  %7865 = vmatprep.mubr.f32.mxu0 %v3378_v32  ;;  %v9056_v27 = vpack.c.bf16 %v5875_v26, %v5874_v25  ;;  %v5849_v32 = vld [vmem:[%s12393_s2 + $0xa] ss:$0 sm:$0xff]  ;;  %v5895_v37 = vld [vmem:[%s12392_s1 + $0x1158] sm:$0xff]  ;;  %v5896_v26 = vld [vmem:[%s12392_s1 + $0x1160] sm:$0xff] }
0x10d9   : > { %3513 = vmatprep.mubr.f32.mxu1 %v3377_v34  ;;  %9017 = vmatpush3.bf16.msra.mxu1 %v9014_v22  ;;  %v5890_v22 = vld [vmem:[%s12392_s1 + $0x1130] sm:$0xff]  ;;  %v5909_v25 = vld [vmem:[%s12392_s1 + $0x11c8] sm:$0xff] }
0x10da   : > { %9019 = vmatprep.subr.bf16.mxu1 %v9018_v36  ;;  %9045 = vmatpush3.bf16.msra.mxu0 %v9044_v56  ;;  %v9054_v24 = vpack.c.bf16 %v5891_v31, %v5890_v22  ;;  %v5892_v56 = vld [vmem:[%s12392_s1 + $0x1140] sm:$0xff]  ;;  %v5879_v22 = vld [vmem:[%s12392_s1 + $0x10d8] sm:$0xff] }
0x10db   : > { %7866 = vmatmul.mubr.f32.gmra.mrb[46].mxu0 %v3381_v8  ;;  %9047 = vmatprep.subr.bf16.mxu0 %v9046_v5  ;;  %v9082_v5 = vpack.c.bf16 %v5905_v4, %v5904_v3  ;;  %v9058_v15 = vpack.c.bf16 %v5893_v10, %v5892_v56 }
0x10dc   : > { %3514 = vmatmul.mubr.f32.gmra.mrb[46].mxu1 %v3376_v39 }
0x10dd   : > { %3518 = vmatprep.mubr.f32.mxu1 %v3380_v40  ;;  %9021 = vmatpush3.bf16.msra.mxu1 %v9018_v36 }
0x10de   : > { %9023 = vmatprep.subr.bf16.mxu1 %v9022_v42  ;;  %9049 = vmatpush3.bf16.msra.mxu0 %v9048_v21  ;;  %v5907_v21 = vld [vmem:[%s12392_s1 + $0x11b8] sm:$0xff] }
0x10df   : > { %9051 = vmatprep.subr.bf16.mxu0 %v9050_v1  ;;  %v9086_v1 = vpack.c.bf16 %v5907_v21, %v5906_v49 }
0x10e0   : > { %3519 = vmatmul.mubr.f32.gmra.mrb[48].mxu1 %v3379_v45 }
0x10e1   : > { %9025 = vmatpush3.bf16.msra.mxu1 %v9022_v42 }
0x10e2   : > { %9027 = vmatprep.subr.bf16.mxu1 %v9026_v46  ;;  %9053 = vmatpush3.bf16.msra.mxu0 %v9052_v23  ;;  %v9064_v23 = vpack.c.bf16 %v5879_v22, %v5878_v20  ;;  %v5924_v22 = vld [vmem:[%s12394_s3 + $0x430] sm:$0xff] }
0x10e3   : > { %9055 = vmatprep.subr.bf16.mxu0 %v9054_v24  ;;  %v5908_v24 = vld [vmem:[%s12392_s1 + $0x11c0] sm:$0xff] }
0x10e5   : > { %9029 = vmatpush3.bf16.msra.mxu1 %v9026_v46  ;;  %v5902_v46 = vld [vmem:[%s12392_s1 + $0x1190] sm:$0xff] }
0x10e6   : > { %9031 = vmatprep.subr.bf16.mxu1 %v9030_v48  ;;  %9057 = vmatpush3.bf16.msra.mxu0 %v9056_v27  ;;  %v9078_v7 = vpack.c.bf16 %v5903_v47, %v5902_v46  ;;  %v9090_v27 = vpack.c.bf16 %v5909_v25, %v5908_v24  ;;  %v5914_v46 = vld [vmem:[%s12392_s1 + $0x11f0] sm:$0xff]  ;;  %v5915_v47 = vld [vmem:[%s12392_s1 + $0x11f8] sm:$0xff] }
0x10e7   : > { %9059 = vmatprep.subr.bf16.mxu0 %v9058_v15 }
0x10e9   : > { %9033 = vmatpush3.bf16.msra.mxu1 %v9030_v48 }
0x10ea   : > { %9035 = vmatprep.subr.bf16.mxu1 %v9034_v52  ;;  %9061 = vmatpush3.bf16.msra.mxu0 %v9060_v16 }
0x10ed   : > { %9037 = vmatpush3.bf16.msra.mxu1 %v9034_v52 }
0x10ee   : > { %9039 = vmatprep.subr.bf16.mxu1 %v9038_v55 }
0x10f1   : > { %9041 = vmatpush3.bf16.msra.mxu1 %v9038_v55 }
0x10f2   : > { %9075 = vmatprep.subr.bf16.mxu1 %v9074_v0 }
0x11a7   : > { %v6823_v28 = vpop.f32.mrb[42].mxu1 }
0x11a8   : > { %v6824_v30 = vpop.f32.mrb[43].mxu1 }
0x11a9   : > { %v6825_v34 = vadd.f32 %v6824_v30, %v6823_v28  ;;  %v5897_v28 = vld [vmem:[%s12392_s1 + $0x1168] sm:$0xff]  ;;  %v5880_v30 = vld [vmem:[%s12392_s1 + $0x10e0] sm:$0xff] }
0x11aa   : > { %v7864_v38 = vpop.f32.mrb[44].mxu0 }
0x11ab   : > { %v6826_v35 = vpop.f32.mrb[44].mxu1  ;;  %v3506_v36 = vadd.f32 %v6825_v34, %v5849_v32  ;;  %v3590_v17 = vpop.f32.mrb[45].mxu0  ;;  %v9066_v34 = vpack.c.bf16 %v5897_v28, %v5896_v26 }
0x11ac   : > { %v6827_v29 = vpop.f32.mrb[45].mxu1 }
0x11ad   : > { %v3591_v8 = vadd.f32 %v3590_v17, %v3506_v36  ;;  %v6828_v39 = vadd.f32 %v6827_v29, %v6826_v35  ;;  %v5910_v35 = vld [vmem:[%s12392_s1 + $0x11d0] sm:$0xff]  ;;  %v5911_v36 = vld [vmem:[%s12392_s1 + $0x11d8] sm:$0xff] }
0x11ae   : > { %v7867_v42 = vpop.f32.mrb[46].mxu0  ;;  %v5898_v17 = vld [vmem:[%s12392_s1 + $0x1170] sm:$0xff]  ;;  %v9094_v29 = vpack.c.bf16 %v5911_v36, %v5910_v35  ;;  %v5926_v35 = vld [vmem:[%s12394_s3 + $0x440] sm:$0xff]  ;;  %v5927_v36 = vld [vmem:[%s12394_s3 + $0x448] sm:$0xff] }
0x11af   : > { %v3609_v40 = vmax.f32 %v3591_v8, 0.0  ;;  %v3511_v41 = vadd.f32 %v6828_v39, %v5849_v32  ;;  %v6829_v43 = vpop.f32.mrb[46].mxu1  ;;  %v3600_v44 = vpop.f32.mrb[47].mxu0  ;;  %v5899_v8 = vld [vmem:[%s12392_s1 + $0x1178] sm:$0xff]  ;;  %v5882_v39 = vld [vmem:[%s12392_s1 + $0x10f0] sm:$0xff] }
0x11b0   : > { %v6830_v45 = vpop.f32.mrb[47].mxu1 }
0x11b1   : > { %v3596_v12 = vadd.f32 %v7864_v38, %v3511_v41  ;;  %v6831_v48 = vadd.f32 %v6830_v45, %v6829_v43  ;;  %7900 = vmatprep.mubr.f32.mxu1 %v3609_v40  ;;  %v5883_v40 = vld [vmem:[%s12392_s1 + $0x10f8] sm:$0xff]  ;;  %v9070_v41 = vpack.c.bf16 %v5899_v8, %v5898_v17  ;;  %v5912_v43 = vld [vmem:[%s12392_s1 + $0x11e0] sm:$0xff]  ;;  %v9122_v8 = vpack.c.bf16 %v5927_v36, %v5926_v35  ;;  %v5985_v36 = vld [vmem:[%s12392_s1 + $0x1348] sm:$0xff] }
0x11b2   : > { %v5984_v35 = vld [vmem:[%s12392_s1 + $0x1340] sm:$0xff] }
0x11b3   : > { %v3610_v50 = vmax.f32 %v3596_v12, 0.0  ;;  %v3516_v13 = vadd.f32 %v6831_v48, %v5849_v32  ;;  %v6832_v52 = vpop.f32.mrb[48].mxu1  ;;  %v9102_v12 = vpack.c.bf16 %v5915_v47, %v5914_v46  ;;  %v5918_v48 = vld [vmem:[%s12394_s3 + $0x400] sm:$0xff]  ;;  %v5933_v46 = vld [vmem:[%s12394_s3 + $0x478] sm:$0xff] }
0x11b4   : > { %v6833_v54 = vpop.f32.mrb[49].mxu1 }
0x11b5   : > { %v6834_v55 = vadd.f32 %v6833_v54, %v6832_v52  ;;  %7901 = vmatmul.mubr.f32.vlgmr.msra.gmra.mrb[50].mxu1 %v3610_v50  ;;  %v3601_v59 = vadd.f32 %v3600_v44, %v3516_v13  ;;  %v5913_v44 = vld [vmem:[%s12392_s1 + $0x11e8] sm:$0xff]  ;;  %v5867_v52 = vld [vmem:[%s12395_s4 + $0x7] ss:$0 sm:$0xff] }
0x11b6   : > { %9077 = vmatpush3.bf16.msra.mxu1 %v9074_v0  ;;  %v5894_v0 = vld [vmem:[%s12392_s1 + $0x1150] sm:$0xff]  ;;  %v9098_v45 = vpack.c.bf16 %v5913_v44, %v5912_v43  ;;  %v5919_v50 = vld [vmem:[%s12394_s3 + $0x408] sm:$0xff] }
0x11b7   : > { %v3521_v61 = vadd.f32 %v6834_v55, %v5849_v32  ;;  %v3611_v62 = vmax.f32 %v3601_v59, 0.0  ;;  %9079 = vmatprep.subr.bf16.mxu1 %v9078_v7  ;;  %v9062_v31 = vpack.c.bf16 %v5895_v37, %v5894_v0  ;;  %v5881_v32 = vld [vmem:[%s12392_s1 + $0x10e8] sm:$0xff]  ;;  %v9106_v13 = vpack.c.bf16 %v5919_v50, %v5918_v48  ;;  %v5922_v0 = vld [vmem:[%s12394_s3 + $0x420] sm:$0xff] }
0x11b8   : > { %v9068_v38 = vpack.c.bf16 %v5881_v32, %v5880_v30  ;;  %v5931_v43 = vld [vmem:[%s12394_s3 + $0x468] sm:$0xff] }
0x11b9   : > { %7903 = vmatprep.mubr.f32.mxu1 %v3611_v62  ;;  %v3606_v63 = vadd.f32 %v7867_v42, %v3521_v61  ;;  %9063 = vmatprep.subr.bf16.mxu0 %v9062_v31  ;;  %v9072_v42 = vpack.c.bf16 %v5883_v40, %v5882_v39  ;;  %v5925_v31 = vld [vmem:[%s12394_s3 + $0x438] sm:$0xff]  ;;  %v5928_v39 = vld [vmem:[%s12394_s3 + $0x450] sm:$0xff] }
0x11ba   : > { %9081 = vmatpush3.bf16.msra.mxu1 %v9078_v7  ;;  %9065 = vmatpush3.bf16.msra.mxu0 %v9064_v23  ;;  %v5929_v40 = vld [vmem:[%s12394_s3 + $0x458] sm:$0xff] }
0x11bb   : > { %v3612_v2 = vmax.f32 %v3606_v63, 0.0  ;;  %9083 = vmatprep.subr.bf16.mxu1 %v9082_v5  ;;  %9067 = vmatprep.subr.bf16.mxu0 %v9066_v34 }
0x11bd   : > { %7904 = vmatmul.mubr.f32.gmra.mrb[52].mxu1 %v3612_v2 }
0x11be   : > { %9085 = vmatpush3.bf16.msra.mxu1 %v9082_v5  ;;  %9069 = vmatpush3.bf16.msra.mxu0 %v9068_v38  ;;  %v9118_v38 = vpack.c.bf16 %v5925_v31, %v5924_v22  ;;  %v5976_v31 = vld [vmem:[%s12392_s1 + $0x1300] sm:$0xff] }
0x11bf   : > { %9087 = vmatprep.subr.bf16.mxu1 %v9086_v1  ;;  %9071 = vmatprep.subr.bf16.mxu0 %v9070_v41  ;;  %v9126_v41 = vpack.c.bf16 %v5929_v40, %v5928_v39 }
0x11c2   : > { %9089 = vmatpush3.bf16.msra.mxu1 %v9086_v1  ;;  %9073 = vmatpush3.bf16.msra.mxu0 %v9072_v42  ;;  %v5930_v42 = vld [vmem:[%s12394_s3 + $0x460] sm:$0xff] }
0x11c3   : > { %9091 = vmatprep.subr.bf16.mxu1 %v9090_v27  ;;  %9107 = vmatprep.subr.bf16.mxu0 %v9106_v13  ;;  %v9130_v44 = vpack.c.bf16 %v5931_v43, %v5930_v42 }
0x11c6   : > { %9093 = vmatpush3.bf16.msra.mxu1 %v9090_v27 }
0x11c7   : > { %9095 = vmatprep.subr.bf16.mxu1 %v9094_v29 }
0x11ca   : > { %9097 = vmatpush3.bf16.msra.mxu1 %v9094_v29 }
0x11cb   : > { %9099 = vmatprep.subr.bf16.mxu1 %v9098_v45 }
0x11ce   : > { %9101 = vmatpush3.bf16.msra.mxu1 %v9098_v45  ;;  %v5932_v45 = vld [vmem:[%s12394_s3 + $0x470] sm:$0xff] }
0x11cf   : > { %9103 = vmatprep.subr.bf16.mxu1 %v9102_v12  ;;  %v9134_v47 = vpack.c.bf16 %v5933_v46, %v5932_v45  ;;  %v4108_v46 = vadd.s32 32, %v10251_v57 }
0x11d2   : > { %9105 = vmatpush3.bf16.msra.mxu1 %v9102_v12 }
0x1288   : > { %v7902_v7 = vpop.f32.mrb[50].mxu1 }
0x1289   : > { %v3710_v54 = vadd.f32 %v7902_v7, %v5867_v52  ;;  %v3704_v55 = vpop.f32.mrb[51].mxu1  ;;  %v5917_v7 = vld [vmem:[%s12393_s2 + $0xb] ss:$0 sm:$0xff] }
0x128a   : > { %v3705_v59 = vadd.f32 %v5867_v52, %v3704_v55 }
0x128b   : > { %v11790_v61 = vadd.f32 %v3710_v54, %v11572_v6  ;;  %v5920_v6 = vld [vmem:[%s12394_s3 + $0x410] sm:$0xff] }
0x128c   : > { %v11793_v62 = vadd.f32 %v3705_v59, %v11575_v9  ;;  %v5921_v9 = vld [vmem:[%s12394_s3 + $0x418] sm:$0xff] }
0x128d   : > { %3728 = vst [vmem:[#allocation2 + $0x18] sm:$0xff] %v11790_v61  ;;  %v9110_v16 = vpack.c.bf16 %v5921_v9, %v5920_v6  ;;  %v3747_v49 = vmax.f32 %v11790_v61, 0.0 }
0x128e   : > { %3727 = vst [vmem:[#allocation2 + $0x10] sm:$0xff] %v11793_v62  ;;  %v3744_v63 = vmax.f32 %v11793_v62, 0.0 }
0x1290   : > { %v7905_v2 = vpop.f32.mrb[52].mxu1  ;;  %3876 = vmatprep.mubr.f32.mxu0 %v3744_v63 }
0x1291   : > { %v3720_v3 = vadd.f32 %v7905_v2, %v5867_v52  ;;  %v3714_v4 = vpop.f32.mrb[53].mxu1 }
0x1292   : > { %v3715_v56 = vadd.f32 %v5867_v52, %v3714_v4 }
0x1293   : > { %v11799_v5 = vadd.f32 %v3720_v3, %v11581_v18 }
0x1294   : > { %v11808_v10 = vadd.f32 %v3715_v56, %v11584_v19  ;;  %v5923_v19 = vld [vmem:[%s12394_s3 + $0x428] sm:$0xff] }
0x1295   : > { %3730 = vst [vmem:[#allocation2 + $0x28] sm:$0xff] %v11799_v5  ;;  %v3739_v11 = vld [vmem:[#allocation2 + $0x11] sm:$0xff]  ;;  %v9114_v37 = vpack.c.bf16 %v5923_v19, %v5922_v0  ;;  %v3753_v30 = vmax.f32 %v11799_v5, 0.0 }
0x1296   : > { %v3735_v14 = vld [vmem:[#allocation2 + $0xf] sm:$0xff]  ;;  %3729 = vst [vmem:[#allocation2 + $0x20] sm:$0xff] %v11808_v10  ;;  %v3745_v15 = vmax.f32 %v3739_v11, 0.0  ;;  %v3736_v21 = vld [vmem:[#allocation2 + $0x17] sm:$0xff]  ;;  %v3750_v20 = vmax.f32 %v11808_v10, 0.0 }
0x1297   : > { %v3743_v18 = vmax.f32 %v3735_v14, 0.0  ;;  %v3746_v1 = vmax.f32 %v3736_v21, 0.0 }
0x1298   : > { %7938 = vmatprep.mubr.f32.mxu1 %v3745_v15 }
0x1299   : > { %3877 = vmatmul.mubr.f32.vlgmr.msra.gmra.mrb[48].mxu0 %v3743_v18 }
0x129a   : > { %3881 = vmatprep.mubr.f32.mxu0 %v3747_v49  ;;  %9109 = vmatpush3.bf16.msra.mxu0 %v9106_v13 }
0x129b   : > { %9111 = vmatprep.subr.bf16.mxu0 %v9110_v16 }
0x129c   : > { %v3742_v32 = vld [vmem:[#allocation2 + $0x29] sm:$0xff] }
0x129d   : > { %3882 = vmatmul.mubr.f32.gmra.mrb[50].mxu0 %v3746_v1  ;;  %v3740_v23 = vld [vmem:[#allocation2 + $0x19] sm:$0xff]  ;;  %v3741_v25 = vld [vmem:[#allocation2 + $0x21] sm:$0xff]  ;;  %v3754_v17 = vmax.f32 %v3742_v32, 0.0  ;;  %v5982_v32 = vld [vmem:[%s12392_s1 + $0x1330] sm:$0xff] }
0x129e   : > { %3886 = vmatprep.mubr.f32.mxu0 %v3750_v20  ;;  %v3737_v24 = vld [vmem:[#allocation2 + $0x1f] sm:$0xff]  ;;  %9113 = vmatpush3.bf16.msra.mxu0 %v9110_v16  ;;  %v3748_v26 = vmax.f32 %v3740_v23, 0.0  ;;  %v3751_v28 = vmax.f32 %v3741_v25, 0.0  ;;  %v3738_v34 = vld [vmem:[#allocation2 + $0x27] sm:$0xff]  ;;  %v5978_v25 = vld [vmem:[%s12392_s1 + $0x1310] sm:$0xff] }
0x129f   : > { %v3749_v27 = vmax.f32 %v3737_v24, 0.0  ;;  %9115 = vmatprep.subr.bf16.mxu0 %v9114_v37  ;;  %v3752_v29 = vmax.f32 %v3738_v34, 0.0  ;;  %v5977_v23 = vld [vmem:[%s12392_s1 + $0x1308] sm:$0xff]  ;;  %v5983_v34 = vld [vmem:[%s12392_s1 + $0x1338] sm:$0xff] }
0x12a0   : > { %7939 = vmatmul.mubr.f32.vlgmr.msra.gmra.mrb[54].mxu1 %v3748_v26  ;;  %v9178_v24 = vpack.c.bf16 %v5977_v23, %v5976_v31  ;;  %v5979_v26 = vld [vmem:[%s12392_s1 + $0x1318] sm:$0xff] }
0x12a1   : > { %3887 = vmatmul.mubr.f32.gmra.mrb[52].mxu0 %v3749_v27  ;;  %7941 = vmatprep.mubr.f32.mxu1 %v3751_v28  ;;  %v9182_v27 = vpack.c.bf16 %v5979_v26, %v5978_v25  ;;  %v5981_v28 = vld [vmem:[%s12392_s1 + $0x1328] sm:$0xff]  ;;  %v5951_v26 = vld [vmem:[%s12392_s1 + $0x1238] sm:$0xff] }
0x12a2   : > { %3891 = vmatprep.mubr.f32.mxu0 %v3753_v30  ;;  %9117 = vmatpush3.bf16.msra.mxu0 %v9114_v37 }
0x12a3   : > { %9119 = vmatprep.subr.bf16.mxu0 %v9118_v38 }
0x12a4   : > { %7942 = vmatmul.mubr.f32.gmra.mrb[56].mxu1 %v3754_v17  ;;  %v9194_v17 = vpack.c.bf16 %v5985_v36, %v5984_v35  ;;  %v5970_v35 = vld [vmem:[%s12392_s1 + $0x12d0] sm:$0xff]  ;;  %v5971_v36 = vld [vmem:[%s12392_s1 + $0x12d8] sm:$0xff] }
0x12a5   : > { %3892 = vmatmul.mubr.f32.gmra.mrb[54].mxu0 %v3752_v29  ;;  %7990 = vmatprep.mubr.msk.f32.mxu1 %vm4132_vm15, %v10258_v60  ;;  %v5980_v60 = vld [vmem:[%s12392_s1 + $0x1320] sm:$0xff]  ;;  %v5935_v29 = vld [vmem:[%s12395_s4 + $0x8] ss:$0 sm:$0xff] }
0x12a6   : > { %9121 = vmatpush3.bf16.msra.mxu0 %v9118_v38  ;;  %v9186_v30 = vpack.c.bf16 %v5981_v28, %v5980_v60  ;;  %v9190_v38 = vpack.c.bf16 %v5983_v34, %v5982_v32  ;;  %v5969_v60 = vld [vmem:[%s12392_s1 + $0x12c8] sm:$0xff]  ;;  %v5952_v34 = vld [vmem:[%s12392_s1 + $0x1240] sm:$0xff] }
0x12a7   : > { %9123 = vmatprep.subr.bf16.mxu0 %v9122_v8 }
0x12aa   : > { %9125 = vmatpush3.bf16.msra.mxu0 %v9122_v8 }
0x12ab   : > { %9127 = vmatprep.subr.bf16.mxu0 %v9126_v41 }
0x12ae   : > { %9129 = vmatpush3.bf16.msra.mxu0 %v9126_v41 }
0x12af   : > { %9131 = vmatprep.subr.bf16.mxu0 %v9130_v44 }
0x12b2   : > { %9133 = vmatpush3.bf16.msra.mxu0 %v9130_v44 }
0x12b3   : > { %9135 = vmatprep.subr.bf16.mxu0 %v9134_v47 }
0x12b6   : > { %9137 = vmatpush3.bf16.msra.mxu0 %v9134_v47 }
0x12b7   : > { %9179 = vmatprep.subr.bf16.mxu0 %v9178_v24 }
0x136c   : > { %v6907_v12 = vpop.f32.mrb[48].mxu0 }
0x136d   : > { %v6908_v48 = vpop.f32.mrb[49].mxu0 }
0x136e   : > { %v6909_v50 = vadd.f32 %v6908_v48, %v6907_v12 }
0x1370   : > { %v6910_v13 = vpop.f32.mrb[50].mxu0  ;;  %v3879_v2 = vadd.f32 %v6909_v50, %v5917_v7 }
0x1371   : > { %v6911_v52 = vpop.f32.mrb[51].mxu0 }
0x1372   : > { %v6912_v54 = vadd.f32 %v6911_v52, %v6910_v13  ;;  %v4109_v13 = vadd.s32 40, %v10251_v57  ;;  %v5960_v52 = vld [vmem:[%s12392_s1 + $0x1280] sm:$0xff] }
0x1373   : > { %v7940_v59 = vpop.f32.mrb[54].mxu1 }
0x1374   : > { %v3884_v55 = vadd.f32 %v6912_v54, %v5917_v7  ;;  %v6913_v63 = vpop.f32.mrb[52].mxu0  ;;  %v3963_v3 = vpop.f32.mrb[55].mxu1  ;;  %v4110_v54 = vadd.s32 48, %v10251_v57 }
0x1375   : > { %v6914_v4 = vpop.f32.mrb[53].mxu0  ;;  %v3964_v6 = vadd.f32 %v3963_v3, %v3879_v2  ;;  %v4113_v2 = vsub.s32 %v4109_v13, %v10253_v58  ;;  %v4111_v3 = vadd.s32 56, %v10251_v57  ;;  %v5946_v57 = vld [vmem:[%s12392_s1 + $0x1210] sm:$0xff]  ;;  %v5989_v13 = vld [vmem:[%s12392_s1 + $0x1368] sm:$0xff] }
0x1376   : > { %v3969_v56 = vadd.f32 %v7940_v59, %v3884_v55  ;;  %v6915_v9 = vadd.f32 %v6914_v4, %v6913_v63  ;;  %v5945_v63 = vld [vmem:[%s12392_s1 + $0x1208] sm:$0xff]  ;;  %v5963_v4 = vld [vmem:[%s12392_s1 + $0x1298] sm:$0xff] }
0x1377   : > { %v3982_v14 = vmax.f32 %v3964_v6, 0.0  ;;  %v7943_v15 = vpop.f32.mrb[56].mxu1  ;;  %vm4117_vm3 = vcmp.ge.s32.totalorder %v4113_v2, 0  ;;  %vm4121_vm4 = vcmp.le.s32.totalorder %v4113_v2, 1 }
0x1378   : > { %v3983_v11 = vmax.f32 %v3969_v56, 0.0  ;;  %v6916_v18 = vpop.f32.mrb[54].mxu0  ;;  %v3889_v16 = vadd.f32 %v6915_v9, %v5917_v7  ;;  %v3973_v49 = vpop.f32.mrb[57].mxu1  ;;  %v4114_v56 = vsub.s32 %v4110_v54, %v10253_v58  ;;  %vm11941_vm7 = vmand %vm4117_vm3, %vm4121_vm4  ;;  %v5959_v54 = vld [vmem:[%s12392_s1 + $0x1278] sm:$0xff] }
0x1379   : > { %v6917_v21 = vpop.f32.mrb[55].mxu0  ;;  %7976 = vmatprep.mubr.f32.mxu0 %v3982_v14 }
0x137a   : > { %v3974_v0 = vadd.f32 %v3973_v49, %v3889_v16  ;;  %v6918_v19 = vadd.f32 %v6917_v21, %v6916_v18  ;;  %7977 = vmatmul.mubr.f32.vlgmr.msra.gmra.mrb[56].mxu0 %v3983_v11  ;;  %v5947_v11 = vld [vmem:[%s12392_s1 + $0x1218] sm:$0xff]  ;;  %v5964_v18 = vld [vmem:[%s12392_s1 + $0x12a0] sm:$0xff]  ;;  %v5965_v16 = vld [vmem:[%s12392_s1 + $0x12a8] sm:$0xff]  ;;  %vm4118_vm5 = vcmp.ge.s32.totalorder %v4114_v56, 0  ;;  %vm4122_vm6 = vcmp.le.s32.totalorder %v4114_v56, 1 }
0x137b   : > { %9181 = vmatpush3.bf16.msra.mxu0 %v9178_v24  ;;  %v9152_v49 = vpack.c.bf16 %v5947_v11, %v5946_v57  ;;  %v9351_v21 = vld [vmem:[#allocation2 + $0x8] sm:$0xff]  ;;  %vm11951_vm8 = vmand %vm4118_vm5, %vm4122_vm6  ;;  %v6026_v56 = vld [vmem:[%s12392_s1 + $0x1480] sm:$0xff] }
0x137c   : > { %v3984_v1 = vmax.f32 %v3974_v0, 0.0  ;;  %v3894_v37 = vadd.f32 %v6918_v19, %v5917_v7  ;;  %9183 = vmatprep.subr.bf16.mxu0 %v9182_v27  ;;  %v4112_v7 = vsub.s32 %v4108_v46, %v10253_v58  ;;  %v9154_v19 = vpack.c.bf16 %v5965_v16, %v5964_v18  ;;  %v5956_v46 = vld [vmem:[%s12392_s1 + $0x1260] sm:$0xff]  ;;  %v5995_v18 = vld [vmem:[%s12392_s1 + $0x1388] sm:$0xff]  ;;  %v6029_v24 = vld [vmem:[%s12392_s1 + $0x1498] sm:$0xff] }
0x137d   : > { %v4130_v23 = vsel %vm11951_vm8, 1.0, %v9351_v21 }
0x137e   : > { %7979 = vmatprep.mubr.f32.mxu0 %v3984_v1  ;;  %v3979_v20 = vadd.f32 %v7943_v15, %v3894_v37  ;;  %vm4116_vm0 = vcmp.ge.s32.totalorder %v4112_v7, 0  ;;  %vm4120_vm1 = vcmp.le.s32.totalorder %v4112_v7, 1  ;;  %v4115_v15 = vsub.s32 %v4111_v3, %v10253_v58  ;;  %v5966_v37 = vld [vmem:[%s12392_s1 + $0x12b0] sm:$0xff]  ;;  %v6010_v3 = vld [vmem:[%s12392_s1 + $0x1400] sm:$0xff] }
0x137f   : > { %9185 = vmatpush3.bf16.msra.mxu0 %v9182_v27  ;;  %vm11924_vm2 = vmand %vm4116_vm0, %vm4120_vm1  ;;  %v5968_v27 = vld [vmem:[%s12392_s1 + $0x12c0] sm:$0xff]  ;;  %v5958_v7 = vld [vmem:[%s12392_s1 + $0x1270] sm:$0xff] }
0x1380   : > { %v3985_v22 = vmax.f32 %v3979_v20, 0.0  ;;  %9187 = vmatprep.subr.bf16.mxu0 %v9186_v30  ;;  %v4128_v58 = vsel %vm11924_vm2, 1.0, %v9351_v21  ;;  %vm4119_vm9 = vcmp.ge.s32.totalorder %v4115_v15, 0  ;;  %vm4123_vm10 = vcmp.le.s32.totalorder %v4115_v15, 1  ;;  %v5967_v20 = vld [vmem:[%s12392_s1 + $0x12b8] sm:$0xff]  ;;  %v5994_v15 = vld [vmem:[%s12392_s1 + $0x1380] sm:$0xff] }
0x1381   : > { %vm11968_vm11 = vmand %vm4119_vm9, %vm4123_vm10  ;;  %v9158_v25 = vpack.c.bf16 %v5967_v20, %v5966_v37  ;;  %v9162_v32 = vpack.c.bf16 %v5969_v60, %v5968_v27  ;;  %v5999_v27 = vld [vmem:[%s12392_s1 + $0x13a8] sm:$0xff] }
0x1382   : > { %7980 = vmatmul.mubr.f32.gmra.mrb[58].mxu0 %v3985_v22  ;;  %v4129_v22 = vsel %vm11941_vm7, 1.0, %v9351_v21  ;;  %v4131_v28 = vsel %vm11968_vm11, 1.0, %v9351_v21  ;;  %v6013_v21 = vld [vmem:[%s12392_s1 + $0x1418] sm:$0xff] }
0x1383   : > { %9189 = vmatpush3.bf16.msra.mxu0 %v9186_v30 }
0x1384   : > { %9191 = vmatprep.subr.bf16.mxu0 %v9190_v38 }
0x1387   : > { %9193 = vmatpush3.bf16.msra.mxu0 %v9190_v38  ;;  %v5953_v38 = vld [vmem:[%s12392_s1 + $0x1248] sm:$0xff] }
0x1388   : > { %9195 = vmatprep.subr.bf16.mxu0 %v9194_v17 }
0x138b   : > { %9197 = vmatpush3.bf16.msra.mxu0 %v9194_v17  ;;  %v9164_v17 = vpack.c.bf16 %v5953_v38, %v5952_v34 }
0x144d   : > { %v7978_v8 = vpop.f32.mrb[56].mxu0 }
0x144e   : > { %v4083_v39 = vadd.f32 %v7978_v8, %v5935_v29  ;;  %v4077_v40 = vpop.f32.mrb[57].mxu0  ;;  %v5954_v8 = vld [vmem:[%s12392_s1 + $0x1250] sm:$0xff] }
0x144f   : > { %v4078_v41 = vadd.f32 %v5935_v29, %v4077_v40 }
0x1450   : > { %v4097_v42 = vadd.f32 %v4083_v39, %v11790_v61  ;;  %v5961_v61 = vld [vmem:[%s12392_s1 + $0x1288] sm:$0xff]  ;;  %v5955_v39 = vld [vmem:[%s12392_s1 + $0x1258] sm:$0xff] }
0x1451   : > { %v4096_v43 = vadd.f32 %v4078_v41, %v11793_v62  ;;  %v9146_v59 = vpack.c.bf16 %v5961_v61, %v5960_v52  ;;  %v9168_v40 = vpack.c.bf16 %v5955_v39, %v5954_v8  ;;  %v5986_v41 = vld [vmem:[%s12392_s1 + $0x1350] sm:$0xff]  ;;  %v6001_v8 = vld [vmem:[%s12392_s1 + $0x13b8] sm:$0xff] }
0x1452   : > { %v5974_v52 = vld [vmem:[%s12392_s1 + $0x12f0] sm:$0xff] }
0x1453   : > { %v9138_v44 = vpack.c.bf16 %v4097_v42, %v4096_v43  ;;  %v5987_v42 = vld [vmem:[%s12392_s1 + $0x1358] sm:$0xff]  ;;  %v5972_v43 = vld [vmem:[%s12392_s1 + $0x12e0] sm:$0xff] }
0x1455   : > { %v7981_v45 = vpop.f32.mrb[58].mxu0  ;;  %9139 = vmatprep.subr.bf16.mxu1 %v9138_v44 }
0x1456   : > { %v4093_v47 = vadd.f32 %v7981_v45, %v5935_v29  ;;  %v4087_v12 = vpop.f32.mrb[59].mxu0  ;;  %9141 = vmatpush3.bf16.msra.mxu1 %v9138_v44  ;;  %v9198_v44 = vpack.c.bf16 %v5987_v42, %v5986_v41  ;;  %v5973_v45 = vld [vmem:[%s12392_s1 + $0x12e8] sm:$0xff] }
0x1457   : > { %v4088_v48 = vadd.f32 %v5935_v29, %v4087_v12  ;;  %v9166_v29 = vpack.c.bf16 %v5971_v36, %v5970_v35  ;;  %v9170_v12 = vpack.c.bf16 %v5973_v45, %v5972_v43  ;;  %v6016_v35 = vld [vmem:[%s12392_s1 + $0x1430] sm:$0xff]  ;;  %v6017_v36 = vld [vmem:[%s12392_s1 + $0x1438] sm:$0xff] }
0x1458   : > { %v4099_v50 = vadd.f32 %v4093_v47, %v11799_v5  ;;  %v5944_v5 = vld [vmem:[%s12392_s1 + $0x1200] sm:$0xff]  ;;  %v5957_v47 = vld [vmem:[%s12392_s1 + $0x1268] sm:$0xff]  ;;  %9199 = vmatprep.subr.bf16.mxu0 %v9198_v44  ;;  %v9222_v42 = vpack.c.bf16 %v6017_v36, %v6016_v35 }
0x1459   : > { %v4098_v62 = vadd.f32 %v4088_v48, %v11808_v10  ;;  %v5962_v10 = vld [vmem:[%s12392_s1 + $0x1290] sm:$0xff]  ;;  %v9148_v6 = vpack.c.bf16 %v5945_v63, %v5944_v5  ;;  %v9172_v48 = vpack.c.bf16 %v5957_v47, %v5956_v46  ;;  %9201 = vmatpush3.bf16.msra.mxu0 %v9198_v44  ;;  %v5991_v63 = vld [vmem:[%s12392_s1 + $0x1378] sm:$0xff]  ;;  %v6077_v35 = vld [vmem:[%s12392_s1 + $0x1608] sm:$0xff] }
0x145a   : > { %v9150_v9 = vpack.c.bf16 %v5963_v4, %v5962_v10  ;;  %v5990_v5 = vld [vmem:[%s12392_s1 + $0x1370] sm:$0xff]  ;;  %v6011_v10 = vld [vmem:[%s12392_s1 + $0x1408] sm:$0xff] }
0x145b   : > { %v9142_v55 = vpack.c.bf16 %v4099_v50, %v4098_v62  ;;  %v5988_v50 = vld [vmem:[%s12392_s1 + $0x1360] sm:$0xff]  ;;  %v5975_v62 = vld [vmem:[%s12392_s1 + $0x12f8] sm:$0xff]  ;;  %v9206_v2 = vpack.c.bf16 %v5991_v63, %v5990_v5  ;;  %v9210_v4 = vpack.c.bf16 %v6011_v10, %v6010_v3  ;;  %v6020_v10 = vld [vmem:[%s12392_s1 + $0x1450] sm:$0xff] }
0x145c   : > { %v9202_v61 = vpack.c.bf16 %v5989_v13, %v5988_v50  ;;  %v6033_v3 = vld [vmem:[%s12392_s1 + $0x14b8] sm:$0xff] }
0x145d   : > { %9143 = vmatprep.subr.bf16.mxu1 %v9142_v55 }
0x145e   : > { %9145 = vmatpush3.bf16.msra.mxu1 %v9142_v55  ;;  %v9174_v55 = vpack.c.bf16 %v5975_v62, %v5974_v52  ;;  %9203 = vmatprep.subr.bf16.mxu0 %v9202_v61  ;;  %v6030_v52 = vld [vmem:[%s12392_s1 + $0x14a0] sm:$0xff] }
0x145f   : > { %9147 = vmatprep.subr.bf16.mxu1 %v9146_v59  ;;  %v9176_v59 = vpack.c.bf16 %v5959_v54, %v5958_v7  ;;  %9205 = vmatpush3.bf16.msra.mxu0 %v9202_v61  ;;  %v6031_v61 = vld [vmem:[%s12392_s1 + $0x14a8] sm:$0xff]  ;;  %v6018_v62 = vld [vmem:[%s12392_s1 + $0x1440] sm:$0xff] }
0x1460   : > { %9207 = vmatprep.subr.bf16.mxu0 %v9206_v2  ;;  %v9250_v7 = vpack.c.bf16 %v6031_v61, %v6030_v52  ;;  %v6019_v54 = vld [vmem:[%s12392_s1 + $0x1448] sm:$0xff] }
0x1461   : > { %7991 = vmatmul.mubr.msk.f32.vlgmr.msra.gmra.mrb[58].mxu1 %vm4132_vm15, %v10323_v33  ;;  %v5948_v33 = vld [vmem:[%s12392_s1 + $0x1220] sm:$0xff]  ;;  %v9226_v5 = vpack.c.bf16 %v6019_v54, %v6018_v62  ;;  %v6062_v54 = vld [vmem:[%s12392_s1 + $0x1590] sm:$0xff] }
0x1462   : > { %7993 = vmatprep.mubr.msk.f32.mxu1 %vm4132_vm15, %v11128_v51  ;;  %9149 = vmatpush3.bf16.msra.mxu1 %v9148_v6  ;;  %v5949_v51 = vld [vmem:[%s12392_s1 + $0x1228] sm:$0xff]  ;;  %v6044_v62 = vld [vmem:[%s12392_s1 + $0x1500] sm:$0xff] }
0x1463   : > { %9151 = vmatprep.subr.bf16.mxu1 %v9150_v9  ;;  %v9156_v31 = vpack.c.bf16 %v5949_v51, %v5948_v33  ;;  %9209 = vmatpush3.bf16.msra.mxu0 %v9206_v2  ;;  %v6027_v6 = vld [vmem:[%s12392_s1 + $0x1488] sm:$0xff]  ;;  %v5996_v33 = vld [vmem:[%s12392_s1 + $0x1390] sm:$0xff]  ;;  %v5997_v51 = vld [vmem:[%s12392_s1 + $0x1398] sm:$0xff] }
0x1464   : > { %v9242_v9 = vpack.c.bf16 %v6027_v6, %v6026_v56  ;;  %v6032_v2 = vld [vmem:[%s12392_s1 + $0x14b0] sm:$0xff]  ;;  %v6021_v56 = vld [vmem:[%s12392_s1 + $0x1458] sm:$0xff] }
0x1465   : > { %7994 = vmatmul.mubr.msk.f32.gmra.mrb[60].mxu1 %vm4132_vm15, %v11140_v53  ;;  %v5950_v53 = vld [vmem:[%s12392_s1 + $0x1230] sm:$0xff] }
0x1466   : > { %7996 = vmatprep.mubr.msk.f32.mxu1 %vm4132_vm15, %v4128_v58  ;;  %9153 = vmatpush3.bf16.msra.mxu1 %v9152_v49  ;;  %v9160_v30 = vpack.c.bf16 %v5951_v26, %v5950_v53  ;;  %v6012_v49 = vld [vmem:[%s12392_s1 + $0x1410] sm:$0xff]  ;;  %v9212_v58 = vpack.c.bf16 %v5995_v18, %v5994_v15  ;;  %v9216_v53 = vpack.c.bf16 %v5997_v51, %v5996_v33  ;;  %v5998_v26 = vld [vmem:[%s12392_s1 + $0x13a0] sm:$0xff]  ;;  %v6035_v15 = vld [vmem:[%s12392_s1 + $0x14c8] sm:$0xff] }
0x1467   : > { %9155 = vmatprep.subr.bf16.mxu1 %v9154_v19  ;;  %9243 = vmatprep.subr.bf16.mxu0 %v9242_v9  ;;  %v9214_v19 = vpack.c.bf16 %v6013_v21, %v6012_v49  ;;  %v6004_v6 = vld [vmem:[%s12392_s1 + $0x13d0] sm:$0xff]  ;;  %v6022_v18 = vld [vmem:[%s12392_s1 + $0x1460] sm:$0xff]  ;;  %v6023_v49 = vld [vmem:[%s12392_s1 + $0x1468] sm:$0xff] }
0x1468   : > { %v6006_v21 = vld [vmem:[%s12392_s1 + $0x13e0] sm:$0xff]  ;;  %v6036_v33 = vld [vmem:[%s12392_s1 + $0x14d0] sm:$0xff]  ;;  %v6037_v51 = vld [vmem:[%s12392_s1 + $0x14d8] sm:$0xff] }
0x1469   : > { %7997 = vmatmul.mubr.msk.f32.gmra.mrb[62].mxu1 %vm4132_vm15, %v4129_v22  ;;  %v6014_v22 = vld [vmem:[%s12392_s1 + $0x1420] sm:$0xff] }
0x146a   : > { %7999 = vmatprep.mubr.msk.f32.mxu1 %vm4132_vm15, %v4130_v23  ;;  %9157 = vmatpush3.bf16.msra.mxu1 %v9156_v31  ;;  %v6015_v31 = vld [vmem:[%s12392_s1 + $0x1428] sm:$0xff]  ;;  %v6028_v23 = vld [vmem:[%s12392_s1 + $0x1490] sm:$0xff] }
0x146b   : > { %9159 = vmatprep.subr.bf16.mxu1 %v9158_v25  ;;  %v9218_v34 = vpack.c.bf16 %v6015_v31, %v6014_v22  ;;  %v9246_v38 = vpack.c.bf16 %v6029_v24, %v6028_v23  ;;  %v6008_v22 = vld [vmem:[%s12392_s1 + $0x13f0] sm:$0xff]  ;;  %v6009_v31 = vld [vmem:[%s12392_s1 + $0x13f8] sm:$0xff] }
0x146c   : > { %v9240_v24 = vpack.c.bf16 %v6009_v31, %v6008_v22  ;;  %v6049_v22 = vld [vmem:[%s12392_s1 + $0x1528] sm:$0xff] }
0x146d   : > { %8000 = vmatmul.mubr.msk.f32.gmra.mrb[64].mxu1 %vm4132_vm15, %v4131_v28 }
0x146e   : > { %9161 = vmatpush3.bf16.msra.mxu1 %v9160_v30 }
0x146f   : > { %9163 = vmatprep.subr.bf16.mxu1 %v9162_v32 }
0x1472   : > { %9165 = vmatpush3.bf16.msra.mxu1 %v9164_v17  ;;  %v9220_v17 = vpack.c.bf16 %v5999_v27, %v5998_v26  ;;  %v6040_v27 = vld [vmem:[%s12392_s1 + $0x14f0] sm:$0xff] }
0x1473   : > { %9167 = vmatprep.subr.bf16.mxu1 %v9166_v29  ;;  %v6000_v29 = vld [vmem:[%s12392_s1 + $0x13b0] sm:$0xff] }
0x1474   : > { %v9224_v43 = vpack.c.bf16 %v6001_v8, %v6000_v29  ;;  %v12215_v8 = vld [vmem:[%s12393_s2 + $0xc] ss:$0 sm:$0xff] }
0x1476   : > { %9169 = vmatpush3.bf16.msra.mxu1 %v9168_v40 }
0x1477   : > { %9171 = vmatprep.subr.bf16.mxu1 %v9170_v12 }
0x147a   : > { %9173 = vmatpush3.bf16.msra.mxu1 %v9172_v48 }
0x147b   : > { %9175 = vmatprep.subr.bf16.mxu1 %v9174_v55  ;;  %v6002_v55 = vld [vmem:[%s12392_s1 + $0x13c0] sm:$0xff] }
0x147e   : > { %9177 = vmatpush3.bf16.msra.mxu1 %v9176_v59  ;;  %v6003_v59 = vld [vmem:[%s12392_s1 + $0x13c8] sm:$0xff] }
0x147f   : > { %9211 = vmatprep.subr.bf16.mxu1 %v9210_v4  ;;  %v9228_v63 = vpack.c.bf16 %v6003_v59, %v6002_v55  ;;  %v9254_v4 = vpack.c.bf16 %v6033_v3, %v6032_v2  ;;  %v6063_v55 = vld [vmem:[%s12392_s1 + $0x1598] sm:$0xff] }
0x1534   : > { %v7992_v57 = vpop.f32.mrb[58].mxu1 }
0x1535   : > { %4259 = vst [vmem:[#allocation2 + $0x18] sm:$0xff] %v7992_v57  ;;  %v4219_v11 = vpop.f32.mrb[59].mxu1 }
0x1536   : > { %4258 = vst [vmem:[#allocation2 + $0x10] sm:$0xff] %v4219_v11  ;;  %4411 = vmatprep.mubr.f32.mxu1 %v4219_v11 }
0x1538   : > { %v7995_v14 = vpop.f32.mrb[60].mxu1 }
0x1539   : > { %4261 = vst [vmem:[#allocation2 + $0x28] sm:$0xff] %v7995_v14  ;;  %v4229_v16 = vpop.f32.mrb[61].mxu1 }
0x153a   : > { %4260 = vst [vmem:[#allocation2 + $0x20] sm:$0xff] %v4229_v16 }
0x153c   : > { %v12073_v0 = vpop.f32.mrb[62].mxu1 }
0x153d   : > { %4263 = vst [vmem:[#allocation2 + $0x38] sm:$0xff] %v12073_v0  ;;  %v4239_v1 = vpop.f32.mrb[63].mxu1  ;;  %v4266_v37 = vld [vmem:[#allocation2 + $0xf] sm:$0xff]  ;;  %v4267_v30 = vld [vmem:[#allocation2 + $0x17] sm:$0xff] }
0x153e   : > { %v4282_v20 = vld [vmem:[#allocation2 + $0x11] sm:$0xff]  ;;  %4262 = vst [vmem:[#allocation2 + $0x30] sm:$0xff] %v4239_v1  ;;  %4412 = vmatmul.mubr.f32.vlgmr.msra.gmra.mrb[66].mxu1 %v4266_v37  ;;  %v9262_v37 = vpack.c.bf16 %v6037_v51, %v6036_v33 }
0x153f   : > { %8034 = vmatprep.mubr.f32.mxu0 %v4282_v20  ;;  %4416 = vmatprep.mubr.f32.mxu1 %v7992_v57  ;;  %v9230_v57 = vpack.c.bf16 %v6021_v56, %v6020_v10  ;;  %v6025_v20 = vld [vmem:[%s12392_s1 + $0x1478] sm:$0xff] }
0x1540   : > { %9213 = vmatpush3.bf16.msra.mxu1 %v9212_v58  ;;  %v8001_v25 = vpop.f32.mrb[64].mxu1  ;;  %v6007_v58 = vld [vmem:[%s12392_s1 + $0x13e8] sm:$0xff] }
0x1541   : > { %9215 = vmatprep.subr.bf16.mxu1 %v9214_v19  ;;  %4265 = vst [vmem:[#allocation2 + $0x48] sm:$0xff] %v8001_v25  ;;  %v4283_v60 = vld [vmem:[#allocation2 + $0x19] sm:$0xff]  ;;  %v4249_v28 = vpop.f32.mrb[65].mxu1  ;;  %v4284_v32 = vld [vmem:[#allocation2 + $0x21] sm:$0xff]  ;;  %v9236_v19 = vpack.c.bf16 %v6007_v58, %v6006_v21 }
0x1542   : > { %8035 = vmatmul.mubr.f32.vlgmr.msra.gmra.mrb[60].mxu0 %v4283_v60  ;;  %4264 = vst [vmem:[#allocation2 + $0x40] sm:$0xff] %v4249_v28  ;;  %4417 = vmatmul.mubr.f32.gmra.mrb[68].mxu1 %v4267_v30  ;;  %v4268_v39 = vld [vmem:[#allocation2 + $0x1f] sm:$0xff]  ;;  %v4269_v44 = vld [vmem:[#allocation2 + $0x27] sm:$0xff] }
0x1543   : > { %4421 = vmatprep.mubr.f32.mxu1 %v4229_v16  ;;  %8037 = vmatprep.mubr.f32.mxu0 %v4284_v32  ;;  %v6041_v60 = vld [vmem:[%s12392_s1 + $0x14f8] sm:$0xff]  ;;  %v6060_v30 = vld [vmem:[%s12392_s1 + $0x1580] sm:$0xff]  ;;  %v6061_v32 = vld [vmem:[%s12392_s1 + $0x1588] sm:$0xff] }
0x1544   : > { %9217 = vmatpush3.bf16.msra.mxu1 %v9216_v53  ;;  %9245 = vmatpush3.bf16.msra.mxu0 %v9242_v9  ;;  %v6005_v9 = vld [vmem:[%s12392_s1 + $0x13d8] sm:$0xff]  ;;  %v6039_v53 = vld [vmem:[%s12392_s1 + $0x14e8] sm:$0xff] }
0x1545   : > { %v4285_v40 = vld [vmem:[#allocation2 + $0x29] sm:$0xff]  ;;  %v4286_v41 = vld [vmem:[#allocation2 + $0x31] sm:$0xff]  ;;  %9219 = vmatprep.subr.bf16.mxu1 %v9218_v34  ;;  %9247 = vmatprep.subr.bf16.mxu0 %v9246_v38  ;;  %v9232_v11 = vpack.c.bf16 %v6005_v9, %v6004_v6  ;;  %v9274_v34 = vpack.c.bf16 %v6061_v32, %v6060_v30  ;;  %v9278_v6 = vpack.c.bf16 %v6063_v55, %v6062_v54 }
0x1546   : > { %4422 = vmatmul.mubr.f32.gmra.mrb[70].mxu1 %v4268_v39  ;;  %8038 = vmatmul.mubr.f32.gmra.mrb[62].mxu0 %v4285_v40  ;;  %v4270_v12 = vld [vmem:[#allocation2 + $0x2f] sm:$0xff]  ;;  %v4271_v48 = vld [vmem:[#allocation2 + $0x37] sm:$0xff] }
0x1547   : > { %4426 = vmatprep.mubr.f32.mxu1 %v7995_v14  ;;  %8040 = vmatprep.mubr.f32.mxu0 %v4286_v41  ;;  %v6034_v14 = vld [vmem:[%s12392_s1 + $0x14c0] sm:$0xff]  ;;  %v6046_v9 = vld [vmem:[%s12392_s1 + $0x1510] sm:$0xff]  ;;  %v6067_v54 = vld [vmem:[%s12392_s1 + $0x15b8] sm:$0xff] }
0x1548   : > { %9221 = vmatpush3.bf16.msra.mxu1 %v9220_v17  ;;  %9249 = vmatpush3.bf16.msra.mxu0 %v9246_v38  ;;  %v4289_v47 = vld [vmem:[#allocation2 + $0x49] sm:$0xff]  ;;  %v9258_v16 = vpack.c.bf16 %v6035_v15, %v6034_v14  ;;  %v6076_v38 = vld [vmem:[%s12392_s1 + $0x1600] sm:$0xff] }
0x1549   : > { %v4287_v45 = vld [vmem:[#allocation2 + $0x39] sm:$0xff]  ;;  %v4288_v46 = vld [vmem:[#allocation2 + $0x41] sm:$0xff]  ;;  %9223 = vmatprep.subr.bf16.mxu1 %v9222_v42  ;;  %9251 = vmatprep.subr.bf16.mxu0 %v9250_v7  ;;  %v12209_v36 = vpack.c.bf16 %v6077_v35, %v6076_v38  ;;  %v6050_v55 = vld [vmem:[%s12392_s1 + $0x1530] sm:$0xff] }
0x154a   : > { %4427 = vmatmul.mubr.f32.gmra.mrb[72].mxu1 %v4269_v44  ;;  %8041 = vmatmul.mubr.f32.gmra.mrb[64].mxu0 %v4287_v45  ;;  %v4272_v50 = vld [vmem:[#allocation2 + $0x3f] sm:$0xff]  ;;  %v4273_v13 = vld [vmem:[#allocation2 + $0x47] sm:$0xff] }
0x154b   : > { %4431 = vmatprep.mubr.f32.mxu1 %v4239_v1  ;;  %8043 = vmatprep.mubr.f32.mxu0 %v4288_v46  ;;  %v6024_v1 = vld [vmem:[%s12392_s1 + $0x1470] sm:$0xff]  ;;  %v6064_v14 = vld [vmem:[%s12392_s1 + $0x15a0] sm:$0xff]  ;;  %v6065_v15 = vld [vmem:[%s12392_s1 + $0x15a8] sm:$0xff] }
0x154c   : > { %9225 = vmatpush3.bf16.msra.mxu1 %v9224_v43  ;;  %9253 = vmatpush3.bf16.msra.mxu0 %v9250_v7  ;;  %v9238_v23 = vpack.c.bf16 %v6025_v20, %v6024_v1  ;;  %v6045_v7 = vld [vmem:[%s12392_s1 + $0x1508] sm:$0xff]  ;;  %v9282_v51 = vpack.c.bf16 %v6065_v15, %v6064_v14  ;;  %v6048_v1 = vld [vmem:[%s12392_s1 + $0x1520] sm:$0xff]  ;;  %v6082_v14 = vld [vmem:[%s12392_s1 + $0x1630] sm:$0xff] }
0x154d   : > { %9227 = vmatprep.subr.bf16.mxu1 %v9226_v5  ;;  %9255 = vmatprep.subr.bf16.mxu0 %v9254_v4  ;;  %v9276_v10 = vpack.c.bf16 %v6045_v7, %v6044_v62  ;;  %v6066_v62 = vld [vmem:[%s12392_s1 + $0x15b0] sm:$0xff]  ;;  %v6083_v15 = vld [vmem:[%s12392_s1 + $0x1638] sm:$0xff] }
0x154e   : > { %4432 = vmatmul.mubr.f32.gmra.mrb[74].mxu1 %v4270_v12  ;;  %8044 = vmatmul.mubr.f32.gmra.mrb[66].mxu0 %v4289_v47 }
0x154f   : > { %4436 = vmatprep.mubr.f32.mxu1 %v12073_v0  ;;  %v9234_v0 = vpack.c.bf16 %v6023_v49, %v6022_v18 }
0x1550   : > { %9229 = vmatpush3.bf16.msra.mxu1 %v9228_v63  ;;  %9257 = vmatpush3.bf16.msra.mxu0 %v9254_v4 }
0x1551   : > { %9231 = vmatprep.subr.bf16.mxu1 %v9230_v57  ;;  %9259 = vmatprep.subr.bf16.mxu0 %v9258_v16  ;;  %v6047_v57 = vld [vmem:[%s12392_s1 + $0x1518] sm:$0xff] }
0x1552   : > { %4437 = vmatmul.mubr.f32.gmra.mrb[76].mxu1 %v4271_v48 }
0x1553   : > { %4441 = vmatprep.mubr.f32.mxu1 %v4249_v28  ;;  %v9270_v28 = vpack.c.bf16 %v6041_v60, %v6040_v27 }
0x1554   : > { %9233 = vmatpush3.bf16.msra.mxu1 %v9232_v11  ;;  %9261 = vmatpush3.bf16.msra.mxu0 %v9258_v16 }
0x1555   : > { %9235 = vmatprep.subr.bf16.mxu1 %v9234_v0  ;;  %9263 = vmatprep.subr.bf16.mxu0 %v9262_v37  ;;  %v9280_v0 = vpack.c.bf16 %v6047_v57, %v6046_v9  ;;  %v6053_v57 = vld [vmem:[%s12392_s1 + $0x1548] sm:$0xff] }
0x1556   : > { %4442 = vmatmul.mubr.f32.gmra.mrb[78].mxu1 %v4272_v50 }
0x1557   : > { %4446 = vmatprep.mubr.f32.mxu1 %v8001_v25  ;;  %v6038_v25 = vld [vmem:[%s12392_s1 + $0x14e0] sm:$0xff] }
0x1558   : > { %9237 = vmatpush3.bf16.msra.mxu1 %v9236_v19  ;;  %9265 = vmatpush3.bf16.msra.mxu0 %v9262_v37  ;;  %v9266_v26 = vpack.c.bf16 %v6039_v53, %v6038_v25 }
0x1559   : > { %9239 = vmatprep.subr.bf16.mxu1 %v9238_v23 }
0x155a   : > { %4447 = vmatmul.mubr.f32.gmra.mrb[80].mxu1 %v4273_v13  ;;  %9267 = vmatprep.subr.bf16.mxu0 %v9266_v26 }
0x155c   : > { %9241 = vmatpush3.bf16.msra.mxu1 %v9240_v24  ;;  %9269 = vmatpush3.bf16.msra.mxu0 %v9266_v26  ;;  %v9284_v26 = vpack.c.bf16 %v6049_v22, %v6048_v1  ;;  %v6072_v1 = vld [vmem:[%s12392_s1 + $0x15e0] sm:$0xff] }
0x155d   : > { %9271 = vmatprep.subr.bf16.mxu0 %v9270_v28  ;;  %9275 = vmatprep.subr.bf16.mxu1 %v9274_v34  ;;  %v6056_v22 = vld [vmem:[%s12392_s1 + $0x1560] sm:$0xff] }
0x1560   : > { %9273 = vmatpush3.bf16.msra.mxu0 %v9270_v28 }
0x1561   : > { %9307 = vmatprep.subr.bf16.mxu0 %v12209_v36 }
0x1611   : > { %v7003_v17 = vpop.f32.mrb[66].mxu1 }
0x1612   : > { %v7004_v29 = vpop.f32.mrb[67].mxu1 }
0x1613   : > { %v7005_v39 = vadd.f32 %v7004_v29, %v7003_v17 }
0x1615   : > { %v8036_v40 = vpop.f32.mrb[60].mxu0  ;;  %v7006_v41 = vpop.f32.mrb[68].mxu1  ;;  %v4414_v42 = vadd.f32 %v7005_v39, %v12215_v8 }
0x1616   : > { %v4518_v43 = vpop.f32.mrb[61].mxu0  ;;  %v7007_v44 = vpop.f32.mrb[69].mxu1 }
0x1617   : > { %v4519_v45 = vadd.f32 %v4518_v43, %v4414_v42  ;;  %v7008_v46 = vadd.f32 %v7007_v44, %v7006_v41 }
0x1619   : > { %4557 = vst [vmem:[#allocation2 + $0x10] sm:$0xff] %v4519_v45  ;;  %v4419_v47 = vadd.f32 %v7008_v46, %v12215_v8  ;;  %v7009_v12 = vpop.f32.mrb[70].mxu1  ;;  %v8039_v48 = vpop.f32.mrb[62].mxu0  ;;  %4710 = vmatprep.mubr.f32.mxu1 %v4519_v45 }
0x161a   : > { %v7010_v50 = vpop.f32.mrb[71].mxu1  ;;  %v4528_v13 = vpop.f32.mrb[63].mxu0 }
0x161b   : > { %v4524_v52 = vadd.f32 %v8036_v40, %v4419_v47  ;;  %v7011_v61 = vadd.f32 %v7010_v50, %v7009_v12 }
0x161d   : > { %4558 = vst [vmem:[#allocation2 + $0x18] sm:$0xff] %v4524_v52  ;;  %v4424_v59 = vadd.f32 %v7011_v61, %v12215_v8  ;;  %v7012_v5 = vpop.f32.mrb[72].mxu1  ;;  %v8042_v63 = vpop.f32.mrb[64].mxu0  ;;  %v6079_v61 = vld [vmem:[%s12392_s1 + $0x1618] sm:$0xff] }
0x161e   : > { %v7013_v2 = vpop.f32.mrb[73].mxu1  ;;  %v4538_v3 = vpop.f32.mrb[65].mxu0 }
0x161f   : > { %v4529_v4 = vadd.f32 %v4528_v13, %v4424_v59  ;;  %v7014_v56 = vadd.f32 %v7013_v2, %v7012_v5  ;;  %v6051_v59 = vld [vmem:[%s12392_s1 + $0x1538] sm:$0xff]  ;;  %v9286_v5 = vpack.c.bf16 %v6067_v54, %v6066_v62  ;;  %v6080_v2 = vld [vmem:[%s12392_s1 + $0x1620] sm:$0xff] }
0x1620   : > { %v4565_v11 = vld [vmem:[#allocation2 + $0xf] sm:$0xff] }
0x1621   : > { %4559 = vst [vmem:[#allocation2 + $0x20] sm:$0xff] %v4529_v4  ;;  %v4429_v18 = vadd.f32 %v7014_v56, %v12215_v8  ;;  %v7015_v16 = vpop.f32.mrb[74].mxu1  ;;  %4711 = vmatmul.mubr.f32.vlgmr.msra.gmra.mrb[82].mxu1 %v4565_v11  ;;  %v8045_v49 = vpop.f32.mrb[66].mxu0  ;;  %v6069_v56 = vld [vmem:[%s12392_s1 + $0x15c8] sm:$0xff] }
0x1622   : > { %v7016_v21 = vpop.f32.mrb[75].mxu1  ;;  %4715 = vmatprep.mubr.f32.mxu1 %v4524_v52  ;;  %v4548_v58 = vpop.f32.mrb[67].mxu0  ;;  %9277 = vmatpush3.bf16.msra.mxu1 %v9276_v10  ;;  %v6068_v10 = vld [vmem:[%s12392_s1 + $0x15c0] sm:$0xff] }
0x1623   : > { %v4534_v19 = vadd.f32 %v8039_v48, %v4429_v18  ;;  %v7017_v33 = vadd.f32 %v7016_v21, %v7015_v16  ;;  %9279 = vmatprep.subr.bf16.mxu1 %v9278_v6  ;;  %v6052_v6 = vld [vmem:[%s12392_s1 + $0x1540] sm:$0xff]  ;;  %v9290_v9 = vpack.c.bf16 %v6069_v56, %v6068_v10  ;;  %v6070_v18 = vld [vmem:[%s12392_s1 + $0x15d0] sm:$0xff]  ;;  %v9318_v16 = vpack.c.bf16 %v6083_v15, %v6082_v14 }
0x1624   : > { %v4581_v37 = vld [vmem:[#allocation2 + $0x11] sm:$0xff]  ;;  %v9292_v11 = vpack.c.bf16 %v6053_v57, %v6052_v6 }
0x1625   : > { %v4566_v20 = vld [vmem:[#allocation2 + $0x17] sm:$0xff]  ;;  %4560 = vst [vmem:[#allocation2 + $0x28] sm:$0xff] %v4534_v19  ;;  %v4434_v31 = vadd.f32 %v7017_v33, %v12215_v8  ;;  %v7018_v23 = vpop.f32.mrb[76].mxu1  ;;  %8078 = vmatprep.mubr.f32.mxu0 %v4581_v37  ;;  %v6084_v33 = vld [vmem:[%s12392_s1 + $0x1640] sm:$0xff] }
0x1626   : > { %4716 = vmatmul.mubr.f32.gmra.mrb[84].mxu1 %v4566_v20  ;;  %v7019_v24 = vpop.f32.mrb[77].mxu1  ;;  %v6054_v21 = vld [vmem:[%s12392_s1 + $0x1550] sm:$0xff]  ;;  %v6073_v20 = vld [vmem:[%s12392_s1 + $0x15e8] sm:$0xff] }
0x1627   : > { %4720 = vmatprep.mubr.f32.mxu1 %v4529_v4  ;;  %9281 = vmatpush3.bf16.msra.mxu1 %v9280_v0  ;;  %v4539_v25 = vadd.f32 %v4538_v3, %v4434_v31  ;;  %v7020_v53 = vadd.f32 %v7019_v24, %v7018_v23  ;;  %v6081_v3 = vld [vmem:[%s12392_s1 + $0x1628] sm:$0xff]  ;;  %v9298_v23 = vpack.c.bf16 %v6073_v20, %v6072_v1 }
0x1628   : > { %9283 = vmatprep.subr.bf16.mxu1 %v9282_v51  ;;  %v4582_v27 = vld [vmem:[#allocation2 + $0x19] sm:$0xff]  ;;  %v9314_v4 = vpack.c.bf16 %v6081_v3, %v6080_v2  ;;  %v6085_v51 = vld [vmem:[%s12392_s1 + $0x1648] sm:$0xff] }
0x1629   : > { %v4567_v60 = vld [vmem:[#allocation2 + $0x1f] sm:$0xff]  ;;  %4561 = vst [vmem:[#allocation2 + $0x30] sm:$0xff] %v4539_v25  ;;  %v4439_v28 = vadd.f32 %v7020_v53, %v12215_v8  ;;  %v7021_v30 = vpop.f32.mrb[78].mxu1  ;;  %8079 = vmatmul.mubr.f32.vlgmr.msra.gmra.mrb[68].mxu0 %v4582_v27  ;;  %v9322_v37 = vpack.c.bf16 %v6085_v51, %v6084_v33  ;;  %v6057_v31 = vld [vmem:[%s12392_s1 + $0x1568] sm:$0xff] }
0x162a   : > { %4721 = vmatmul.mubr.f32.gmra.mrb[86].mxu1 %v4567_v60  ;;  %v7022_v32 = vpop.f32.mrb[79].mxu1  ;;  %9309 = vmatpush3.bf16.msra.mxu0 %v12209_v36  ;;  %v9300_v24 = vpack.c.bf16 %v6057_v31, %v6056_v22  ;;  %v6087_v53 = vld [vmem:[%s12392_s1 + $0x1658] sm:$0xff] }
0x162b   : > { %4725 = vmatprep.mubr.f32.mxu1 %v4534_v19  ;;  %v4544_v34 = vadd.f32 %v8042_v63, %v4439_v28  ;;  %v7023_v38 = vadd.f32 %v7022_v32, %v7021_v30  ;;  %9285 = vmatpush3.bf16.msra.mxu1 %v9284_v26  ;;  %v9288_v63 = vpack.c.bf16 %v6051_v59, %v6050_v55  ;;  %v6074_v26 = vld [vmem:[%s12392_s1 + $0x15f0] sm:$0xff]  ;;  %v6075_v60 = vld [vmem:[%s12392_s1 + $0x15f8] sm:$0xff] }
0x162c   : > { %v4583_v35 = vld [vmem:[#allocation2 + $0x21] sm:$0xff]  ;;  %9287 = vmatprep.subr.bf16.mxu1 %v9286_v5  ;;  %v6058_v28 = vld [vmem:[%s12392_s1 + $0x1570] sm:$0xff]  ;;  %v6059_v30 = vld [vmem:[%s12392_s1 + $0x1578] sm:$0xff]  ;;  %v9302_v32 = vpack.c.bf16 %v6075_v60, %v6074_v26 }
0x162d   : > { %v4568_v17 = vld [vmem:[#allocation2 + $0x27] sm:$0xff]  ;;  %4562 = vst [vmem:[#allocation2 + $0x38] sm:$0xff] %v4544_v34  ;;  %v4444_v29 = vadd.f32 %v7023_v38, %v12215_v8  ;;  %v7024_v39 = vpop.f32.mrb[80].mxu1  ;;  %8081 = vmatprep.mubr.f32.mxu0 %v4583_v35 }
0x162e   : > { %4726 = vmatmul.mubr.f32.gmra.mrb[88].mxu1 %v4568_v17  ;;  %v7025_v40 = vpop.f32.mrb[81].mxu1  ;;  %v6088_v38 = vld [vmem:[%s12392_s1 + $0x1660] sm:$0xff]  ;;  %v6089_v35 = vld [vmem:[%s12392_s1 + $0x1668] sm:$0xff] }
0x162f   : > { %4730 = vmatprep.mubr.f32.mxu1 %v4539_v25  ;;  %v4549_v41 = vadd.f32 %v4548_v58, %v4444_v29  ;;  %v7026_v42 = vadd.f32 %v7025_v40, %v7024_v39  ;;  %9289 = vmatpush3.bf16.msra.mxu1 %v9288_v63  ;;  %v6055_v58 = vld [vmem:[%s12392_s1 + $0x1558] sm:$0xff]  ;;  %v6086_v25 = vld [vmem:[%s12392_s1 + $0x1650] sm:$0xff]  ;;  %v9330_v17 = vpack.c.bf16 %v6089_v35, %v6088_v38 }
0x1630   : > { %v4584_v43 = vld [vmem:[#allocation2 + $0x29] sm:$0xff]  ;;  %9291 = vmatprep.subr.bf16.mxu1 %v9290_v9  ;;  %v9296_v19 = vpack.c.bf16 %v6055_v58, %v6054_v21  ;;  %v9326_v27 = vpack.c.bf16 %v6087_v53, %v6086_v25  ;;  %v6091_v39 = vld [vmem:[%s12392_s1 + $0x1678] sm:$0xff] }
0x1631   : > { %v4569_v44 = vld [vmem:[#allocation2 + $0x2f] sm:$0xff]  ;;  %4563 = vst [vmem:[#allocation2 + $0x40] sm:$0xff] %v4549_v41  ;;  %v4449_v36 = vadd.f32 %v7026_v42, %v12215_v8  ;;  %8082 = vmatmul.mubr.f32.gmra.mrb[70].mxu0 %v4584_v43 }
0x1632   : > { %4731 = vmatmul.mubr.f32.gmra.mrb[90].mxu1 %v4569_v44  ;;  %v6078_v8 = vld [vmem:[%s12392_s1 + $0x1610] sm:$0xff] }
0x1633   : > { %4735 = vmatprep.mubr.f32.mxu1 %v4544_v34  ;;  %v4554_v45 = vadd.f32 %v8045_v49, %v4449_v36  ;;  %v9310_v7 = vpack.c.bf16 %v6079_v61, %v6078_v8  ;;  %9293 = vmatpush3.bf16.msra.mxu1 %v9292_v11  ;;  %v6071_v49 = vld [vmem:[%s12392_s1 + $0x15d8] sm:$0xff]  ;;  %v9304_v34 = vpack.c.bf16 %v6059_v30, %v6058_v28  ;;  %v6090_v29 = vld [vmem:[%s12392_s1 + $0x1670] sm:$0xff] }
0x1634   : > { %v4585_v46 = vld [vmem:[#allocation2 + $0x31] sm:$0xff]  ;;  %v9294_v0 = vpack.c.bf16 %v6071_v49, %v6070_v18  ;;  %v9334_v40 = vpack.c.bf16 %v6091_v39, %v6090_v29 }
0x1635   : > { %v4570_v47 = vld [vmem:[#allocation2 + $0x37] sm:$0xff]  ;;  %4564 = vst [vmem:[#allocation2 + $0x48] sm:$0xff] %v4554_v45  ;;  %8084 = vmatprep.mubr.f32.mxu0 %v4585_v46  ;;  %9311 = vmatprep.subr.bf16.mxu0 %v9310_v7 }
0x1636   : > { %4736 = vmatmul.mubr.f32.gmra.mrb[92].mxu1 %v4570_v47  ;;  %9313 = vmatpush3.bf16.msra.mxu0 %v9310_v7 }
0x1637   : > { %4740 = vmatprep.mubr.f32.mxu1 %v4549_v41  ;;  %9315 = vmatprep.subr.bf16.mxu0 %v9314_v4 }
0x1638   : > { %v4586_v12 = vld [vmem:[#allocation2 + $0x39] sm:$0xff]  ;;  %9295 = vmatprep.subr.bf16.mxu1 %v9294_v0 }
0x1639   : > { %v4571_v48 = vld [vmem:[#allocation2 + $0x3f] sm:$0xff]  ;;  %8085 = vmatmul.mubr.f32.gmra.mrb[72].mxu0 %v4586_v12  ;;  %9297 = vmatpush3.bf16.msra.mxu1 %v9296_v19 }
0x163a   : > { %4741 = vmatmul.mubr.f32.gmra.mrb[94].mxu1 %v4571_v48  ;;  %9317 = vmatpush3.bf16.msra.mxu0 %v9314_v4 }
0x163b   : > { %4745 = vmatprep.mubr.f32.mxu1 %v4554_v45  ;;  %9319 = vmatprep.subr.bf16.mxu0 %v9318_v16  ;;  %v12361_v45 = vld [vmem:[%s12393_s2 + $0xd] ss:$0 sm:$0xff] }
0x163c   : > { %v4587_v50 = vld [vmem:[#allocation2 + $0x41] sm:$0xff]  ;;  %v4588_v52 = vld [vmem:[#allocation2 + $0x49] sm:$0xff]  ;;  %9299 = vmatprep.subr.bf16.mxu1 %v9298_v23 }
0x163d   : > { %v4572_v13 = vld [vmem:[#allocation2 + $0x47] sm:$0xff]  ;;  %8087 = vmatprep.mubr.f32.mxu0 %v4587_v50  ;;  %9301 = vmatpush3.bf16.msra.mxu1 %v9300_v24 }
0x163e   : > { %4746 = vmatmul.mubr.f32.gmra.mrb[96].mxu1 %v4572_v13  ;;  %8088 = vmatmul.mubr.f32.gmra.mrb[74].mxu0 %v4588_v52 }
0x163f   : > { %9321 = vmatpush3.bf16.msra.mxu0 %v9318_v16  ;;  %9303 = vmatprep.subr.bf16.mxu1 %v9302_v32 }
0x1640   : > { %9323 = vmatprep.subr.bf16.mxu0 %v9322_v37 }
0x1641   : > { %9305 = vmatpush3.bf16.msra.mxu1 %v9304_v34 }
0x1643   : > { %9325 = vmatpush3.bf16.msra.mxu0 %v9322_v37 }
0x1644   : > { %9327 = vmatprep.subr.bf16.mxu0 %v9326_v27 }
0x1647   : > { %9329 = vmatpush3.bf16.msra.mxu0 %v9326_v27 }
0x1648   : > { %9331 = vmatprep.subr.bf16.mxu0 %v9330_v17 }
0x164b   : > { %9333 = vmatpush3.bf16.msra.mxu0 %v9330_v17 }
0x164c   : > { %9335 = vmatprep.subr.bf16.mxu0 %v9334_v40 }
0x164f   : > { %9337 = vmatpush3.bf16.msra.mxu0 %v9334_v40 }
0x16f4   : > { %v7083_v41 = vpop.f32.mrb[82].mxu1 }
0x16f5   : > { %v7084_v42 = vpop.f32.mrb[83].mxu1 }
0x16f6   : > { %v7085_v43 = vadd.f32 %v7084_v42, %v7083_v41 }
0x16f8   : > { %v4713_v50 = vadd.f32 %v7085_v43, %v12361_v45 }
0x16f9   : > { %v7086_v44 = vpop.f32.mrb[84].mxu1 }
0x16fa   : > { %v7087_v36 = vpop.f32.mrb[85].mxu1 }
0x16fb   : > { %v7088_v46 = vadd.f32 %v7087_v36, %v7086_v44 }
0x16fc   : > { %v8080_v12 = vpop.f32.mrb[68].mxu0 }
0x16fd   : > { %v4718_v47 = vadd.f32 %v7088_v46, %v12361_v45  ;;  %v7089_v48 = vpop.f32.mrb[86].mxu1  ;;  %v4817_v13 = vpop.f32.mrb[69].mxu0 }
0x16fe   : > { %v7090_v52 = vpop.f32.mrb[87].mxu1  ;;  %v4818_v61 = vadd.f32 %v4817_v13, %v4713_v50 }
0x16ff   : > { %v4823_v8 = vadd.f32 %v8080_v12, %v4718_v47  ;;  %v7091_v62 = vadd.f32 %v7090_v52, %v7089_v48 }
0x1700   : > { %v4856_v54 = vmax.f32 %v4818_v61, 0.0  ;;  %v6093_v61 = vld [vmem:[%s12393_s2 + $0xe] ss:$0 sm:$0xff] }
0x1701   : > { %v4857_v7 = vmax.f32 %v4823_v8, 0.0  ;;  %v7092_v55 = vpop.f32.mrb[88].mxu1  ;;  %v4723_v10 = vadd.f32 %v7091_v62, %v12361_v45 }
0x1702   : > { %v7093_v59 = vpop.f32.mrb[89].mxu1  ;;  %4864 = vst [vmem:[#allocation2 + $0x10] sm:$0xff] %v4856_v54  ;;  %5017 = vmatprep.mubr.f32.mxu1 %v4856_v54 }
0x1703   : > { %4865 = vst [vmem:[#allocation2 + $0x18] sm:$0xff] %v4857_v7  ;;  %v7094_v5 = vadd.f32 %v7093_v59, %v7092_v55 }
0x1704   : > { %v8083_v2 = vpop.f32.mrb[70].mxu0 }
0x1705   : > { %v4728_v63 = vadd.f32 %v7094_v5, %v12361_v45  ;;  %v7095_v3 = vpop.f32.mrb[90].mxu1  ;;  %v4827_v4 = vpop.f32.mrb[71].mxu0 }
0x1706   : > { %v7096_v56 = vpop.f32.mrb[91].mxu1  ;;  %v4828_v9 = vadd.f32 %v4827_v4, %v4723_v10 }
0x1707   : > { %v4833_v6 = vadd.f32 %v8083_v2, %v4728_v63  ;;  %v7097_v57 = vadd.f32 %v7096_v56, %v7095_v3 }
0x1708   : > { %v4858_v14 = vmax.f32 %v4828_v9, 0.0 }
0x1709   : > { %v4859_v11 = vmax.f32 %v4833_v6, 0.0  ;;  %v7098_v15 = vpop.f32.mrb[92].mxu1  ;;  %v4872_v16 = vld [vmem:[#allocation2 + $0xf] sm:$0xff]  ;;  %v4733_v33 = vadd.f32 %v7097_v57, %v12361_v45 }
0x170a   : > { %v7099_v18 = vpop.f32.mrb[93].mxu1  ;;  %v4888_v49 = vld [vmem:[#allocation2 + $0x11] sm:$0xff]  ;;  %4866 = vst [vmem:[#allocation2 + $0x20] sm:$0xff] %v4858_v14  ;;  %5018 = vmatmul.mubr.f32.vlgmr.msra.gmra.mrb[98].mxu1 %v4872_v16 }
0x170b   : > { %4867 = vst [vmem:[#allocation2 + $0x28] sm:$0xff] %v4859_v11  ;;  %v7100_v21 = vadd.f32 %v7099_v18, %v7098_v15  ;;  %8122 = vmatprep.mubr.f32.mxu0 %v4888_v49  ;;  %5022 = vmatprep.mubr.f32.mxu1 %v4857_v7  ;;  %v4873_v37 = vld [vmem:[#allocation2 + $0x17] sm:$0xff] }
0x170c   : > { %v8086_v0 = vpop.f32.mrb[72].mxu0 }
0x170d   : > { %v4738_v58 = vadd.f32 %v7100_v21, %v12361_v45  ;;  %v7101_v19 = vpop.f32.mrb[94].mxu1  ;;  %v4837_v51 = vpop.f32.mrb[73].mxu0 }
0x170e   : > { %v7102_v1 = vpop.f32.mrb[95].mxu1  ;;  %v4838_v22 = vadd.f32 %v4837_v51, %v4733_v33  ;;  %5023 = vmatmul.mubr.f32.gmra.mrb[100].mxu1 %v4873_v37 }
0x170f   : > { %v4843_v20 = vadd.f32 %v8086_v0, %v4738_v58  ;;  %v7103_v31 = vadd.f32 %v7102_v1, %v7101_v19  ;;  %5027 = vmatprep.mubr.f32.mxu1 %v4858_v14 }
0x1710   : > { %v4860_v24 = vmax.f32 %v4838_v22, 0.0 }
0x1711   : > { %v4861_v23 = vmax.f32 %v4843_v20, 0.0  ;;  %v7104_v25 = vpop.f32.mrb[96].mxu1  ;;  %v4743_v53 = vadd.f32 %v7103_v31, %v12361_v45  ;;  %v8089_v26 = vpop.f32.mrb[74].mxu0  ;;  %v4889_v60 = vld [vmem:[#allocation2 + $0x19] sm:$0xff] }
0x1712   : > { %v7105_v27 = vpop.f32.mrb[97].mxu1  ;;  %v4874_v28 = vld [vmem:[#allocation2 + $0x1f] sm:$0xff]  ;;  %4868 = vst [vmem:[#allocation2 + $0x30] sm:$0xff] %v4860_v24  ;;  %v4847_v34 = vpop.f32.mrb[75].mxu0  ;;  %8123 = vmatmul.mubr.f32.vlgmr.msra.gmra.mrb[76].mxu0 %v4889_v60  ;;  %v4875_v29 = vld [vmem:[#allocation2 + $0x27] sm:$0xff] }
0x1713   : > { %v4890_v30 = vld [vmem:[#allocation2 + $0x21] sm:$0xff]  ;;  %4869 = vst [vmem:[#allocation2 + $0x38] sm:$0xff] %v4861_v23  ;;  %v7106_v32 = vadd.f32 %v7105_v27, %v7104_v25  ;;  %5028 = vmatmul.mubr.f32.gmra.mrb[102].mxu1 %v4874_v28  ;;  %v4848_v38 = vadd.f32 %v4847_v34, %v4743_v53 }
0x1714   : > { %8125 = vmatprep.mubr.f32.mxu0 %v4890_v30  ;;  %5032 = vmatprep.mubr.f32.mxu1 %v4859_v11 }
0x1715   : > { %v4748_v35 = vadd.f32 %v7106_v32, %v12361_v45  ;;  %v4862_v17 = vmax.f32 %v4848_v38, 0.0 }
0x1717   : > { %v4853_v39 = vadd.f32 %v8089_v26, %v4748_v35  ;;  %5033 = vmatmul.mubr.f32.gmra.mrb[104].mxu1 %v4875_v29  ;;  %4870 = vst [vmem:[#allocation2 + $0x40] sm:$0xff] %v4862_v17 }
0x1718   : > { %5037 = vmatprep.mubr.f32.mxu1 %v4860_v24 }
0x1719   : > { %v4863_v40 = vmax.f32 %v4853_v39, 0.0  ;;  %v4891_v41 = vld [vmem:[#allocation2 + $0x29] sm:$0xff] }
0x171a   : > { %v4876_v42 = vld [vmem:[#allocation2 + $0x2f] sm:$0xff]  ;;  %8126 = vmatmul.mubr.f32.gmra.mrb[78].mxu0 %v4891_v41  ;;  %v4877_v44 = vld [vmem:[#allocation2 + $0x37] sm:$0xff] }
0x171b   : > { %v4892_v43 = vld [vmem:[#allocation2 + $0x31] sm:$0xff]  ;;  %4871 = vst [vmem:[#allocation2 + $0x48] sm:$0xff] %v4863_v40  ;;  %5038 = vmatmul.mubr.f32.gmra.mrb[106].mxu1 %v4876_v42 }
0x171c   : > { %8128 = vmatprep.mubr.f32.mxu0 %v4892_v43  ;;  %5042 = vmatprep.mubr.f32.mxu1 %v4861_v23 }
0x171e   : > { %v4893_v36 = vld [vmem:[#allocation2 + $0x39] sm:$0xff] }
0x171f   : > { %5043 = vmatmul.mubr.f32.gmra.mrb[108].mxu1 %v4877_v44  ;;  %8129 = vmatmul.mubr.f32.gmra.mrb[80].mxu0 %v4893_v36  ;;  %v4878_v45 = vld [vmem:[#allocation2 + $0x3f] sm:$0xff] }
0x1720   : > { %5047 = vmatprep.mubr.f32.mxu1 %v4862_v17 }
0x1722   : > { %v4894_v46 = vld [vmem:[#allocation2 + $0x41] sm:$0xff]  ;;  %v4895_v47 = vld [vmem:[#allocation2 + $0x49] sm:$0xff] }
0x1723   : > { %5048 = vmatmul.mubr.f32.gmra.mrb[110].mxu1 %v4878_v45  ;;  %8131 = vmatprep.mubr.f32.mxu0 %v4894_v46  ;;  %v4879_v12 = vld [vmem:[#allocation2 + $0x47] sm:$0xff] }
0x1724   : > { %5052 = vmatprep.mubr.f32.mxu1 %v4863_v40  ;;  %8132 = vmatmul.mubr.f32.gmra.mrb[82].mxu0 %v4895_v47 }
0x1727   : > { %5053 = vmatmul.mubr.f32.gmra.mrb[112].mxu1 %v4879_v12 }
0x17dd   : > { %v7163_v48 = vpop.f32.mrb[98].mxu1 }
0x17de   : > { %v7164_v50 = vpop.f32.mrb[99].mxu1 }
0x17df   : > { %v7165_v13 = vadd.f32 %v7164_v50, %v7163_v48 }
0x17e1   : > { %v7166_v52 = vpop.f32.mrb[100].mxu1  ;;  %v5020_v59 = vadd.f32 %v7165_v13, %v6093_v61 }
0x17e2   : > { %v7167_v8 = vpop.f32.mrb[101].mxu1 }
0x17e3   : > { %v7168_v62 = vadd.f32 %v7167_v8, %v7166_v52 }
0x17e5   : > { %v5025_v7 = vadd.f32 %v7168_v62, %v6093_v61  ;;  %v8124_v54 = vpop.f32.mrb[76].mxu0 }
0x17e6   : > { %v7169_v55 = vpop.f32.mrb[102].mxu1  ;;  %v5124_v5 = vpop.f32.mrb[77].mxu0 }
0x17e7   : > { %v7170_v63 = vpop.f32.mrb[103].mxu1  ;;  %v5130_v2 = vadd.f32 %v8124_v54, %v5025_v7  ;;  %v5125_v3 = vadd.f32 %v5124_v5, %v5020_v59 }
0x17e8   : > { %v7171_v10 = vadd.f32 %v7170_v63, %v7169_v55 }
0x17e9   : > { %5164 = vst [vmem:[%s12378_s9 + $0x8] sm:$0xff] %v5130_v2  ;;  %5163 = vst [vmem:[%s12378_s9] sm:$0xff] %v5125_v3 }
0x17ea   : > { %v7172_v4 = vpop.f32.mrb[104].mxu1  ;;  %v5030_v14 = vadd.f32 %v7171_v10, %v6093_v61 }
0x17eb   : > { %v7173_v56 = vpop.f32.mrb[105].mxu1 }
0x17ec   : > { %v7174_v6 = vadd.f32 %v7173_v56, %v7172_v4 }
0x17ed   : > { %v8127_v57 = vpop.f32.mrb[78].mxu0 }
0x17ee   : > { %v5035_v9 = vadd.f32 %v7174_v6, %v6093_v61  ;;  %v7175_v11 = vpop.f32.mrb[106].mxu1  ;;  %v5134_v15 = vpop.f32.mrb[79].mxu0 }
0x17ef   : > { %v7176_v18 = vpop.f32.mrb[107].mxu1  ;;  %v5135_v49 = vadd.f32 %v5134_v15, %v5030_v14 }
0x17f0   : > { %v5140_v16 = vadd.f32 %v8127_v57, %v5035_v9  ;;  %v7177_v21 = vadd.f32 %v7176_v18, %v7175_v11 }
0x17f1   : > { %5165 = vst [vmem:[%s12378_s9 + $0x10] sm:$0xff] %v5135_v49 }
0x17f2   : > { %5166 = vst [vmem:[%s12378_s9 + $0x18] sm:$0xff] %v5140_v16  ;;  %v7178_v58 = vpop.f32.mrb[108].mxu1  ;;  %v5040_v0 = vadd.f32 %v7177_v21, %v6093_v61  ;;  %v8130_v19 = vpop.f32.mrb[80].mxu0 }
0x17f3   : > { %v7179_v33 = vpop.f32.mrb[109].mxu1  ;;  %v5144_v1 = vpop.f32.mrb[81].mxu0 }
0x17f4   : > { %v7180_v51 = vadd.f32 %v7179_v33, %v7178_v58  ;;  %v5145_v37 = vadd.f32 %v5144_v1, %v5040_v0 }
0x17f6   : > { %v5045_v20 = vadd.f32 %v7180_v51, %v6093_v61  ;;  %v7181_v22 = vpop.f32.mrb[110].mxu1  ;;  %5167 = vst [vmem:[%s12378_s9 + $0x20] sm:$0xff] %v5145_v37 }
0x17f7   : > { %v7182_v31 = vpop.f32.mrb[111].mxu1  ;;  %v8133_v23 = vpop.f32.mrb[82].mxu0 }
0x17f8   : > { %v5150_v24 = vadd.f32 %v8130_v19, %v5045_v20  ;;  %v7183_v25 = vadd.f32 %v7182_v31, %v7181_v22  ;;  %v5154_v53 = vpop.f32.mrb[83].mxu0 }
0x17fa   : > { %5168 = vst [vmem:[%s12378_s9 + $0x28] sm:$0xff] %v5150_v24  ;;  %v5050_v26 = vadd.f32 %v7183_v25, %v6093_v61  ;;  %v7184_v27 = vpop.f32.mrb[112].mxu1 }
0x17fb   : > { %v7185_v60 = vpop.f32.mrb[113].mxu1 }
0x17fc   : > { %v5155_v28 = vadd.f32 %v5154_v53, %v5050_v26  ;;  %v7186_v30 = vadd.f32 %v7185_v60, %v7184_v27 }
0x17fe   : > { %5169 = vst [vmem:[%s12378_s9 + $0x30] sm:$0xff] %v5155_v28  ;;  %v5055_v32 = vadd.f32 %v7186_v30, %v6093_v61 }
0x1800   : > { %v5160_v34 = vadd.f32 %v8133_v23, %v5055_v32 }
0x1802   : > { %5170 = vst [vmem:[%s12378_s9 + $0x38] sm:$0xff] %v5160_v34 }
0x1803 PF: > { %s15_s18 = sadd.s32 1, %s9358_s18  }
0x1804   : > { %p12_p4 = scmp.ge.s32.totalorder %s15_s18, 4  }
0x1806   :  { %14 = sbr.rel (!%p12_p4) target bundleno = 1 (0x1), region = 114 }

</bundles_post_ra>
